<compile_context>
chip_gen: v6e
topology: v6e:2x2x1
jax: 0.10.0
libtpu: 0.0.40
codegen_flags: <defaults>
</compile_context>

<pallas_src>
import functools

import jax
import jax.numpy as jnp
from jax.experimental import pallas as pl
from jax.experimental.pallas import tpu as pltpu


# --------------------------------------------------------------------------- #
# Kernel                                                                       #
# --------------------------------------------------------------------------- #
def qnetwork_kernel(state_ref,   # (TB, 3)    f32   streamed batch tile
                    action_ref,  # (TB, 1)    f32   streamed batch tile
                    ws_ref,      # (3, 64)    f32   fc_s weight (in, out)
                    bs_ref,      # (1, 64)    f32
                    wa_ref,      # (1, 64)    f32   fc_a weight (in, out)
                    ba_ref,      # (1, 64)    f32
                    w1s_ref,     # (64, 128)  bf16  fc1 rows fed by the state branch
                    w1a_ref,     # (64, 128)  bf16  fc1 rows fed by the action branch
                    b1_ref,      # (1, 128)   ew_dtype
                    w2_ref,      # (128, 64)  bf16
                    b2_ref,      # (1, 64)    ew_dtype
                    wo_ref,      # (1, 64)    f32   out.weight as a row (VPU use)
                    bo_ref,      # (1,)       f32   out.bias, SMEM scalar
                    out_ref,     # (TB, 1)    f32
                    *, ew_dtype):
    s = state_ref[...]                                             # (TB, 3) f32
    a = action_ref[...]                                            # (TB, 1) f32

    # --- Layer 1 (block-diagonal fc_s | fc_a), kept in f32: K=3 / K=1 is free ---
    h_s = jnp.dot(s, ws_ref[...],
                  preferred_element_type=jnp.float32) + bs_ref[...]   # (TB, 64)
    h_a = a * wa_ref[...] + ba_ref[...]                                # (TB, 64) outer product, VPU
    h_s = jnp.maximum(h_s, 0.0).astype(jnp.bfloat16)
    h_a = jnp.maximum(h_a, 0.0).astype(jnp.bfloat16)

    # --- fc1: split over the two halves of its input dim -> no concat needed ---
    q = (jnp.dot(h_s, w1s_ref[...], preferred_element_type=jnp.float32)
         + jnp.dot(h_a, w1a_ref[...], preferred_element_type=jnp.float32))
    # Cast right after the MXU pop; bias + ReLU run in ew_dtype (bf16 on v6e/v7x).
    q = jnp.maximum(q.astype(ew_dtype) + b1_ref[...], 0).astype(jnp.bfloat16)  # (TB, 128)

    # --- fc2 ---
    q = jnp.dot(q, w2_ref[...], preferred_element_type=jnp.float32)
    q = jnp.maximum(q.astype(ew_dtype) + b2_ref[...], 0)                        # (TB, 64)

    # --- out: 64 -> 1 on VPU + lane reduce, in f32 (an N=1 MXU matmul wastes 255/256 cols) ---
    qf = q.astype(jnp.float32)
    out_ref[...] = (jnp.sum(qf * wo_ref[...], axis=-1, keepdims=True)
                    + bo_ref[0]).astype(out_ref.dtype)                          # (TB, 1)


# --------------------------------------------------------------------------- #
# Host-side helpers                                                            #
# --------------------------------------------------------------------------- #
def _round_up(x, m):
    return ((x + m - 1) // m) * m


def _device_hints():
    """Return (tensorcores_per_device, elementwise_dtype) for the current backend."""
    kind = ""
    try:
        kind = jax.devices()[0].device_kind.lower()
    except Exception:
        pass
    # v5e has no bf16 VPU: keep elementwise math in f32 there.
    is_v5e = ("v5 lite" in kind) or ("v5e" in kind) or ("v5litepod" in kind)
    # v7x (and v4 megacore) expose 2 TensorCores per device; give the grid at least
    # one step per core so dimension_semantics=("parallel",) can shard the batch.
    n_cores = 2 if ("v7" in kind or "7x" in kind or "v4" in kind) else 1
    ew_dtype = jnp.float32 if is_v5e else jnp.bfloat16
    return n_cores, ew_dtype


def _choose_tiling(batch, n_cores, max_tile=4096):
    """Pick (tile_b, n_steps): as few grid steps as possible (1 on single-TC chips),
    a multiple of n_cores steps on multi-TC chips, tiles capped so VMEM stays sane."""
    n_steps = max(n_cores, -(-batch // max_tile))
    if n_cores > 1 and n_steps % n_cores:
        n_steps = _round_up(n_steps, n_cores)
    tile = _round_up(-(-batch // n_steps), 128)
    n_steps = -(-batch // tile)
    return tile, n_steps


def _vmem_limit_bytes(tile_b):
    # Narrow (tile,<=3) input / (tile,1) output buffers are lane-padded to 128 in VMEM
    # (~512 B/row each, double-buffered) plus ~2 KB/row of live intermediates.
    est = tile_b * (8 * 1024) + (8 << 20)
    return int(min(56 << 20, max(32 << 20, est)))   # cap below v7x's 64 MiB physical VMEM


def pack_params(p, *, ew_dtype=jnp.bfloat16):
    """Repack (in, out)-layout params into the kernel's layout / dtypes (done once)."""
    mm = jnp.bfloat16   # MXU operand dtype for the 128-wide layers (fine on v5e/v6e/v7x)
    return dict(
        ws=p["ws"].astype(jnp.float32),                    # (3, 64)
        bs=p["bs"].astype(jnp.float32),                    # (1, 64)
        wa=p["wa"].astype(jnp.float32),                    # (1, 64)
        ba=p["ba"].astype(jnp.float32),                    # (1, 64)
        w1s=p["w1"][:64, :].astype(mm),                    # (64, 128) state half of fc1
        w1a=p["w1"][64:, :].astype(mm),                    # (64, 128) action half of fc1
        b1=p["b1"].astype(ew_dtype),                       # (1, 128)
        w2=p["w2"].astype(mm),                             # (128, 64)
        b2=p["b2"].astype(ew_dtype),                       # (1, 64)
        wo=p["wo"].reshape(1, -1).astype(jnp.float32),     # (1, 64)
        bo=p["bo"].reshape((1,)).astype(jnp.float32),      # (1,)
    )


def qnetwork_forward(state, action, packed, *, ew_dtype=jnp.bfloat16, n_cores=1,
                     tile_b=None, max_tile=4096):
    B = state.shape[0]
    if tile_b is None:
        tile_b, n_steps = _choose_tiling(B, n_cores, max_tile)
    else:
        n_steps = -(-B // tile_b)

    state = state.astype(jnp.float32)
    action = action.astype(jnp.float32)

    kernel = functools.partial(qnetwork_kernel, ew_dtype=ew_dtype)

    def resident(shape):
        # Whole weight/bias as one block; same block index every step -> stays in VMEM.
        return pl.BlockSpec(shape, lambda i: (0, 0))

    return pl.pallas_call(
        kernel,
        out_shape=jax.ShapeDtypeStruct((B, 1), jnp.float32),
        grid=(n_steps,),
        in_specs=[
            pl.BlockSpec((tile_b, 3), lambda i: (i, 0)),   # state tile   (streamed)
            pl.BlockSpec((tile_b, 1), lambda i: (i, 0)),   # action tile  (streamed)
            resident((3, 64)),     # ws
            resident((1, 64)),     # bs
            resident((1, 64)),     # wa
            resident((1, 64)),     # ba
            resident((64, 128)),   # w1 (state half)
            resident((64, 128)),   # w1 (action half)
            resident((1, 128)),    # b1
            resident((128, 64)),   # w2
            resident((1, 64)),     # b2
            resident((1, 64)),     # wo
            pl.BlockSpec(memory_space=pltpu.MemorySpace.SMEM),   # bo scalar
        ],
        out_specs=pl.BlockSpec((tile_b, 1), lambda i: (i, 0)),
        compiler_params=pltpu.CompilerParams(
            dimension_semantics=("parallel",),
            vmem_limit_bytes=_vmem_limit_bytes(tile_b)),
    )(state, action,
      packed["ws"], packed["bs"], packed["wa"], packed["ba"],
      packed["w1s"], packed["w1a"], packed["b1"],
      packed["w2"], packed["b2"], packed["wo"], packed["bo"])


# --------------------------------------------------------------------------- #
# Reference / init / demo                                                      #
# --------------------------------------------------------------------------- #
def init_params(key):
    """Deterministic init mimicking PyTorch nn.Linear default (uniform +-1/sqrt(fan_in)).
    Weights stored as (in, out); biases as (1, out)."""
    def linear(key, fan_in, fan_out):
        kw, kb = jax.random.split(key)
        bound = 1.0 / jnp.sqrt(float(fan_in))
        w = jax.random.uniform(kw, (fan_in, fan_out), jnp.float32, -bound, bound)
        b = jax.random.uniform(kb, (1, fan_out), jnp.float32, -bound, bound)
        return w, b

    ks = jax.random.split(key, 5)
    ws, bs = linear(ks[0], 3, 64)      # fc_s
    wa, ba = linear(ks[1], 1, 64)      # fc_a
    w1, b1 = linear(ks[2], 128, 128)   # fc1
    w2, b2 = linear(ks[3], 128, 64)    # fc2
    wo, bo = linear(ks[4], 64, 1)      # out
    return dict(ws=ws, bs=bs, wa=wa, ba=ba,
                w1=w1, b1=b1, w2=w2, b2=b2, wo=wo, bo=bo)


def qnetwork_reference(state, action, p):
    h1 = jnp.maximum(state @ p["ws"] + p["bs"], 0.0)
    h2 = jnp.maximum(action @ p["wa"] + p["ba"], 0.0)
    cat = jnp.concatenate([h1, h2], axis=-1)
    q = jnp.maximum(cat @ p["w1"] + p["b1"], 0.0)
    q = jnp.maximum(q @ p["w2"] + p["b2"], 0.0)
    return q @ p["wo"] + p["bo"]


if __name__ == "__main__":
    key = jax.random.PRNGKey(0)
    k_param, k_state, k_action = jax.random.split(key, 3)

    B = 500   # deliberately not a multiple of 8/128: exercises Pallas boundary clipping
    state = jax.random.normal(k_state, (B, 3), jnp.float32)
    action = jax.random.normal(k_action, (B, 1), jnp.float32)

    n_cores, ew_dtype = _device_hints()
    params = init_params(k_param)
    packed = pack_params(params, ew_dtype=ew_dtype)

    fwd = jax.jit(functools.partial(qnetwork_forward,
                                    ew_dtype=ew_dtype, n_cores=n_cores))
    q_pallas = jax.block_until_ready(fwd(state, action, packed))
    q_ref = qnetwork_reference(state, action, params)

    assert q_pallas.shape == (B, 1)
    max_err = float(jnp.max(jnp.abs(q_pallas - q_ref)))
    # bf16 MXU operands (and bf16 hidden-layer elementwise on v6e/v7x) vs f32 reference.
    assert jnp.allclose(q_pallas, q_ref, atol=5e-2, rtol=5e-2), (
        "max abs err = %f" % max_err)
    print("KERNEL_OK")
</pallas_src>

<mosaic_0001>
module attributes {stable_mosaic.version = 11 : i64} {
  func.func @qnetwork_kernel(%arg0: i32, %arg1: memref<512x3xf32, #tpu.memory_space<vmem>>, %arg2: memref<512x1xf32, #tpu.memory_space<vmem>>, %arg3: memref<3x64xf32, #tpu.memory_space<vmem>>, %arg4: memref<1x64xf32, #tpu.memory_space<vmem>>, %arg5: memref<1x64xf32, #tpu.memory_space<vmem>>, %arg6: memref<1x64xf32, #tpu.memory_space<vmem>>, %arg7: memref<64x128xbf16, #tpu.memory_space<vmem>>, %arg8: memref<64x128xbf16, #tpu.memory_space<vmem>>, %arg9: memref<1x128xbf16, #tpu.memory_space<vmem>>, %arg10: memref<128x64xbf16, #tpu.memory_space<vmem>>, %arg11: memref<1x64xbf16, #tpu.memory_space<vmem>>, %arg12: memref<1x64xf32, #tpu.memory_space<vmem>>, %arg13: memref<1xf32, #tpu.memory_space<smem>>, %arg14: memref<512x1xf32, #tpu.memory_space<vmem>>) attributes {dimension_semantics = [#tpu.dimension_semantics<parallel>], iteration_bounds = array<i64: 1>, scalar_prefetch = 0 : i64, scratch_operands = 0 : i64, tpu.core_type = #tpu.core_type<tc>, window_params = [{transform_indices = @transform_0, window_bounds = array<i64: 512, 3>}, {transform_indices = @transform_1, window_bounds = array<i64: 512, 1>}, {pipeline_mode = #tpu.pipeline_mode<synchronous>, transform_indices = @transform_2, window_bounds = array<i64: 3, 64>}, {pipeline_mode = #tpu.pipeline_mode<synchronous>, transform_indices = @transform_3, window_bounds = array<i64: 1, 64>}, {pipeline_mode = #tpu.pipeline_mode<synchronous>, transform_indices = @transform_4, window_bounds = array<i64: 1, 64>}, {pipeline_mode = #tpu.pipeline_mode<synchronous>, transform_indices = @transform_5, window_bounds = array<i64: 1, 64>}, {pipeline_mode = #tpu.pipeline_mode<synchronous>, transform_indices = @transform_6, window_bounds = array<i64: 64, 128>}, {pipeline_mode = #tpu.pipeline_mode<synchronous>, transform_indices = @transform_7, window_bounds = array<i64: 64, 128>}, {pipeline_mode = #tpu.pipeline_mode<synchronous>, transform_indices = @transform_8, window_bounds = array<i64: 1, 128>}, {pipeline_mode = #tpu.pipeline_mode<synchronous>, transform_indices = @transform_9, window_bounds = array<i64: 128, 64>}, {pipeline_mode = #tpu.pipeline_mode<synchronous>, transform_indices = @transform_10, window_bounds = array<i64: 1, 64>}, {pipeline_mode = #tpu.pipeline_mode<synchronous>, transform_indices = @transform_11, window_bounds = array<i64: 1, 64>}, {transform_indices = @transform_12, window_bounds = array<i64: 1>}, {transform_indices = @transform_13, window_bounds = array<i64: 512, 1>}]} {
    %c0 = arith.constant 0 : index
    %c0_0 = arith.constant 0 : index
    %0 = vector.load %arg1[%c0, %c0_0] : memref<512x3xf32, #tpu.memory_space<vmem>>, vector<512x3xf32>
    %c0_1 = arith.constant 0 : index
    %c0_2 = arith.constant 0 : index
    %1 = vector.load %arg2[%c0_1, %c0_2] : memref<512x1xf32, #tpu.memory_space<vmem>>, vector<512x1xf32>
    %c0_3 = arith.constant 0 : index
    %c0_4 = arith.constant 0 : index
    %2 = vector.load %arg3[%c0_3, %c0_4] : memref<3x64xf32, #tpu.memory_space<vmem>>, vector<3x64xf32>
    %cst = arith.constant dense<0.000000e+00> : vector<512x64xf32>
    %3 = tpu.matmul %0, %2, %cst {dimension_numbers = #tpu.dot_dimension_numbers<[1], [0], [0], [1], [0, 0, 1, 1], [], []>} : vector<512x3xf32>, vector<3x64xf32>, vector<512x64xf32> -> vector<512x64xf32>
    %c0_5 = arith.constant 0 : index
    %c0_6 = arith.constant 0 : index
    %4 = vector.load %arg4[%c0_5, %c0_6] : memref<1x64xf32, #tpu.memory_space<vmem>>, vector<1x64xf32>
    %5 = vector.broadcast %4 : vector<1x64xf32> to vector<512x64xf32>
    %6 = arith.addf %3, %5 : vector<512x64xf32>
    %c0_7 = arith.constant 0 : index
    %c0_8 = arith.constant 0 : index
    %7 = vector.load %arg5[%c0_7, %c0_8] : memref<1x64xf32, #tpu.memory_space<vmem>>, vector<1x64xf32>
    %8 = vector.broadcast %1 : vector<512x1xf32> to vector<512x64xf32>
    %9 = vector.broadcast %7 : vector<1x64xf32> to vector<512x64xf32>
    %10 = arith.mulf %8, %9 : vector<512x64xf32>
    %c0_9 = arith.constant 0 : index
    %c0_10 = arith.constant 0 : index
    %11 = vector.load %arg6[%c0_9, %c0_10] : memref<1x64xf32, #tpu.memory_space<vmem>>, vector<1x64xf32>
    %12 = vector.broadcast %11 : vector<1x64xf32> to vector<512x64xf32>
    %13 = arith.addf %10, %12 : vector<512x64xf32>
    %cst_11 = arith.constant 0.000000e+00 : f32
    %14 = vector.broadcast %cst_11 : f32 to vector<512x64xf32>
    %15 = arith.maximumf %6, %14 : vector<512x64xf32>
    %16 = arith.truncf %15 : vector<512x64xf32> to vector<512x64xbf16>
    %cst_12 = arith.constant 0.000000e+00 : f32
    %17 = vector.broadcast %cst_12 : f32 to vector<512x64xf32>
    %18 = arith.maximumf %13, %17 : vector<512x64xf32>
    %19 = arith.truncf %18 : vector<512x64xf32> to vector<512x64xbf16>
    %c0_13 = arith.constant 0 : index
    %c0_14 = arith.constant 0 : index
    %20 = vector.load %arg7[%c0_13, %c0_14] : memref<64x128xbf16, #tpu.memory_space<vmem>>, vector<64x128xbf16>
    %cst_15 = arith.constant dense<0.000000e+00> : vector<512x128xf32>
    %21 = tpu.matmul %16, %20, %cst_15 {dimension_numbers = #tpu.dot_dimension_numbers<[1], [0], [0], [1], [0, 0, 1, 1], [], []>} : vector<512x64xbf16>, vector<64x128xbf16>, vector<512x128xf32> -> vector<512x128xf32>
    %c0_16 = arith.constant 0 : index
    %c0_17 = arith.constant 0 : index
    %22 = vector.load %arg8[%c0_16, %c0_17] : memref<64x128xbf16, #tpu.memory_space<vmem>>, vector<64x128xbf16>
    %cst_18 = arith.constant dense<0.000000e+00> : vector<512x128xf32>
    %23 = tpu.matmul %19, %22, %cst_18 {dimension_numbers = #tpu.dot_dimension_numbers<[1], [0], [0], [1], [0, 0, 1, 1], [], []>} : vector<512x64xbf16>, vector<64x128xbf16>, vector<512x128xf32> -> vector<512x128xf32>
    %24 = arith.addf %21, %23 : vector<512x128xf32>
    %25 = arith.truncf %24 : vector<512x128xf32> to vector<512x128xbf16>
    %c0_19 = arith.constant 0 : index
    %c0_20 = arith.constant 0 : index
    %26 = vector.load %arg9[%c0_19, %c0_20] : memref<1x128xbf16, #tpu.memory_space<vmem>>, vector<1x128xbf16>
    %27 = vector.broadcast %26 : vector<1x128xbf16> to vector<512x128xbf16>
    %28 = arith.addf %25, %27 : vector<512x128xbf16>
    %cst_21 = arith.constant 0.000000e+00 : bf16
    %29 = vector.broadcast %cst_21 : bf16 to vector<512x128xbf16>
    %30 = arith.maximumf %28, %29 : vector<512x128xbf16>
    %c0_22 = arith.constant 0 : index
    %c0_23 = arith.constant 0 : index
    %31 = vector.load %arg10[%c0_22, %c0_23] : memref<128x64xbf16, #tpu.memory_space<vmem>>, vector<128x64xbf16>
    %cst_24 = arith.constant dense<0.000000e+00> : vector<512x64xf32>
    %32 = tpu.matmul %30, %31, %cst_24 {dimension_numbers = #tpu.dot_dimension_numbers<[1], [0], [0], [1], [0, 0, 1, 1], [], []>} : vector<512x128xbf16>, vector<128x64xbf16>, vector<512x64xf32> -> vector<512x64xf32>
    %33 = arith.truncf %32 : vector<512x64xf32> to vector<512x64xbf16>
    %c0_25 = arith.constant 0 : index
    %c0_26 = arith.constant 0 : index
    %34 = vector.load %arg11[%c0_25, %c0_26] : memref<1x64xbf16, #tpu.memory_space<vmem>>, vector<1x64xbf16>
    %35 = vector.broadcast %34 : vector<1x64xbf16> to vector<512x64xbf16>
    %36 = arith.addf %33, %35 : vector<512x64xbf16>
    %cst_27 = arith.constant 0.000000e+00 : bf16
    %37 = vector.broadcast %cst_27 : bf16 to vector<512x64xbf16>
    %38 = arith.maximumf %36, %37 : vector<512x64xbf16>
    %39 = arith.extf %38 : vector<512x64xbf16> to vector<512x64xf32>
    %c0_28 = arith.constant 0 : index
    %c0_29 = arith.constant 0 : index
    %40 = vector.load %arg12[%c0_28, %c0_29] : memref<1x64xf32, #tpu.memory_space<vmem>>, vector<1x64xf32>
    %41 = vector.broadcast %40 : vector<1x64xf32> to vector<512x64xf32>
    %42 = arith.mulf %39, %41 : vector<512x64xf32>
    %cst_30 = arith.constant dense<0.000000e+00> : vector<512xf32>
    %43 = vector.multi_reduction <add>, %42, %cst_30 [1] : vector<512x64xf32> to vector<512xf32>
    %44 = vector.shape_cast %43 : vector<512xf32> to vector<512x1xf32>
    %c0_31 = arith.constant 0 : index
    %45 = memref.load %arg13[%c0_31] : memref<1xf32, #tpu.memory_space<smem>>
    %46 = vector.broadcast %45 : f32 to vector<512x1xf32>
    %47 = arith.addf %44, %46 : vector<512x1xf32>
    %c0_32 = arith.constant 0 : index
    %c0_33 = arith.constant 0 : index
    %48 = vector.load %arg14[%c0_32, %c0_33] : memref<512x1xf32, #tpu.memory_space<vmem>>, vector<512x1xf32>
    tpu.vector_store %arg14[%c0_32, %c0_33], %47 {strides = array<i32>} : memref<512x1xf32, #tpu.memory_space<vmem>>, vector<512x1xf32>,
    return
  }
  func.func @transform_0(%arg0: i32) -> (i32, i32) {
    %c0_i32 = arith.constant 0 : i32
    %c0_i32_0 = arith.constant 0 : i32
    return %arg0, %c0_i32 : i32, i32
  }
  func.func @transform_1(%arg0: i32) -> (i32, i32) {
    %c0_i32 = arith.constant 0 : i32
    %c0_i32_0 = arith.constant 0 : i32
    return %arg0, %c0_i32 : i32, i32
  }
  func.func @transform_2(%arg0: i32) -> (i32, i32) {
    %c0_i32 = arith.constant 0 : i32
    %c0_i32_0 = arith.constant 0 : i32
    %c0_i32_1 = arith.constant 0 : i32
    return %c0_i32, %c0_i32_0 : i32, i32
  }
  func.func @transform_3(%arg0: i32) -> (i32, i32) {
    %c0_i32 = arith.constant 0 : i32
    %c0_i32_0 = arith.constant 0 : i32
    %c0_i32_1 = arith.constant 0 : i32
    return %c0_i32, %c0_i32_0 : i32, i32
  }
  func.func @transform_4(%arg0: i32) -> (i32, i32) {
    %c0_i32 = arith.constant 0 : i32
    %c0_i32_0 = arith.constant 0 : i32
    %c0_i32_1 = arith.constant 0 : i32
    return %c0_i32, %c0_i32_0 : i32, i32
  }
  func.func @transform_5(%arg0: i32) -> (i32, i32) {
    %c0_i32 = arith.constant 0 : i32
    %c0_i32_0 = arith.constant 0 : i32
    %c0_i32_1 = arith.constant 0 : i32
    return %c0_i32, %c0_i32_0 : i32, i32
  }
  func.func @transform_6(%arg0: i32) -> (i32, i32) {
    %c0_i32 = arith.constant 0 : i32
    %c0_i32_0 = arith.constant 0 : i32
    %c0_i32_1 = arith.constant 0 : i32
    return %c0_i32, %c0_i32_0 : i32, i32
  }
  func.func @transform_7(%arg0: i32) -> (i32, i32) {
    %c0_i32 = arith.constant 0 : i32
    %c0_i32_0 = arith.constant 0 : i32
    %c0_i32_1 = arith.constant 0 : i32
    return %c0_i32, %c0_i32_0 : i32, i32
  }
  func.func @transform_8(%arg0: i32) -> (i32, i32) {
    %c0_i32 = arith.constant 0 : i32
    %c0_i32_0 = arith.constant 0 : i32
    %c0_i32_1 = arith.constant 0 : i32
    return %c0_i32, %c0_i32_0 : i32, i32
  }
  func.func @transform_9(%arg0: i32) -> (i32, i32) {
    %c0_i32 = arith.constant 0 : i32
    %c0_i32_0 = arith.constant 0 : i32
    %c0_i32_1 = arith.constant 0 : i32
    return %c0_i32, %c0_i32_0 : i32, i32
  }
  func.func @transform_10(%arg0: i32) -> (i32, i32) {
    %c0_i32 = arith.constant 0 : i32
    %c0_i32_0 = arith.constant 0 : i32
    %c0_i32_1 = arith.constant 0 : i32
    return %c0_i32, %c0_i32_0 : i32, i32
  }
  func.func @transform_11(%arg0: i32) -> (i32, i32) {
    %c0_i32 = arith.constant 0 : i32
    %c0_i32_0 = arith.constant 0 : i32
    %c0_i32_1 = arith.constant 0 : i32
    return %c0_i32, %c0_i32_0 : i32, i32
  }
  func.func @transform_12(%arg0: i32) -> i32 {
    %c0_i32 = arith.constant 0 : i32
    %c0_i32_0 = arith.constant 0 : i32
    return %c0_i32 : i32
  }
  func.func @transform_13(%arg0: i32) -> (i32, i32) {
    %c0_i32 = arith.constant 0 : i32
    %c0_i32_0 = arith.constant 0 : i32
    return %arg0, %c0_i32 : i32, i32
  }
}

</mosaic_0001>

<bundles_post_ra>
// kernel: qnetwork_forward.1
= control target key start
LH: loop header
LB: loop body
LE: loop exit
PB: predicated region body
PF: predicated region fallthrough
CT: control target
= control target key end

     0   :  { %vm375_vm0 = vcmask 1042432   ;;  %v4228_v3 = vmov 0   ;;  %vm182_vm1 = vcmask 23552   ;;  %vm1458_vm2 = vcmask 523264   ;;  %s5795_s0 = inlined_call_operand.vmem [shape: f32[500,3], index: 0, kind: input, shape index: {}]   ;;  %s5796_s1 = inlined_call_operand.vmem [shape: f32[500,1], index: 1, kind: input, shape index: {}]   ;;  %s5797_s2 = inlined_call_operand.vmem [shape: f32[3,64], index: 2, kind: input, shape index: {}]   ;;  %s5798_s3 = inlined_call_operand.vmem [shape: f32[1,64], index: 3, kind: input, shape index: {}]   ;;  %s5799_s4 = inlined_call_operand.vmem [shape: f32[1,64], index: 4, kind: input, shape index: {}]   ;;  %s5800_s5 = inlined_call_operand.vmem [shape: f32[1,64], index: 5, kind: input, shape index: {}]   ;;  %s5801_s6 = inlined_call_operand.vmem [shape: bf16[64,128], index: 6, kind: input, shape index: {}]   ;;  %s5802_s7 = inlined_call_operand.vmem [shape: bf16[64,128], index: 7, kind: input, shape index: {}]   ;;  %s5803_s8 = inlined_call_operand.vmem [shape: bf16[1,128], index: 8, kind: input, shape index: {}]   ;;  %s5804_s9 = inlined_call_operand.vmem [shape: bf16[128,64], index: 9, kind: input, shape index: {}]   ;;  %s5805_s10 = inlined_call_operand.vmem [shape: bf16[1,64], index: 10, kind: input, shape index: {}]   ;;  %s5806_s11 = inlined_call_operand.vmem [shape: f32[1,64], index: 11, kind: input, shape index: {}]   ;;  %s5807_s12 = inlined_call_operand.<no memory space> [shape: f32[1], index: 12, kind: input, shape index: {}]   ;;  %s5808_s13 = inlined_call_operand.vmem [shape: f32[500,1], index: 13, kind: output, shape index: {}]  }
   0x1   :  { %v174_v0 = vld [vmem:[%s5797_s2] sm:$0x7]  ;;  %v112_v1 = vld [vmem:[%s5796_s1 + $0x10] sm:$0xff]  ;;  %4211 = vset.pattern.permute.xlu1 %v4228_v3  ;;  %4210 = vset.pattern.permute.xlu0 %v4228_v3  ;;  %v47_v5 = vld [vmem:[%s5795_s0 + $0x8] sm:$0xff]  ;;  %vm3207_vm3 = vcmask 7168  }
   0x2   :  { %v110_v2 = vld [vmem:[%s5796_s1] sm:$0xff]  ;;  %3887 = vmatprep.subr.msk.mxu0 %vm375_vm0, %v174_v0  ;;  %777 = vperm.xlu1 %4211, %v112_v1   ;;  %v113_v6 = vld [vmem:[%s5796_s1 + $0x18] sm:$0xff]  ;;  %v48_v7 = vld [vmem:[%s5795_s0 + $0x10] sm:$0xff] }
   0x3   :  { %v46_v4 = vld [vmem:[%s5795_s0] sm:$0xff]  ;;  %3888 = vmatpush3.msk.msra.mxu0 %vm375_vm0, %v174_v0  ;;  %767 = vperm.xlu0 %4210, %v110_v2   ;;  %v111_v8 = vld [vmem:[%s5796_s1 + $0x8] sm:$0xff]  ;;  %v49_v9 = vld [vmem:[%s5795_s0 + $0x18] sm:$0xff] }
   0x4   :  { %3889 = vmatprep.mubr.msk.f32.mxu0 %vm182_vm1, %v46_v4  ;;  %v115_v10 = vld [vmem:[%s5796_s1 + $0x28] sm:$0xff]  ;;  %v50_v11 = vld [vmem:[%s5795_s0 + $0x20] sm:$0xff]  ;;  %v117_v14 = vld [vmem:[%s5796_s1 + $0x38] sm:$0xff] }
   0x5   :  { %3890 = vmatmul.mubr.msk.f32.vlgmr.msra.gmra.mxu0 %vm182_vm1, %v47_v5  ;;  %v114_v12 = vld [vmem:[%s5796_s1 + $0x20] sm:$0xff]  ;;  %v51_v13 = vld [vmem:[%s5795_s0 + $0x28] sm:$0xff]  ;;  %v52_v15 = vld [vmem:[%s5795_s0 + $0x30] sm:$0xff] }
   0x6   :  { %782 = vperm.xlu1 %4211, %v113_v6   ;;  %3892 = vmatprep.mubr.msk.f32.mxu0 %vm182_vm1, %v48_v7  ;;  %v116_v16 = vld [vmem:[%s5796_s1 + $0x30] sm:$0xff]  ;;  %v53_v17 = vld [vmem:[%s5795_s0 + $0x38] sm:$0xff]  ;;  %v119_v18 = vld [vmem:[%s5796_s1 + $0x48] sm:$0xff] }
   0x7   :  { %772 = vperm.xlu0 %4210, %v111_v8   ;;  %v54_v19 = vld [vmem:[%s5795_s0 + $0x40] sm:$0xff]  ;;  %v55_v21 = vld [vmem:[%s5795_s0 + $0x48] sm:$0xff]  ;;  %v121_v22 = vld [vmem:[%s5796_s1 + $0x58] sm:$0xff] }
   0x8   :  { %v118_v20 = vld [vmem:[%s5796_s1 + $0x40] sm:$0xff]  ;;  %v56_v23 = vld [vmem:[%s5795_s0 + $0x50] sm:$0xff]  ;;  %v57_v25 = vld [vmem:[%s5795_s0 + $0x58] sm:$0xff] }
   0x9   :  { %3893 = vmatmul.mubr.msk.f32.gmra.mxu0 %vm182_vm1, %v49_v9  ;;  %v120_v24 = vld [vmem:[%s5796_s1 + $0x50] sm:$0xff]  ;;  %v123_v26 = vld [vmem:[%s5796_s1 + $0x68] sm:$0xff]  ;;  %v58_v27 = vld [vmem:[%s5795_s0 + $0x60] sm:$0xff] }
   0xa   :  { %792 = vperm.xlu1 %4211, %v115_v10   ;;  %3895 = vmatprep.mubr.msk.f32.mxu0 %vm182_vm1, %v50_v11  ;;  %v122_v28 = vld [vmem:[%s5796_s1 + $0x60] sm:$0xff]  ;;  %v59_v29 = vld [vmem:[%s5795_s0 + $0x68] sm:$0xff]  ;;  %v125_v30 = vld [vmem:[%s5796_s1 + $0x78] sm:$0xff] }
   0xb   :  { %787 = vperm.xlu0 %4210, %v114_v12   ;;  %v60_v31 = vld [vmem:[%s5795_s0 + $0x70] sm:$0xff]  ;;  %v4212_v32 = vld [vmem:[%s5801_s6 + $0x18] sm:$0xff]   ;;  %v127_v35 = vld [vmem:[%s5796_s1 + $0x88] sm:$0xff] }
   0xc   :  { %v124_v33 = vld [vmem:[%s5796_s1 + $0x70] sm:$0xff]  ;;  %4057 = vmatprep.subr.bf16.mxu0 %v4212_v32  ;;  %v61_v34 = vld [vmem:[%s5795_s0 + $0x78] sm:$0xff]  ;;  %v62_v36 = vld [vmem:[%s5795_s0 + $0x80] sm:$0xff] }
   0xd   :  { %3896 = vmatmul.mubr.msk.f32.gmra.mxu0 %vm182_vm1, %v51_v13  ;;  %v126_v37 = vld [vmem:[%s5796_s1 + $0x80] sm:$0xff]  ;;  %v63_v38 = vld [vmem:[%s5795_s0 + $0x88] sm:$0xff]  ;;  %v129_v39 = vld [vmem:[%s5796_s1 + $0x98] sm:$0xff] }
   0xe   :  { %802 = vperm.xlu1 %4211, %v117_v14   ;;  %3898 = vmatprep.mubr.msk.f32.mxu0 %vm182_vm1, %v52_v15  ;;  %v64_v40 = vld [vmem:[%s5795_s0 + $0x90] sm:$0xff]  ;;  %v65_v42 = vld [vmem:[%s5795_s0 + $0x98] sm:$0xff]  ;;  %v131_v43 = vld [vmem:[%s5796_s1 + $0xa8] sm:$0xff] }
   0xf   :  { %797 = vperm.xlu0 %4210, %v116_v16   ;;  %4058 = vmatpush3.bf16.msra.mxu0 %v4212_v32  ;;  %v128_v41 = vld [vmem:[%s5796_s1 + $0x90] sm:$0xff]  ;;  %v66_v44 = vld [vmem:[%s5795_s0 + $0xa0] sm:$0xff]  ;;  %v67_v47 = vld [vmem:[%s5795_s0 + $0xa8] sm:$0xff] }
  0x10   :  { %v4213_v45 = vld [vmem:[%s5801_s6 + $0x10] sm:$0xff]   ;;  %v130_v46 = vld [vmem:[%s5796_s1 + $0xa0] sm:$0xff]  ;;  %v133_v48 = vld [vmem:[%s5796_s1 + $0xb8] sm:$0xff] }
  0x11   :  { %3899 = vmatmul.mubr.msk.f32.gmra.mxu0 %vm182_vm1, %v53_v17  ;;  %4059 = vmatprep.subr.bf16.mxu0 %v4213_v45  ;;  %v68_v49 = vld [vmem:[%s5795_s0 + $0xb0] sm:$0xff]  ;;  %v4214_v51 = vld [vmem:[%s5802_s7 + $0x18] sm:$0xff]   ;;  %v135_v53 = vld [vmem:[%s5796_s1 + $0xc8] sm:$0xff] }
  0x12   :  { %812 = vperm.xlu1 %4211, %v119_v18   ;;  %3901 = vmatprep.mubr.msk.f32.mxu0 %vm182_vm1, %v54_v19  ;;  %v132_v50 = vld [vmem:[%s5796_s1 + $0xb0] sm:$0xff]  ;;  %v69_v52 = vld [vmem:[%s5795_s0 + $0xb8] sm:$0xff]  ;;  %v134_v54 = vld [vmem:[%s5796_s1 + $0xc0] sm:$0xff] }
  0x13   :  { %807 = vperm.xlu0 %4210, %v118_v20   ;;  %4060 = vmatpush3.bf16.msra.mxu0 %v4213_v45  ;;  %v70_v55 = vld [vmem:[%s5795_s0 + $0xc0] sm:$0xff]  ;;  %v4215_v56 = vld [vmem:[%s5802_s7 + $0x10] sm:$0xff]   ;;  %v71_v57 = vld [vmem:[%s5795_s0 + $0xc8] sm:$0xff] }
  0x14   :  { %3985 = vmatprep.subr.bf16.mxu1 %v4214_v51  ;;  %v137_v58 = vld [vmem:[%s5796_s1 + $0xd8] sm:$0xff]  ;;  %v72_v59 = vld [vmem:[%s5795_s0 + $0xd0] sm:$0xff]  ;;  %v4216_v60 = vld [vmem:[%s5802_s7 + $0x8] sm:$0xff]  }
  0x15   :  { %3902 = vmatmul.mubr.msk.f32.gmra.mxu0 %vm182_vm1, %v55_v21  ;;  %3986 = vmatpush3.bf16.msra.mxu1 %v4214_v51  ;;  %v136_v61 = vld [vmem:[%s5796_s1 + $0xd0] sm:$0xff]  ;;  %v4218_v62 = vld [vmem:[%s5801_s6 + $0x8] sm:$0xff]   ;;  %v4217_v63 = vld [vmem:[%s5802_s7] sm:$0xff]  }
  0x16   :  { %822 = vperm.xlu1 %4211, %v121_v22   ;;  %3904 = vmatprep.mubr.msk.f32.mxu0 %vm182_vm1, %v56_v23  ;;  %v73_v0 = vld [vmem:[%s5795_s0 + $0xd8] sm:$0xff]  ;;  %v139_v1 = vld [vmem:[%s5796_s1 + $0xe8] sm:$0xff]  ;;  %v74_v2 = vld [vmem:[%s5795_s0 + $0xe0] sm:$0xff] }
  0x17   :  { %817 = vperm.xlu0 %4210, %v120_v24   ;;  %3987 = vmatprep.subr.bf16.mxu1 %v4215_v56  ;;  %v4219_v4 = vld [vmem:[%s5801_s6] sm:$0xff]   ;;  %v75_v6 = vld [vmem:[%s5795_s0 + $0xe8] sm:$0xff]  ;;  %v141_v7 = vld [vmem:[%s5796_s1 + $0xf8] sm:$0xff] }
  0x18   :  { %4061 = vmatprep.subr.bf16.mxu0 %v4218_v62  ;;  %v138_v5 = vld [vmem:[%s5796_s1 + $0xe0] sm:$0xff]  ;;  %v76_v8 = vld [vmem:[%s5795_s0 + $0xf0] sm:$0xff]  ;;  %v77_v10 = vld [vmem:[%s5795_s0 + $0xf8] sm:$0xff] }
  0x19   :  { %3905 = vmatmul.mubr.msk.f32.gmra.mxu0 %vm182_vm1, %v57_v25  ;;  %3988 = vmatpush3.bf16.msra.mxu1 %v4215_v56  ;;  %v140_v9 = vld [vmem:[%s5796_s1 + $0xf0] sm:$0xff]  ;;  %v143_v11 = vld [vmem:[%s5796_s1 + $0x108] sm:$0xff]  ;;  %v78_v12 = vld [vmem:[%s5795_s0 + $0x100] sm:$0xff] }
  0x1a   :  { %832 = vperm.xlu1 %4211, %v123_v26   ;;  %3907 = vmatprep.mubr.msk.f32.mxu0 %vm182_vm1, %v58_v27  ;;  %v142_v13 = vld [vmem:[%s5796_s1 + $0x100] sm:$0xff]  ;;  %v79_v14 = vld [vmem:[%s5795_s0 + $0x108] sm:$0xff]  ;;  %v145_v15 = vld [vmem:[%s5796_s1 + $0x118] sm:$0xff] }
  0x1b   :  { %827 = vperm.xlu0 %4210, %v122_v28   ;;  %3989 = vmatprep.subr.bf16.mxu1 %v4216_v60  ;;  %v80_v16 = vld [vmem:[%s5795_s0 + $0x110] sm:$0xff]  ;;  %v81_v18 = vld [vmem:[%s5795_s0 + $0x118] sm:$0xff]  ;;  %v147_v19 = vld [vmem:[%s5796_s1 + $0x128] sm:$0xff] }
  0x1c   :  { %4062 = vmatpush3.bf16.msra.mxu0 %v4218_v62  ;;  %v144_v17 = vld [vmem:[%s5796_s1 + $0x110] sm:$0xff]  ;;  %v82_v20 = vld [vmem:[%s5795_s0 + $0x120] sm:$0xff]  ;;  %v83_v22 = vld [vmem:[%s5795_s0 + $0x128] sm:$0xff] }
  0x1d   :  { %3908 = vmatmul.mubr.msk.f32.gmra.mxu0 %vm182_vm1, %v59_v29  ;;  %3990 = vmatpush3.bf16.msra.mxu1 %v4216_v60  ;;  %v146_v21 = vld [vmem:[%s5796_s1 + $0x120] sm:$0xff]  ;;  %v149_v23 = vld [vmem:[%s5796_s1 + $0x138] sm:$0xff]  ;;  %v84_v24 = vld [vmem:[%s5795_s0 + $0x130] sm:$0xff] }
  0x1e   :  { %842 = vperm.xlu1 %4211, %v125_v30   ;;  %3910 = vmatprep.mubr.msk.f32.mxu0 %vm182_vm1, %v60_v31  ;;  %v148_v25 = vld [vmem:[%s5796_s1 + $0x130] sm:$0xff]  ;;  %v85_v26 = vld [vmem:[%s5795_s0 + $0x138] sm:$0xff]  ;;  %v151_v27 = vld [vmem:[%s5796_s1 + $0x148] sm:$0xff] }
  0x1f   :  { %837 = vperm.xlu0 %4210, %v124_v33   ;;  %4063 = vmatprep.subr.bf16.mxu0 %v4219_v4  ;;  %v86_v28 = vld [vmem:[%s5795_s0 + $0x140] sm:$0xff]  ;;  %v87_v30 = vld [vmem:[%s5795_s0 + $0x148] sm:$0xff]  ;;  %v153_v31 = vld [vmem:[%s5796_s1 + $0x158] sm:$0xff] }
  0x20   :  { %3991 = vmatprep.subr.bf16.mxu1 %v4217_v63  ;;  %4064 = vmatpush3.bf16.msra.mxu0 %v4219_v4  ;;  %v150_v29 = vld [vmem:[%s5796_s1 + $0x140] sm:$0xff]  ;;  %v88_v32 = vld [vmem:[%s5795_s0 + $0x150] sm:$0xff]  ;;  %v163_v51 = vld [vmem:[%s5796_s1 + $0x1a8] sm:$0xff] }
  0x21   :  { %3911 = vmatmul.mubr.msk.f32.gmra.mxu0 %vm182_vm1, %v61_v34  ;;  %3992 = vmatpush3.bf16.msra.mxu1 %v4217_v63  ;;  %v152_v33 = vld [vmem:[%s5796_s1 + $0x150] sm:$0xff]  ;;  %v89_v34 = vld [vmem:[%s5795_s0 + $0x158] sm:$0xff]  ;;  %v158_v45 = vld [vmem:[%s5796_s1 + $0x180] sm:$0xff] }
  0x22   :  { %852 = vperm.xlu1 %4211, %v127_v35   ;;  %3913 = vmatprep.mubr.msk.f32.mxu0 %vm182_vm1, %v62_v36  ;;  %v155_v35 = vld [vmem:[%s5796_s1 + $0x168] sm:$0xff]  ;;  %v90_v36 = vld [vmem:[%s5795_s0 + $0x160] sm:$0xff]  ;;  %v100_v56 = vld [vmem:[%s5795_s0 + $0x1b0] sm:$0xff] }
  0x23   :  { %847 = vperm.xlu0 %4210, %v126_v37   ;;  %v154_v37 = vld [vmem:[%s5796_s1 + $0x160] sm:$0xff]  ;;  %v103_v62 = vld [vmem:[%s5795_s0 + $0x1c8] sm:$0xff]  ;;  %v169_v63 = vld [vmem:[%s5796_s1 + $0x1d8] sm:$0xff] }
  0x24   :  { %v102_v60 = vld [vmem:[%s5795_s0 + $0x1c0] sm:$0xff]  ;;  %v171_v4 = vld [vmem:[%s5796_s1 + $0x1e8] sm:$0xff] }
  0x25   :  { %3914 = vmatmul.mubr.msk.f32.gmra.mxu0 %vm182_vm1, %v63_v38  ;;  %v91_v38 = vld [vmem:[%s5795_s0 + $0x168] sm:$0xff] }
  0x26   :  { %862 = vperm.xlu1 %4211, %v129_v39   ;;  %3916 = vmatprep.mubr.msk.f32.mxu0 %vm182_vm1, %v64_v40  ;;  %v157_v39 = vld [vmem:[%s5796_s1 + $0x178] sm:$0xff]  ;;  %v92_v40 = vld [vmem:[%s5795_s0 + $0x170] sm:$0xff] }
  0x27   :  { %857 = vperm.xlu0 %4210, %v128_v41   ;;  %v156_v41 = vld [vmem:[%s5796_s1 + $0x170] sm:$0xff] }
  0x29   :  { %3917 = vmatmul.mubr.msk.f32.gmra.mxu0 %vm182_vm1, %v65_v42  ;;  %v93_v42 = vld [vmem:[%s5795_s0 + $0x178] sm:$0xff] }
  0x2a   :  { %872 = vperm.xlu1 %4211, %v131_v43   ;;  %3919 = vmatprep.mubr.msk.f32.mxu0 %vm182_vm1, %v66_v44  ;;  %v159_v43 = vld [vmem:[%s5796_s1 + $0x188] sm:$0xff]  ;;  %v94_v44 = vld [vmem:[%s5795_s0 + $0x180] sm:$0xff] }
  0x2b   :  { %867 = vperm.xlu0 %4210, %v130_v46   ;;  %v95_v46 = vld [vmem:[%s5795_s0 + $0x188] sm:$0xff] }
  0x2d   :  { %3920 = vmatmul.mubr.msk.f32.gmra.mxu0 %vm182_vm1, %v67_v47  ;;  %v161_v47 = vld [vmem:[%s5796_s1 + $0x198] sm:$0xff] }
  0x2e   :  { %882 = vperm.xlu1 %4211, %v133_v48   ;;  %3922 = vmatprep.mubr.msk.f32.mxu0 %vm182_vm1, %v68_v49  ;;  %v96_v48 = vld [vmem:[%s5795_s0 + $0x190] sm:$0xff] }
  0x2f   :  { %877 = vperm.xlu0 %4210, %v132_v50   ;;  %v160_v49 = vld [vmem:[%s5796_s1 + $0x190] sm:$0xff]  ;;  %v97_v50 = vld [vmem:[%s5795_s0 + $0x198] sm:$0xff] }
  0x31   :  { %3923 = vmatmul.mubr.msk.f32.gmra.mxu0 %vm182_vm1, %v69_v52  ;;  %v98_v52 = vld [vmem:[%s5795_s0 + $0x1a0] sm:$0xff] }
  0x32   :  { %892 = vperm.xlu1 %4211, %v135_v53   ;;  %3925 = vmatprep.mubr.msk.f32.mxu0 %vm182_vm1, %v70_v55  ;;  %v162_v53 = vld [vmem:[%s5796_s1 + $0x1a0] sm:$0xff]  ;;  %v165_v55 = vld [vmem:[%s5796_s1 + $0x1b8] sm:$0xff] }
  0x33   :  { %887 = vperm.xlu0 %4210, %v134_v54   ;;  %v99_v54 = vld [vmem:[%s5795_s0 + $0x1a8] sm:$0xff] }
  0x35   :  { %3926 = vmatmul.mubr.msk.f32.gmra.mxu0 %vm182_vm1, %v71_v57  ;;  %v164_v57 = vld [vmem:[%s5796_s1 + $0x1b0] sm:$0xff] }
  0x36   :  { %902 = vperm.xlu1 %4211, %v137_v58   ;;  %3928 = vmatprep.mubr.msk.f32.mxu0 %vm182_vm1, %v72_v59  ;;  %v101_v58 = vld [vmem:[%s5795_s0 + $0x1b8] sm:$0xff]  ;;  %v167_v59 = vld [vmem:[%s5796_s1 + $0x1c8] sm:$0xff] }
  0x37   :  { %897 = vperm.xlu0 %4210, %v136_v61   ;;  %v166_v61 = vld [vmem:[%s5796_s1 + $0x1c0] sm:$0xff] }
  0x39   :  { %3929 = vmatmul.mubr.msk.f32.gmra.mxu0 %vm182_vm1, %v73_v0  ;;  %v104_v0 = vld [vmem:[%s5795_s0 + $0x1d0] sm:$0xff] }
  0x3a   :  { %912 = vperm.xlu1 %4211, %v139_v1   ;;  %3931 = vmatprep.mubr.msk.f32.mxu0 %vm182_vm1, %v74_v2  ;;  %v168_v1 = vld [vmem:[%s5796_s1 + $0x1d0] sm:$0xff]  ;;  %v105_v2 = vld [vmem:[%s5795_s0 + $0x1d8] sm:$0xff] }
  0x3b   :  { %907 = vperm.xlu0 %4210, %v138_v5   ;;  %v106_v5 = vld [vmem:[%s5795_s0 + $0x1e0] sm:$0xff] }
  0x3d   :  { %3932 = vmatmul.mubr.msk.f32.gmra.mxu0 %vm182_vm1, %v75_v6  ;;  %v170_v6 = vld [vmem:[%s5796_s1 + $0x1e0] sm:$0xff] }
  0x3e   :  { %922 = vperm.xlu1 %4211, %v141_v7   ;;  %3934 = vmatprep.mubr.msk.f32.mxu0 %vm182_vm1, %v76_v8  ;;  %v107_v7 = vld [vmem:[%s5795_s0 + $0x1e8] sm:$0xff]  ;;  %v4764_v8 = vld [vmem:[%s5799_s4] ss:$0 sm:$0xff] }
  0x3f   :  { %917 = vperm.xlu0 %4210, %v140_v9   ;;  %v173_v9 = vld [vmem:[%s5796_s1 + $0x1f8] sm:$0xff] }
  0x41   :  { %3935 = vmatmul.mubr.msk.f32.gmra.mxu0 %vm182_vm1, %v77_v10  ;;  %v108_v10 = vld [vmem:[%s5795_s0 + $0x1f0] sm:$0xff] }
  0x42   :  { %932 = vperm.xlu1 %4211, %v143_v11   ;;  %3937 = vmatprep.mubr.msk.f32.mxu0 %vm182_vm1, %v78_v12  ;;  %v172_v11 = vld [vmem:[%s5796_s1 + $0x1f0] sm:$0xff]  ;;  %v4779_v12 = vld [vmem:[%s5800_s5] ss:$0 sm:$0xff] }
  0x43   :  { %927 = vperm.xlu0 %4210, %v142_v13  }
  0x45   :  { %3938 = vmatmul.mubr.msk.f32.gmra.mxu0 %vm182_vm1, %v79_v14 }
  0x46   :  { %942 = vperm.xlu1 %4211, %v145_v15   ;;  %3940 = vmatprep.mubr.msk.f32.mxu0 %vm182_vm1, %v80_v16  ;;  %v109_v16 = vld [vmem:[%s5795_s0 + $0x1f8] sm:$0xff] }
  0x47   :  { %937 = vperm.xlu0 %4210, %v144_v17  }
  0x49   :  { %3941 = vmatmul.mubr.msk.f32.gmra.mxu0 %vm182_vm1, %v81_v18 }
  0x4a   :  { %952 = vperm.xlu1 %4211, %v147_v19   ;;  %3943 = vmatprep.mubr.msk.f32.mxu0 %vm182_vm1, %v82_v20 }
  0x4b   :  { %947 = vperm.xlu0 %4210, %v146_v21  }
  0x4d   :  { %3944 = vmatmul.mubr.msk.f32.gmra.mxu0 %vm182_vm1, %v83_v22 }
  0x4e   :  { %962 = vperm.xlu1 %4211, %v149_v23   ;;  %3946 = vmatprep.mubr.msk.f32.mxu0 %vm182_vm1, %v84_v24 }
  0x4f   :  { %957 = vperm.xlu0 %4210, %v148_v25  }
  0x51   :  { %3947 = vmatmul.mubr.msk.f32.gmra.mxu0 %vm182_vm1, %v85_v26 }
  0x52   :  { %972 = vperm.xlu1 %4211, %v151_v27   ;;  %3949 = vmatprep.mubr.msk.f32.mxu0 %vm182_vm1, %v86_v28 }
  0x53   :  { %967 = vperm.xlu0 %4210, %v150_v29  }
  0x55   :  { %3950 = vmatmul.mubr.msk.f32.gmra.mxu0 %vm182_vm1, %v87_v30 }
  0x56   :  { %982 = vperm.xlu1 %4211, %v153_v31   ;;  %3952 = vmatprep.mubr.msk.f32.mxu0 %vm182_vm1, %v88_v32 }
  0x57   :  { %977 = vperm.xlu0 %4210, %v152_v33  }
  0x59   :  { %3953 = vmatmul.mubr.msk.f32.gmra.mxu0 %vm182_vm1, %v89_v34 }
  0x5a   :  { %992 = vperm.xlu1 %4211, %v155_v35   ;;  %3955 = vmatprep.mubr.msk.f32.mxu0 %vm182_vm1, %v90_v36 }
  0x5b   :  { %987 = vperm.xlu0 %4210, %v154_v37  }
  0x5d   :  { %3956 = vmatmul.mubr.msk.f32.gmra.mxu0 %vm182_vm1, %v91_v38 }
  0x5e   :  { %1002 = vperm.xlu1 %4211, %v157_v39   ;;  %3958 = vmatprep.mubr.msk.f32.mxu0 %vm182_vm1, %v92_v40 }
  0x5f   :  { %997 = vperm.xlu0 %4210, %v156_v41  }
  0x61   :  { %3959 = vmatmul.mubr.msk.f32.gmra.mxu0 %vm182_vm1, %v93_v42 }
  0x62   :  { %1012 = vperm.xlu1 %4211, %v159_v43   ;;  %3961 = vmatprep.mubr.msk.f32.mxu0 %vm182_vm1, %v94_v44 }
  0x63   :  { %1007 = vperm.xlu0 %4210, %v158_v45  }
  0x65   :  { %3962 = vmatmul.mubr.msk.f32.gmra.mxu0 %vm182_vm1, %v95_v46 }
  0x66   :  { %1022 = vperm.xlu1 %4211, %v161_v47   ;;  %3964 = vmatprep.mubr.msk.f32.mxu0 %vm182_vm1, %v96_v48 }
  0x67   :  { %1017 = vperm.xlu0 %4210, %v160_v49  }
  0x69   :  { %3965 = vmatmul.mubr.msk.f32.gmra.mxu0 %vm182_vm1, %v97_v50 }
  0x6a   :  { %1032 = vperm.xlu1 %4211, %v163_v51   ;;  %3967 = vmatprep.mubr.msk.f32.mxu0 %vm182_vm1, %v98_v52 }
  0x6b   :  { %1027 = vperm.xlu0 %4210, %v162_v53  }
  0x6d   :  { %3968 = vmatmul.mubr.msk.f32.gmra.mxu0 %vm182_vm1, %v99_v54 }
  0x6e   :  { %1042 = vperm.xlu1 %4211, %v165_v55   ;;  %3970 = vmatprep.mubr.msk.f32.mxu0 %vm182_vm1, %v100_v56 }
  0x6f   :  { %1037 = vperm.xlu0 %4210, %v164_v57  }
  0x71   :  { %3971 = vmatmul.mubr.msk.f32.gmra.mxu0 %vm182_vm1, %v101_v58 }
  0x72   :  { %1052 = vperm.xlu1 %4211, %v167_v59   ;;  %3973 = vmatprep.mubr.msk.f32.mxu0 %vm182_vm1, %v102_v60 }
  0x73   :  { %1047 = vperm.xlu0 %4210, %v166_v61  }
  0x75   :  { %3974 = vmatmul.mubr.msk.f32.gmra.mxu0 %vm182_vm1, %v103_v62 }
  0x76   :  { %1062 = vperm.xlu1 %4211, %v169_v63   ;;  %3976 = vmatprep.mubr.msk.f32.mxu0 %vm182_vm1, %v104_v0 }
  0x77   :  { %1057 = vperm.xlu0 %4210, %v168_v1  }
  0x79   :  { %3977 = vmatmul.mubr.msk.f32.gmra.mxu0 %vm182_vm1, %v105_v2 }
  0x7a   :  { %1072 = vperm.xlu1 %4211, %v171_v4   ;;  %3979 = vmatprep.mubr.msk.f32.mxu0 %vm182_vm1, %v106_v5 }
  0x7b   :  { %1067 = vperm.xlu0 %4210, %v170_v6  }
  0x7d   :  { %3980 = vmatmul.mubr.msk.f32.gmra.mxu0 %vm182_vm1, %v107_v7  ;;  %v778_v13 = vpop.permute.xlu1 %777 }
  0x7e   :  { %v1093_v14 = vmul.f32 %v4764_v8, %v778_v13  ;;  %v768_v15 = vpop.permute.xlu0 %767  ;;  %1082 = vperm.xlu1 %4211, %v173_v9   ;;  %3982 = vmatprep.mubr.msk.f32.mxu0 %vm182_vm1, %v108_v10 }
  0x7f   :  { %v1091_v17 = vmul.f32 %v4764_v8, %v768_v15  ;;  %1077 = vperm.xlu0 %4210, %v172_v11  }
  0x80   :  { %v1164_v18 = vadd.f32 %v4779_v12, %v1093_v14 }
  0x81   :  { %v1162_v19 = vadd.f32 %v4779_v12, %v1091_v17  ;;  %3983 = vmatmul.mubr.msk.f32.gmra.mxu0 %vm182_vm1, %v109_v16  ;;  %v783_v20 = vpop.permute.xlu1 %782 }
  0x82   :  { %v1094_v21 = vmul.f32 %v4764_v8, %v783_v20  ;;  %v773_v22 = vpop.permute.xlu0 %772  ;;  %v1324_v24 = vmax.f32 %v1164_v18, 0.0 }
  0x83   :  { %v1092_v23 = vmul.f32 %v4764_v8, %v773_v22  ;;  %v1322_v28 = vmax.f32 %v1162_v19, 0.0 }
  0x84   :  { %v1165_v25 = vadd.f32 %v4779_v12, %v1094_v21 }
  0x85   :  { %v1163_v26 = vadd.f32 %v4779_v12, %v1092_v23  ;;  %v793_v27 = vpop.permute.xlu1 %792 }
  0x86   :  { %v1325_v29 = vmax.f32 %v1165_v25, 0.0  ;;  %v1096_v30 = vmul.f32 %v4764_v8, %v793_v27  ;;  %v788_v31 = vpop.permute.xlu0 %787 }
  0x87   :  { %v1095_v32 = vmul.f32 %v4764_v8, %v788_v31  ;;  %v1323_v33 = vmax.f32 %v1163_v26, 0.0 }
  0x88   :  { %v1387_v34 = vpack.c.bf16 %v1325_v29, %v1324_v24  ;;  %v1167_v35 = vadd.f32 %v4779_v12, %v1096_v30 }
  0x89   :  { %v1166_v36 = vadd.f32 %v4779_v12, %v1095_v32  ;;  %v803_v37 = vpop.permute.xlu1 %802  ;;  %v1386_v38 = vpack.c.bf16 %v1323_v33, %v1322_v28 }
  0x8a   :  { %v1327_v39 = vmax.f32 %v1167_v35, 0.0  ;;  %v1098_v40 = vmul.f32 %v4764_v8, %v803_v37  ;;  %v798_v41 = vpop.permute.xlu0 %797 }
  0x8b   :  { %v1326_v42 = vmax.f32 %v1166_v36, 0.0  ;;  %v1097_v43 = vmul.f32 %v4764_v8, %v798_v41  ;;  %3993 = vmatprep.mubr.msk.bf16.mxu1 %vm1458_vm2, %v1386_v38  ;;  %v4220_v38 = vld [vmem:[%s5804_s9 + $0x38] sm:$0xff]  }
  0x8c   :  { %v1169_v44 = vadd.f32 %v4779_v12, %v1098_v40  ;;  %3994 = vmatmul.mubr.msk.bf16.vlgmr.msra.gmra.mxu1 %vm1458_vm2, %v1387_v34  ;;  %4129 = vmatprep.subr.bf16.mxu1 %v4220_v38 }
  0x8d   :  { %v1388_v45 = vpack.c.bf16 %v1327_v39, %v1326_v42  ;;  %v1168_v46 = vadd.f32 %v4779_v12, %v1097_v43  ;;  %v813_v47 = vpop.permute.xlu1 %812  ;;  %4130 = vmatpush3.bf16.msra.mxu1 %v4220_v38 }
  0x8e   :  { %v1329_v48 = vmax.f32 %v1169_v44, 0.0  ;;  %v1100_v49 = vmul.f32 %v4764_v8, %v813_v47  ;;  %v808_v50 = vpop.permute.xlu0 %807 }
  0x8f   :  { %v1328_v51 = vmax.f32 %v1168_v46, 0.0  ;;  %v1099_v52 = vmul.f32 %v4764_v8, %v808_v50  ;;  %3997 = vmatprep.mubr.msk.bf16.mxu1 %vm1458_vm2, %v1388_v45 }
  0x90   :  { %v1171_v53 = vadd.f32 %v4779_v12, %v1100_v49 }
  0x91   :  { %v1389_v54 = vpack.c.bf16 %v1329_v48, %v1328_v51  ;;  %v1170_v55 = vadd.f32 %v4779_v12, %v1099_v52  ;;  %v823_v56 = vpop.permute.xlu1 %822 }
  0x92   :  { %v1331_v57 = vmax.f32 %v1171_v53, 0.0  ;;  %v1102_v58 = vmul.f32 %v4764_v8, %v823_v56  ;;  %v818_v59 = vpop.permute.xlu0 %817 }
  0x93   :  { %v1330_v60 = vmax.f32 %v1170_v55, 0.0  ;;  %v1101_v61 = vmul.f32 %v4764_v8, %v818_v59 }
  0x94   :  { %v1173_v62 = vadd.f32 %v4779_v12, %v1102_v58  ;;  %3998 = vmatmul.mubr.msk.bf16.gmra.mxu1 %vm1458_vm2, %v1389_v54 }
  0x95   :  { %v1390_v63 = vpack.c.bf16 %v1331_v57, %v1330_v60  ;;  %v1172_v0 = vadd.f32 %v4779_v12, %v1101_v61  ;;  %v833_v1 = vpop.permute.xlu1 %832 }
  0x96   :  { %v1333_v2 = vmax.f32 %v1173_v62, 0.0  ;;  %v1104_v4 = vmul.f32 %v4764_v8, %v833_v1  ;;  %v828_v5 = vpop.permute.xlu0 %827 }
  0x97   :  { %v1332_v6 = vmax.f32 %v1172_v0, 0.0  ;;  %v1103_v7 = vmul.f32 %v4764_v8, %v828_v5  ;;  %4001 = vmatprep.mubr.msk.bf16.mxu1 %vm1458_vm2, %v1390_v63 }
  0x98   :  { %v1175_v9 = vadd.f32 %v4779_v12, %v1104_v4 }
  0x99   :  { %v1391_v10 = vpack.c.bf16 %v1333_v2, %v1332_v6  ;;  %v1174_v11 = vadd.f32 %v4779_v12, %v1103_v7  ;;  %v843_v13 = vpop.permute.xlu1 %842 }
  0x9a   :  { %v1335_v14 = vmax.f32 %v1175_v9, 0.0  ;;  %v1106_v15 = vmul.f32 %v4764_v8, %v843_v13  ;;  %v838_v16 = vpop.permute.xlu0 %837 }
  0x9b   :  { %v1334_v17 = vmax.f32 %v1174_v11, 0.0  ;;  %v1105_v18 = vmul.f32 %v4764_v8, %v838_v16 }
  0x9c   :  { %v1177_v19 = vadd.f32 %v4779_v12, %v1106_v15  ;;  %4002 = vmatmul.mubr.msk.bf16.gmra.mxu1 %vm1458_vm2, %v1391_v10 }
  0x9d   :  { %v1392_v20 = vpack.c.bf16 %v1335_v14, %v1334_v17  ;;  %v1176_v21 = vadd.f32 %v4779_v12, %v1105_v18  ;;  %v853_v22 = vpop.permute.xlu1 %852  ;;  %v4221_v14 = vld [vmem:[%s5804_s9 + $0x30] sm:$0xff]  }
  0x9e   :  { %v1337_v23 = vmax.f32 %v1177_v19, 0.0  ;;  %v1108_v24 = vmul.f32 %v4764_v8, %v853_v22  ;;  %v848_v25 = vpop.permute.xlu0 %847  ;;  %4131 = vmatprep.subr.bf16.mxu1 %v4221_v14 }
  0x9f   :  { %v1336_v26 = vmax.f32 %v1176_v21, 0.0  ;;  %v1107_v27 = vmul.f32 %v4764_v8, %v848_v25  ;;  %4005 = vmatprep.mubr.msk.bf16.mxu1 %vm1458_vm2, %v1392_v20  ;;  %4132 = vmatpush3.bf16.msra.mxu1 %v4221_v14 }
  0xa0   :  { %v1179_v28 = vadd.f32 %v4779_v12, %v1108_v24 }
  0xa1   :  { %v1393_v29 = vpack.c.bf16 %v1337_v23, %v1336_v26  ;;  %v1178_v30 = vadd.f32 %v4779_v12, %v1107_v27  ;;  %v863_v31 = vpop.permute.xlu1 %862 }
  0xa2   :  { %v1339_v32 = vmax.f32 %v1179_v28, 0.0  ;;  %v1110_v33 = vmul.f32 %v4764_v8, %v863_v31  ;;  %v858_v34 = vpop.permute.xlu0 %857 }
  0xa3   :  { %v1338_v35 = vmax.f32 %v1178_v30, 0.0  ;;  %v1109_v36 = vmul.f32 %v4764_v8, %v858_v34 }
  0xa4   :  { %v1181_v37 = vadd.f32 %v4779_v12, %v1110_v33  ;;  %4006 = vmatmul.mubr.msk.bf16.gmra.mxu1 %vm1458_vm2, %v1393_v29 }
  0xa5   :  { %v1394_v39 = vpack.c.bf16 %v1339_v32, %v1338_v35  ;;  %v1180_v40 = vadd.f32 %v4779_v12, %v1109_v36  ;;  %v873_v41 = vpop.permute.xlu1 %872 }
  0xa6   :  { %v1341_v42 = vmax.f32 %v1181_v37, 0.0  ;;  %v1112_v43 = vmul.f32 %v4764_v8, %v873_v41  ;;  %v868_v44 = vpop.permute.xlu0 %867 }
  0xa7   :  { %v1340_v45 = vmax.f32 %v1180_v40, 0.0  ;;  %v1111_v46 = vmul.f32 %v4764_v8, %v868_v44  ;;  %4009 = vmatprep.mubr.msk.bf16.mxu1 %vm1458_vm2, %v1394_v39 }
  0xa8   :  { %v1183_v47 = vadd.f32 %v4779_v12, %v1112_v43 }
  0xa9   :  { %v1395_v48 = vpack.c.bf16 %v1341_v42, %v1340_v45  ;;  %v1182_v49 = vadd.f32 %v4779_v12, %v1111_v46  ;;  %v883_v50 = vpop.permute.xlu1 %882 }
  0xaa   :  { %v1343_v51 = vmax.f32 %v1183_v47, 0.0  ;;  %v1114_v52 = vmul.f32 %v4764_v8, %v883_v50  ;;  %v878_v53 = vpop.permute.xlu0 %877  ;;  %v4880_v50 = vld [vmem:[%s5798_s3] ss:$0 sm:$0xff] }
  0xab   :  { %v1342_v54 = vmax.f32 %v1182_v49, 0.0  ;;  %v1113_v55 = vmul.f32 %v4764_v8, %v878_v53 }
  0xac   :  { %v1185_v56 = vadd.f32 %v4779_v12, %v1114_v52  ;;  %4010 = vmatmul.mubr.msk.bf16.gmra.mxu1 %vm1458_vm2, %v1395_v48  ;;  %v4222_v52 = vld [vmem:[%s5804_s9 + $0x28] sm:$0xff]  }
  0xad   :  { %v1396_v57 = vpack.c.bf16 %v1343_v51, %v1342_v54  ;;  %v1184_v58 = vadd.f32 %v4779_v12, %v1113_v55  ;;  %v893_v59 = vpop.permute.xlu1 %892  ;;  %4133 = vmatprep.subr.bf16.mxu1 %v4222_v52 }
  0xae   :  { %v1345_v60 = vmax.f32 %v1185_v56, 0.0  ;;  %v1116_v61 = vmul.f32 %v4764_v8, %v893_v59  ;;  %v888_v62 = vpop.permute.xlu0 %887  ;;  %4134 = vmatpush3.bf16.msra.mxu1 %v4222_v52 }
  0xaf   :  { %v1344_v63 = vmax.f32 %v1184_v58, 0.0  ;;  %v1115_v0 = vmul.f32 %v4764_v8, %v888_v62  ;;  %4013 = vmatprep.mubr.msk.bf16.mxu1 %vm1458_vm2, %v1396_v57 }
  0xb0   :  { %v1187_v1 = vadd.f32 %v4779_v12, %v1116_v61 }
  0xb1   :  { %v1397_v2 = vpack.c.bf16 %v1345_v60, %v1344_v63  ;;  %v1186_v4 = vadd.f32 %v4779_v12, %v1115_v0  ;;  %v903_v5 = vpop.permute.xlu1 %902 }
  0xb2   :  { %v1347_v6 = vmax.f32 %v1187_v1, 0.0  ;;  %v1118_v7 = vmul.f32 %v4764_v8, %v903_v5  ;;  %v898_v9 = vpop.permute.xlu0 %897 }
  0xb3   :  { %v1346_v10 = vmax.f32 %v1186_v4, 0.0  ;;  %v1117_v11 = vmul.f32 %v4764_v8, %v898_v9 }
  0xb4   :  { %v1189_v13 = vadd.f32 %v4779_v12, %v1118_v7  ;;  %4014 = vmatmul.mubr.msk.bf16.gmra.mxu1 %vm1458_vm2, %v1397_v2 }
  0xb5   :  { %v1398_v15 = vpack.c.bf16 %v1347_v6, %v1346_v10  ;;  %v1188_v16 = vadd.f32 %v4779_v12, %v1117_v11  ;;  %v913_v17 = vpop.permute.xlu1 %912 }
  0xb6   :  { %v1349_v18 = vmax.f32 %v1189_v13, 0.0  ;;  %v1120_v19 = vmul.f32 %v4764_v8, %v913_v17  ;;  %v908_v20 = vpop.permute.xlu0 %907 }
  0xb7   :  { %v1348_v21 = vmax.f32 %v1188_v16, 0.0  ;;  %v1119_v22 = vmul.f32 %v4764_v8, %v908_v20  ;;  %4017 = vmatprep.mubr.msk.bf16.mxu1 %vm1458_vm2, %v1398_v15 }
  0xb8   :  { %v1191_v23 = vadd.f32 %v4779_v12, %v1120_v19 }
  0xb9   :  { %v1399_v24 = vpack.c.bf16 %v1349_v18, %v1348_v21  ;;  %v1190_v25 = vadd.f32 %v4779_v12, %v1119_v22  ;;  %v923_v26 = vpop.permute.xlu1 %922 }
  0xba   :  { %v1351_v27 = vmax.f32 %v1191_v23, 0.0  ;;  %v1122_v28 = vmul.f32 %v4764_v8, %v923_v26  ;;  %v918_v29 = vpop.permute.xlu0 %917 }
  0xbb   :  { %v1350_v30 = vmax.f32 %v1190_v25, 0.0  ;;  %v1121_v31 = vmul.f32 %v4764_v8, %v918_v29 }
  0xbc   :  { %v1193_v32 = vadd.f32 %v4779_v12, %v1122_v28  ;;  %4018 = vmatmul.mubr.msk.bf16.gmra.mxu1 %vm1458_vm2, %v1399_v24 }
  0xbd   :  { %v1400_v33 = vpack.c.bf16 %v1351_v27, %v1350_v30  ;;  %v1192_v34 = vadd.f32 %v4779_v12, %v1121_v31  ;;  %v933_v35 = vpop.permute.xlu1 %932 }
  0xbe   :  { %v1353_v36 = vmax.f32 %v1193_v32, 0.0  ;;  %v1124_v37 = vmul.f32 %v4764_v8, %v933_v35  ;;  %v928_v38 = vpop.permute.xlu0 %927 }
  0xbf   :  { %v1352_v39 = vmax.f32 %v1192_v34, 0.0  ;;  %v1123_v40 = vmul.f32 %v4764_v8, %v928_v38  ;;  %4021 = vmatprep.mubr.msk.bf16.mxu1 %vm1458_vm2, %v1400_v33 }
  0xc0   :  { %v1195_v41 = vadd.f32 %v4779_v12, %v1124_v37  ;;  %v4223_v37 = vld [vmem:[%s5804_s9 + $0x20] sm:$0xff]  }
  0xc1   :  { %v1401_v42 = vpack.c.bf16 %v1353_v36, %v1352_v39  ;;  %v1194_v43 = vadd.f32 %v4779_v12, %v1123_v40  ;;  %v943_v44 = vpop.permute.xlu1 %942  ;;  %4135 = vmatprep.subr.bf16.mxu1 %v4223_v37 }
  0xc2   :  { %v1355_v45 = vmax.f32 %v1195_v41, 0.0  ;;  %v1126_v46 = vmul.f32 %v4764_v8, %v943_v44  ;;  %v938_v47 = vpop.permute.xlu0 %937  ;;  %4136 = vmatpush3.bf16.msra.mxu1 %v4223_v37 }
  0xc3   :  { %v1354_v48 = vmax.f32 %v1194_v43, 0.0  ;;  %v1125_v49 = vmul.f32 %v4764_v8, %v938_v47 }
  0xc4   :  { %v1197_v51 = vadd.f32 %v4779_v12, %v1126_v46  ;;  %4022 = vmatmul.mubr.msk.bf16.gmra.mxu1 %vm1458_vm2, %v1401_v42 }
  0xc5   :  { %v1402_v53 = vpack.c.bf16 %v1355_v45, %v1354_v48  ;;  %v1196_v54 = vadd.f32 %v4779_v12, %v1125_v49  ;;  %v3891_v55 = vpop.f32.mrf.mxu0  ;;  %v953_v56 = vpop.permute.xlu1 %952 }
  0xc6   :  { %v1357_v57 = vmax.f32 %v1197_v51, 0.0  ;;  %v451_v58 = vadd.f32 %v3891_v55, %v4880_v50  ;;  %v1128_v59 = vmul.f32 %v4764_v8, %v953_v56  ;;  %v948_v60 = vpop.permute.xlu0 %947 }
  0xc7   :  { %v1356_v61 = vmax.f32 %v1196_v54, 0.0  ;;  %v1127_v62 = vmul.f32 %v4764_v8, %v948_v60  ;;  %v445_v63 = vpop.f32.mrf.mxu0  ;;  %4025 = vmatprep.mubr.msk.bf16.mxu1 %vm1458_vm2, %v1402_v53 }
  0xc8   :  { %v1199_v0 = vadd.f32 %v4779_v12, %v1128_v59  ;;  %v446_v1 = vadd.f32 %v4880_v50, %v445_v63  ;;  %v1227_v4 = vmax.f32 %v451_v58, 0.0 }
  0xc9   :  { %v1403_v2 = vpack.c.bf16 %v1357_v57, %v1356_v61  ;;  %v1198_v5 = vadd.f32 %v4779_v12, %v1127_v62  ;;  %v3894_v6 = vpop.f32.mrf.mxu0  ;;  %v963_v7 = vpop.permute.xlu1 %962 }
  0xca   :  { %v1359_v9 = vmax.f32 %v1199_v0, 0.0  ;;  %v1226_v10 = vmax.f32 %v446_v1, 0.0  ;;  %v461_v11 = vadd.f32 %v3894_v6, %v4880_v50  ;;  %v1130_v13 = vmul.f32 %v4764_v8, %v963_v7  ;;  %v958_v14 = vpop.permute.xlu0 %957 }
  0xcb   :  { %v1358_v15 = vmax.f32 %v1198_v5, 0.0  ;;  %v1129_v16 = vmul.f32 %v4764_v8, %v958_v14  ;;  %v455_v17 = vpop.f32.mrf.mxu0 }
  0xcc   :  { %v1290_v18 = vpack.c.bf16 %v1227_v4, %v1226_v10  ;;  %v1201_v19 = vadd.f32 %v4779_v12, %v1130_v13  ;;  %v456_v20 = vadd.f32 %v4880_v50, %v455_v17  ;;  %4026 = vmatmul.mubr.msk.bf16.gmra.mxu1 %vm1458_vm2, %v1403_v2  ;;  %v1229_v22 = vmax.f32 %v461_v11, 0.0 }
  0xcd   :  { %v1404_v21 = vpack.c.bf16 %v1359_v9, %v1358_v15  ;;  %v1200_v23 = vadd.f32 %v4779_v12, %v1129_v16  ;;  %v3897_v24 = vpop.f32.mrf.mxu0  ;;  %v973_v25 = vpop.permute.xlu1 %972 }
  0xce   :  { %v1361_v26 = vmax.f32 %v1201_v19, 0.0  ;;  %v1228_v27 = vmax.f32 %v456_v20, 0.0  ;;  %v471_v28 = vadd.f32 %v3897_v24, %v4880_v50  ;;  %4065 = vmatprep.mubr.msk.bf16.mxu0 %vm1458_vm2, %v1290_v18  ;;  %v1132_v29 = vmul.f32 %v4764_v8, %v973_v25  ;;  %v968_v30 = vpop.permute.xlu0 %967 }
  0xcf   :  { %v1360_v31 = vmax.f32 %v1200_v23, 0.0  ;;  %v1131_v32 = vmul.f32 %v4764_v8, %v968_v30  ;;  %v465_v33 = vpop.f32.mrf.mxu0  ;;  %4029 = vmatprep.mubr.msk.bf16.mxu1 %vm1458_vm2, %v1404_v21 }
  0xd0   :  { %v1291_v34 = vpack.c.bf16 %v1229_v22, %v1228_v27  ;;  %v1203_v35 = vadd.f32 %v4779_v12, %v1132_v29  ;;  %v466_v36 = vadd.f32 %v4880_v50, %v465_v33  ;;  %v1231_v39 = vmax.f32 %v471_v28, 0.0 }
  0xd1   :  { %v1405_v38 = vpack.c.bf16 %v1361_v26, %v1360_v31  ;;  %v1202_v40 = vadd.f32 %v4779_v12, %v1131_v32  ;;  %v3900_v41 = vpop.f32.mrf.mxu0  ;;  %v983_v42 = vpop.permute.xlu1 %982 }
  0xd2   :  { %v1363_v43 = vmax.f32 %v1203_v35, 0.0  ;;  %v1230_v44 = vmax.f32 %v466_v36, 0.0  ;;  %v481_v45 = vadd.f32 %v3900_v41, %v4880_v50  ;;  %4066 = vmatmul.mubr.msk.bf16.vlgmr.msra.gmra.mxu0 %vm1458_vm2, %v1291_v34  ;;  %v1134_v46 = vmul.f32 %v4764_v8, %v983_v42  ;;  %v978_v47 = vpop.permute.xlu0 %977  ;;  %v4224_v42 = vld [vmem:[%s5804_s9 + $0x18] sm:$0xff]  }
  0xd3   :  { %v1362_v48 = vmax.f32 %v1202_v40, 0.0  ;;  %v1133_v49 = vmul.f32 %v4764_v8, %v978_v47  ;;  %v475_v51 = vpop.f32.mrf.mxu0  ;;  %4137 = vmatprep.subr.bf16.mxu1 %v4224_v42 }
  0xd4   :  { %v1292_v52 = vpack.c.bf16 %v1231_v39, %v1230_v44  ;;  %v1205_v53 = vadd.f32 %v4779_v12, %v1134_v46  ;;  %v476_v54 = vadd.f32 %v4880_v50, %v475_v51  ;;  %4030 = vmatmul.mubr.msk.bf16.gmra.mxu1 %vm1458_vm2, %v1405_v38  ;;  %v1233_v56 = vmax.f32 %v481_v45, 0.0 }
  0xd5   :  { %v1406_v55 = vpack.c.bf16 %v1363_v43, %v1362_v48  ;;  %v1204_v57 = vadd.f32 %v4779_v12, %v1133_v49  ;;  %v3903_v58 = vpop.f32.mrf.mxu0  ;;  %v993_v59 = vpop.permute.xlu1 %992  ;;  %4138 = vmatpush3.bf16.msra.mxu1 %v4224_v42 }
  0xd6   :  { %v1365_v60 = vmax.f32 %v1205_v53, 0.0  ;;  %v1232_v61 = vmax.f32 %v476_v54, 0.0  ;;  %v491_v62 = vadd.f32 %v3903_v58, %v4880_v50  ;;  %4069 = vmatprep.mubr.msk.bf16.mxu0 %vm1458_vm2, %v1292_v52  ;;  %v1136_v63 = vmul.f32 %v4764_v8, %v993_v59  ;;  %v988_v0 = vpop.permute.xlu0 %987 }
  0xd7   :  { %v1364_v1 = vmax.f32 %v1204_v57, 0.0  ;;  %v1135_v2 = vmul.f32 %v4764_v8, %v988_v0  ;;  %v485_v4 = vpop.f32.mrf.mxu0  ;;  %4033 = vmatprep.mubr.msk.bf16.mxu1 %vm1458_vm2, %v1406_v55 }
  0xd8   :  { %v1293_v5 = vpack.c.bf16 %v1233_v56, %v1232_v61  ;;  %v1207_v6 = vadd.f32 %v4779_v12, %v1136_v63  ;;  %v486_v7 = vadd.f32 %v4880_v50, %v485_v4  ;;  %v1235_v10 = vmax.f32 %v491_v62, 0.0 }
  0xd9   :  { %v1407_v9 = vpack.c.bf16 %v1365_v60, %v1364_v1  ;;  %v1206_v11 = vadd.f32 %v4779_v12, %v1135_v2  ;;  %v3906_v13 = vpop.f32.mrf.mxu0  ;;  %v1003_v14 = vpop.permute.xlu1 %1002 }
  0xda   :  { %v1367_v15 = vmax.f32 %v1207_v6, 0.0  ;;  %v1234_v16 = vmax.f32 %v486_v7, 0.0  ;;  %v501_v17 = vadd.f32 %v3906_v13, %v4880_v50  ;;  %4070 = vmatmul.mubr.msk.bf16.gmra.mxu0 %vm1458_vm2, %v1293_v5  ;;  %v1138_v18 = vmul.f32 %v4764_v8, %v1003_v14  ;;  %v998_v19 = vpop.permute.xlu0 %997 }
  0xdb   :  { %v1366_v20 = vmax.f32 %v1206_v11, 0.0  ;;  %v1137_v21 = vmul.f32 %v4764_v8, %v998_v19  ;;  %v495_v22 = vpop.f32.mrf.mxu0 }
  0xdc   :  { %v1294_v23 = vpack.c.bf16 %v1235_v10, %v1234_v16  ;;  %v1209_v24 = vadd.f32 %v4779_v12, %v1138_v18  ;;  %v496_v25 = vadd.f32 %v4880_v50, %v495_v22  ;;  %4034 = vmatmul.mubr.msk.bf16.gmra.mxu1 %vm1458_vm2, %v1407_v9  ;;  %v1237_v27 = vmax.f32 %v501_v17, 0.0 }
  0xdd   :  { %v1408_v26 = vpack.c.bf16 %v1367_v15, %v1366_v20  ;;  %v1208_v28 = vadd.f32 %v4779_v12, %v1137_v21  ;;  %v3909_v29 = vpop.f32.mrf.mxu0  ;;  %v1013_v30 = vpop.permute.xlu1 %1012 }
  0xde   :  { %v1369_v31 = vmax.f32 %v1209_v24, 0.0  ;;  %v1236_v32 = vmax.f32 %v496_v25, 0.0  ;;  %v511_v33 = vadd.f32 %v3909_v29, %v4880_v50  ;;  %4073 = vmatprep.mubr.msk.bf16.mxu0 %vm1458_vm2, %v1294_v23  ;;  %v1140_v34 = vmul.f32 %v4764_v8, %v1013_v30  ;;  %v1008_v35 = vpop.permute.xlu0 %1007 }
  0xdf   :  { %v1368_v36 = vmax.f32 %v1208_v28, 0.0  ;;  %v1139_v37 = vmul.f32 %v4764_v8, %v1008_v35  ;;  %v505_v38 = vpop.f32.mrf.mxu0  ;;  %4037 = vmatprep.mubr.msk.bf16.mxu1 %vm1458_vm2, %v1408_v26 }
  0xe0   :  { %v1295_v39 = vpack.c.bf16 %v1237_v27, %v1236_v32  ;;  %v1211_v40 = vadd.f32 %v4779_v12, %v1140_v34  ;;  %v506_v41 = vadd.f32 %v4880_v50, %v505_v38  ;;  %v1239_v44 = vmax.f32 %v511_v33, 0.0 }
  0xe1   :  { %v1409_v43 = vpack.c.bf16 %v1369_v31, %v1368_v36  ;;  %v1210_v45 = vadd.f32 %v4779_v12, %v1139_v37  ;;  %v3912_v46 = vpop.f32.mrf.mxu0  ;;  %v1023_v47 = vpop.permute.xlu1 %1022 }
  0xe2   :  { %v1371_v48 = vmax.f32 %v1211_v40, 0.0  ;;  %v1238_v49 = vmax.f32 %v506_v41, 0.0  ;;  %v521_v51 = vadd.f32 %v3912_v46, %v4880_v50  ;;  %4074 = vmatmul.mubr.msk.bf16.gmra.mxu0 %vm1458_vm2, %v1295_v39  ;;  %v1142_v52 = vmul.f32 %v4764_v8, %v1023_v47  ;;  %v1018_v53 = vpop.permute.xlu0 %1017  ;;  %v4225_v47 = vld [vmem:[%s5804_s9 + $0x10] sm:$0xff]  }
  0xe3   :  { %v1370_v54 = vmax.f32 %v1210_v45, 0.0  ;;  %v1141_v55 = vmul.f32 %v4764_v8, %v1018_v53  ;;  %v515_v56 = vpop.f32.mrf.mxu0  ;;  %4139 = vmatprep.subr.bf16.mxu1 %v4225_v47 }
  0xe4   :  { %v1296_v57 = vpack.c.bf16 %v1239_v44, %v1238_v49  ;;  %v1213_v58 = vadd.f32 %v4779_v12, %v1142_v52  ;;  %v516_v59 = vadd.f32 %v4880_v50, %v515_v56  ;;  %4038 = vmatmul.mubr.msk.bf16.gmra.mxu1 %vm1458_vm2, %v1409_v43  ;;  %v1241_v61 = vmax.f32 %v521_v51, 0.0 }
  0xe5   :  { %v1410_v60 = vpack.c.bf16 %v1371_v48, %v1370_v54  ;;  %v1212_v62 = vadd.f32 %v4779_v12, %v1141_v55  ;;  %v3915_v63 = vpop.f32.mrf.mxu0  ;;  %v1033_v0 = vpop.permute.xlu1 %1032  ;;  %4140 = vmatpush3.bf16.msra.mxu1 %v4225_v47 }
  0xe6   :  { %v1373_v1 = vmax.f32 %v1213_v58, 0.0  ;;  %v1240_v2 = vmax.f32 %v516_v59, 0.0  ;;  %v531_v4 = vadd.f32 %v3915_v63, %v4880_v50  ;;  %4077 = vmatprep.mubr.msk.bf16.mxu0 %vm1458_vm2, %v1296_v57  ;;  %v1144_v5 = vmul.f32 %v4764_v8, %v1033_v0  ;;  %v1028_v6 = vpop.permute.xlu0 %1027 }
  0xe7   :  { %v1372_v7 = vmax.f32 %v1212_v62, 0.0  ;;  %v1143_v9 = vmul.f32 %v4764_v8, %v1028_v6  ;;  %v525_v10 = vpop.f32.mrf.mxu0  ;;  %4041 = vmatprep.mubr.msk.bf16.mxu1 %vm1458_vm2, %v1410_v60 }
  0xe8   :  { %v1297_v11 = vpack.c.bf16 %v1241_v61, %v1240_v2  ;;  %v1215_v13 = vadd.f32 %v4779_v12, %v1144_v5  ;;  %v526_v14 = vadd.f32 %v4880_v50, %v525_v10  ;;  %v1243_v16 = vmax.f32 %v531_v4, 0.0 }
  0xe9   :  { %v1411_v15 = vpack.c.bf16 %v1373_v1, %v1372_v7  ;;  %v1214_v17 = vadd.f32 %v4779_v12, %v1143_v9  ;;  %v3918_v18 = vpop.f32.mrf.mxu0  ;;  %v1043_v19 = vpop.permute.xlu1 %1042 }
  0xea   :  { %v1375_v20 = vmax.f32 %v1215_v13, 0.0  ;;  %v1242_v21 = vmax.f32 %v526_v14, 0.0  ;;  %v541_v22 = vadd.f32 %v3918_v18, %v4880_v50  ;;  %4078 = vmatmul.mubr.msk.bf16.gmra.mxu0 %vm1458_vm2, %v1297_v11  ;;  %v1146_v23 = vmul.f32 %v4764_v8, %v1043_v19  ;;  %v1038_v24 = vpop.permute.xlu0 %1037 }
  0xeb   :  { %v1374_v25 = vmax.f32 %v1214_v17, 0.0  ;;  %v1145_v26 = vmul.f32 %v4764_v8, %v1038_v24  ;;  %v535_v27 = vpop.f32.mrf.mxu0 }
  0xec   :  { %v1298_v28 = vpack.c.bf16 %v1243_v16, %v1242_v21  ;;  %v1217_v29 = vadd.f32 %v4779_v12, %v1146_v23  ;;  %v536_v30 = vadd.f32 %v4880_v50, %v535_v27  ;;  %4042 = vmatmul.mubr.msk.bf16.gmra.mxu1 %vm1458_vm2, %v1411_v15  ;;  %v1245_v32 = vmax.f32 %v541_v22, 0.0 }
  0xed   :  { %v1412_v31 = vpack.c.bf16 %v1375_v20, %v1374_v25  ;;  %v1216_v33 = vadd.f32 %v4779_v12, %v1145_v26  ;;  %v3921_v34 = vpop.f32.mrf.mxu0  ;;  %v1053_v35 = vpop.permute.xlu1 %1052 }
  0xee   :  { %v1377_v36 = vmax.f32 %v1217_v29, 0.0  ;;  %v1244_v37 = vmax.f32 %v536_v30, 0.0  ;;  %v551_v38 = vadd.f32 %v3921_v34, %v4880_v50  ;;  %4081 = vmatprep.mubr.msk.bf16.mxu0 %vm1458_vm2, %v1298_v28  ;;  %v1148_v39 = vmul.f32 %v4764_v8, %v1053_v35  ;;  %v1048_v40 = vpop.permute.xlu0 %1047 }
  0xef   :  { %v1376_v41 = vmax.f32 %v1216_v33, 0.0  ;;  %v1147_v42 = vmul.f32 %v4764_v8, %v1048_v40  ;;  %v545_v43 = vpop.f32.mrf.mxu0  ;;  %4045 = vmatprep.mubr.msk.bf16.mxu1 %vm1458_vm2, %v1412_v31 }
  0xf0   :  { %v1299_v44 = vpack.c.bf16 %v1245_v32, %v1244_v37  ;;  %v1219_v45 = vadd.f32 %v4779_v12, %v1148_v39  ;;  %v546_v46 = vadd.f32 %v4880_v50, %v545_v43  ;;  %v1247_v49 = vmax.f32 %v551_v38, 0.0 }
  0xf1   :  { %v1413_v48 = vpack.c.bf16 %v1377_v36, %v1376_v41  ;;  %v1218_v51 = vadd.f32 %v4779_v12, %v1147_v42  ;;  %v3924_v52 = vpop.f32.mrf.mxu0  ;;  %v1063_v53 = vpop.permute.xlu1 %1062 }
  0xf2   :  { %v1379_v54 = vmax.f32 %v1219_v45, 0.0  ;;  %v1246_v55 = vmax.f32 %v546_v46, 0.0  ;;  %v561_v56 = vadd.f32 %v3924_v52, %v4880_v50  ;;  %4082 = vmatmul.mubr.msk.bf16.gmra.mxu0 %vm1458_vm2, %v1299_v44  ;;  %v1150_v57 = vmul.f32 %v4764_v8, %v1063_v53  ;;  %v1058_v58 = vpop.permute.xlu0 %1057  ;;  %v4226_v46 = vld [vmem:[%s5804_s9 + $0x8] sm:$0xff]  }
  0xf3   :  { %v1378_v59 = vmax.f32 %v1218_v51, 0.0  ;;  %v1149_v60 = vmul.f32 %v4764_v8, %v1058_v58  ;;  %v555_v61 = vpop.f32.mrf.mxu0  ;;  %4141 = vmatprep.subr.bf16.mxu1 %v4226_v46 }
  0xf4   :  { %v1300_v62 = vpack.c.bf16 %v1247_v49, %v1246_v55  ;;  %v1221_v63 = vadd.f32 %v4779_v12, %v1150_v57  ;;  %v556_v0 = vadd.f32 %v4880_v50, %v555_v61  ;;  %4046 = vmatmul.mubr.msk.bf16.gmra.mxu1 %vm1458_vm2, %v1413_v48  ;;  %v1249_v2 = vmax.f32 %v561_v56, 0.0 }
  0xf5   :  { %v1414_v1 = vpack.c.bf16 %v1379_v54, %v1378_v59  ;;  %v1220_v4 = vadd.f32 %v4779_v12, %v1149_v60  ;;  %v3927_v5 = vpop.f32.mrf.mxu0  ;;  %v1073_v6 = vpop.permute.xlu1 %1072  ;;  %4142 = vmatpush3.bf16.msra.mxu1 %v4226_v46 }
  0xf6   :  { %v1381_v7 = vmax.f32 %v1221_v63, 0.0  ;;  %v1248_v9 = vmax.f32 %v556_v0, 0.0  ;;  %v571_v10 = vadd.f32 %v3927_v5, %v4880_v50  ;;  %4085 = vmatprep.mubr.msk.bf16.mxu0 %vm1458_vm2, %v1300_v62  ;;  %v1152_v11 = vmul.f32 %v4764_v8, %v1073_v6  ;;  %v1068_v13 = vpop.permute.xlu0 %1067 }
  0xf7   :  { %v1380_v14 = vmax.f32 %v1220_v4, 0.0  ;;  %v1151_v15 = vmul.f32 %v4764_v8, %v1068_v13  ;;  %v565_v16 = vpop.f32.mrf.mxu0  ;;  %4049 = vmatprep.mubr.msk.bf16.mxu1 %vm1458_vm2, %v1414_v1 }
  0xf8   :  { %v1301_v17 = vpack.c.bf16 %v1249_v2, %v1248_v9  ;;  %v1223_v18 = vadd.f32 %v4779_v12, %v1152_v11  ;;  %v566_v19 = vadd.f32 %v4880_v50, %v565_v16  ;;  %v1251_v21 = vmax.f32 %v571_v10, 0.0 }
  0xf9   :  { %v1415_v20 = vpack.c.bf16 %v1381_v7, %v1380_v14  ;;  %v1222_v22 = vadd.f32 %v4779_v12, %v1151_v15  ;;  %v3930_v23 = vpop.f32.mrf.mxu0  ;;  %v1083_v24 = vpop.permute.xlu1 %1082  ;;  %v4227_v15 = vld [vmem:[%s5804_s9] sm:$0xff]  }
  0xfa   :  { %v1383_v25 = vmax.f32 %v1223_v18, 0.0  ;;  %v1250_v26 = vmax.f32 %v566_v19, 0.0  ;;  %v581_v27 = vadd.f32 %v3930_v23, %v4880_v50  ;;  %4086 = vmatmul.mubr.msk.bf16.gmra.mxu0 %vm1458_vm2, %v1301_v17  ;;  %v1154_v28 = vmul.f32 %v4764_v8, %v1083_v24  ;;  %v1078_v29 = vpop.permute.xlu0 %1077  ;;  %4143 = vmatprep.subr.bf16.mxu1 %v4227_v15 }
  0xfb   :  { %v1382_v30 = vmax.f32 %v1222_v22, 0.0  ;;  %v1153_v31 = vmul.f32 %v4764_v8, %v1078_v29  ;;  %v575_v32 = vpop.f32.mrf.mxu0  ;;  %4144 = vmatpush3.bf16.msra.mxu1 %v4227_v15 }
  0xfc   :  { %v1302_v33 = vpack.c.bf16 %v1251_v21, %v1250_v26  ;;  %v1225_v34 = vadd.f32 %v4779_v12, %v1154_v28  ;;  %v576_v35 = vadd.f32 %v4880_v50, %v575_v32  ;;  %4050 = vmatmul.mubr.msk.bf16.gmra.mxu1 %vm1458_vm2, %v1415_v20  ;;  %v1253_v39 = vmax.f32 %v581_v27, 0.0 }
  0xfd   :  { %v1416_v36 = vpack.c.bf16 %v1383_v25, %v1382_v30  ;;  %v1224_v37 = vadd.f32 %v4779_v12, %v1153_v31  ;;  %v3933_v38 = vpop.f32.mrf.mxu0 }
  0xfe   :  { %v1385_v40 = vmax.f32 %v1225_v34, 0.0  ;;  %v1252_v41 = vmax.f32 %v576_v35, 0.0  ;;  %v591_v42 = vadd.f32 %v3933_v38, %v4880_v50  ;;  %4089 = vmatprep.mubr.msk.bf16.mxu0 %vm1458_vm2, %v1302_v33 }
  0xff   :  { %v1384_v8 = vmax.f32 %v1224_v37, 0.0  ;;  %v585_v43 = vpop.f32.mrf.mxu0  ;;  %4053 = vmatprep.mubr.msk.bf16.mxu1 %vm1458_vm2, %v1416_v36 }
 0x100   :  { %v1303_v44 = vpack.c.bf16 %v1253_v39, %v1252_v41  ;;  %v586_v45 = vadd.f32 %v4880_v50, %v585_v43  ;;  %v1255_v48 = vmax.f32 %v591_v42, 0.0 }
 0x101   :  { %v1417_v12 = vpack.c.bf16 %v1385_v40, %v1384_v8  ;;  %v3936_v47 = vpop.f32.mrf.mxu0 }
 0x102   :  { %v1254_v49 = vmax.f32 %v586_v45, 0.0  ;;  %v601_v51 = vadd.f32 %v3936_v47, %v4880_v50  ;;  %4090 = vmatmul.mubr.msk.bf16.gmra.mxu0 %vm1458_vm2, %v1303_v44 }
 0x103   :  { %v595_v52 = vpop.f32.mrf.mxu0 }
 0x104   :  { %v1304_v53 = vpack.c.bf16 %v1255_v48, %v1254_v49  ;;  %v596_v54 = vadd.f32 %v4880_v50, %v595_v52  ;;  %4054 = vmatmul.mubr.msk.bf16.gmra.mxu1 %vm1458_vm2, %v1417_v12  ;;  %v1257_v56 = vmax.f32 %v601_v51, 0.0 }
 0x105   :  { %v3939_v55 = vpop.f32.mrf.mxu0 }
 0x106   :  { %v1256_v57 = vmax.f32 %v596_v54, 0.0  ;;  %v611_v58 = vadd.f32 %v3939_v55, %v4880_v50  ;;  %4093 = vmatprep.mubr.msk.bf16.mxu0 %vm1458_vm2, %v1304_v53 }
 0x107   :  { %v605_v59 = vpop.f32.mrf.mxu0 }
 0x108   :  { %v1305_v60 = vpack.c.bf16 %v1257_v56, %v1256_v57  ;;  %v606_v61 = vadd.f32 %v4880_v50, %v605_v59  ;;  %v1259_v63 = vmax.f32 %v611_v58, 0.0 }
 0x109   :  { %v3942_v62 = vpop.f32.mrf.mxu0 }
 0x10a   :  { %v1258_v0 = vmax.f32 %v606_v61, 0.0  ;;  %v621_v1 = vadd.f32 %v3942_v62, %v4880_v50  ;;  %4094 = vmatmul.mubr.msk.bf16.gmra.mxu0 %vm1458_vm2, %v1305_v60 }
 0x10b   :  { %v615_v2 = vpop.f32.mrf.mxu0 }
 0x10c   :  { %v1306_v4 = vpack.c.bf16 %v1259_v63, %v1258_v0  ;;  %v616_v5 = vadd.f32 %v4880_v50, %v615_v2  ;;  %v1261_v7 = vmax.f32 %v621_v1, 0.0 }
 0x10d   :  { %v3945_v6 = vpop.f32.mrf.mxu0 }
 0x10e   :  { %v1260_v9 = vmax.f32 %v616_v5, 0.0  ;;  %v631_v10 = vadd.f32 %v3945_v6, %v4880_v50  ;;  %4097 = vmatprep.mubr.msk.bf16.mxu0 %vm1458_vm2, %v1306_v4 }
 0x10f   :  { %v625_v11 = vpop.f32.mrf.mxu0 }
 0x110   :  { %v1307_v13 = vpack.c.bf16 %v1261_v7, %v1260_v9  ;;  %v626_v14 = vadd.f32 %v4880_v50, %v625_v11  ;;  %v1263_v17 = vmax.f32 %v631_v10, 0.0 }
 0x111   :  { %v3948_v16 = vpop.f32.mrf.mxu0 }
 0x112   :  { %v1262_v18 = vmax.f32 %v626_v14, 0.0  ;;  %v641_v19 = vadd.f32 %v3948_v16, %v4880_v50  ;;  %4098 = vmatmul.mubr.msk.bf16.gmra.mxu0 %vm1458_vm2, %v1307_v13 }
 0x113   :  { %v635_v20 = vpop.f32.mrf.mxu0 }
 0x114   :  { %v1308_v21 = vpack.c.bf16 %v1263_v17, %v1262_v18  ;;  %v636_v22 = vadd.f32 %v4880_v50, %v635_v20  ;;  %v1265_v24 = vmax.f32 %v641_v19, 0.0 }
 0x115   :  { %v3951_v23 = vpop.f32.mrf.mxu0 }
 0x116   :  { %v1264_v25 = vmax.f32 %v636_v22, 0.0  ;;  %v651_v26 = vadd.f32 %v3951_v23, %v4880_v50  ;;  %4101 = vmatprep.mubr.msk.bf16.mxu0 %vm1458_vm2, %v1308_v21 }
 0x117   :  { %v645_v27 = vpop.f32.mrf.mxu0 }
 0x118   :  { %v1309_v28 = vpack.c.bf16 %v1265_v24, %v1264_v25  ;;  %v646_v29 = vadd.f32 %v4880_v50, %v645_v27  ;;  %v1267_v31 = vmax.f32 %v651_v26, 0.0 }
 0x119   :  { %v3954_v30 = vpop.f32.mrf.mxu0 }
 0x11a   :  { %v1266_v32 = vmax.f32 %v646_v29, 0.0  ;;  %v661_v33 = vadd.f32 %v3954_v30, %v4880_v50  ;;  %4102 = vmatmul.mubr.msk.bf16.gmra.mxu0 %vm1458_vm2, %v1309_v28 }
 0x11b   :  { %v655_v34 = vpop.f32.mrf.mxu0 }
 0x11c   :  { %v1310_v35 = vpack.c.bf16 %v1267_v31, %v1266_v32  ;;  %v656_v36 = vadd.f32 %v4880_v50, %v655_v34  ;;  %v1269_v38 = vmax.f32 %v661_v33, 0.0 }
 0x11d   :  { %v3957_v37 = vpop.f32.mrf.mxu0 }
 0x11e   :  { %v1268_v39 = vmax.f32 %v656_v36, 0.0  ;;  %v671_v40 = vadd.f32 %v3957_v37, %v4880_v50  ;;  %4105 = vmatprep.mubr.msk.bf16.mxu0 %vm1458_vm2, %v1310_v35 }
 0x11f   :  { %v665_v41 = vpop.f32.mrf.mxu0 }
 0x120   :  { %v1311_v42 = vpack.c.bf16 %v1269_v38, %v1268_v39  ;;  %v666_v8 = vadd.f32 %v4880_v50, %v665_v41  ;;  %v1271_v44 = vmax.f32 %v671_v40, 0.0 }
 0x121   :  { %v3960_v43 = vpop.f32.mrf.mxu0 }
 0x122   :  { %v1270_v45 = vmax.f32 %v666_v8, 0.0  ;;  %v681_v46 = vadd.f32 %v3960_v43, %v4880_v50  ;;  %4106 = vmatmul.mubr.msk.bf16.gmra.mxu0 %vm1458_vm2, %v1311_v42 }
 0x123   :  { %v675_v12 = vpop.f32.mrf.mxu0 }
 0x124   :  { %v1312_v47 = vpack.c.bf16 %v1271_v44, %v1270_v45  ;;  %v676_v48 = vadd.f32 %v4880_v50, %v675_v12  ;;  %v1273_v51 = vmax.f32 %v681_v46, 0.0 }
 0x125   :  { %v3963_v49 = vpop.f32.mrf.mxu0 }
 0x126   :  { %v1272_v52 = vmax.f32 %v676_v48, 0.0  ;;  %v691_v53 = vadd.f32 %v3963_v49, %v4880_v50  ;;  %4109 = vmatprep.mubr.msk.bf16.mxu0 %vm1458_vm2, %v1312_v47 }
 0x127   :  { %v685_v54 = vpop.f32.mrf.mxu0 }
 0x128   :  { %v1313_v55 = vpack.c.bf16 %v1273_v51, %v1272_v52  ;;  %v686_v56 = vadd.f32 %v4880_v50, %v685_v54  ;;  %v1275_v58 = vmax.f32 %v691_v53, 0.0 }
 0x129   :  { %v3966_v57 = vpop.f32.mrf.mxu0 }
 0x12a   :  { %v1274_v59 = vmax.f32 %v686_v56, 0.0  ;;  %v701_v60 = vadd.f32 %v3966_v57, %v4880_v50  ;;  %4110 = vmatmul.mubr.msk.bf16.gmra.mxu0 %vm1458_vm2, %v1313_v55 }
 0x12b   :  { %v695_v61 = vpop.f32.mrf.mxu0 }
 0x12c   :  { %v1314_v62 = vpack.c.bf16 %v1275_v58, %v1274_v59  ;;  %v696_v63 = vadd.f32 %v4880_v50, %v695_v61  ;;  %v1277_v1 = vmax.f32 %v701_v60, 0.0 }
 0x12d   :  { %v3969_v0 = vpop.f32.mrf.mxu0 }
 0x12e   :  { %v1276_v2 = vmax.f32 %v696_v63, 0.0  ;;  %v711_v4 = vadd.f32 %v3969_v0, %v4880_v50  ;;  %4113 = vmatprep.mubr.msk.bf16.mxu0 %vm1458_vm2, %v1314_v62 }
 0x12f   :  { %v705_v5 = vpop.f32.mrf.mxu0 }
 0x130   :  { %v1315_v6 = vpack.c.bf16 %v1277_v1, %v1276_v2  ;;  %v706_v7 = vadd.f32 %v4880_v50, %v705_v5  ;;  %v1279_v10 = vmax.f32 %v711_v4, 0.0 }
 0x131   :  { %v3972_v9 = vpop.f32.mrf.mxu0 }
 0x132   :  { %v1278_v11 = vmax.f32 %v706_v7, 0.0  ;;  %v721_v13 = vadd.f32 %v3972_v9, %v4880_v50  ;;  %4114 = vmatmul.mubr.msk.bf16.gmra.mxu0 %vm1458_vm2, %v1315_v6 }
 0x133   :  { %v715_v14 = vpop.f32.mrf.mxu0 }
 0x134   :  { %v1316_v15 = vpack.c.bf16 %v1279_v10, %v1278_v11  ;;  %v716_v16 = vadd.f32 %v4880_v50, %v715_v14  ;;  %v1281_v18 = vmax.f32 %v721_v13, 0.0 }
 0x135   :  { %v3975_v17 = vpop.f32.mrf.mxu0 }
 0x136   :  { %v1280_v19 = vmax.f32 %v716_v16, 0.0  ;;  %v731_v20 = vadd.f32 %v3975_v17, %v4880_v50  ;;  %4117 = vmatprep.mubr.msk.bf16.mxu0 %vm1458_vm2, %v1316_v15  ;;  %v2289_v16 = vlaneseq }
 0x137   :  { %v725_v21 = vpop.f32.mrf.mxu0 }
 0x138   :  { %v1317_v22 = vpack.c.bf16 %v1281_v18, %v1280_v19  ;;  %v726_v23 = vadd.f32 %v4880_v50, %v725_v21  ;;  %v1283_v25 = vmax.f32 %v731_v20, 0.0  ;;  %v5119_v18 = vshrl.u32 %v2289_v16, 7  ;;  %v2285_v19 = vld [vmem:[%s5803_s8] sm:$0x1] }
 0x139   :  { %v3978_v24 = vpop.f32.mrf.mxu0 }
 0x13a   :  { %v1282_v26 = vmax.f32 %v726_v23, 0.0  ;;  %v741_v27 = vadd.f32 %v3978_v24, %v4880_v50  ;;  %4118 = vmatmul.mubr.msk.bf16.gmra.mxu0 %vm1458_vm2, %v1317_v22  ;;  %v2287_v23 = vpack.i.b16 %v2285_v19, %v2285_v19  ;;  %v2291_v24 = vsub.s32 0, %v5119_v18 }
 0x13b   :  { %v735_v28 = vpop.f32.mrf.mxu0 }
 0x13c   :  { %v1318_v29 = vpack.c.bf16 %v1283_v25, %v1282_v26  ;;  %v736_v30 = vadd.f32 %v4880_v50, %v735_v28  ;;  %v1285_v32 = vmax.f32 %v741_v27, 0.0 }
 0x13d   :  { %v3981_v31 = vpop.f32.mrf.mxu0 }
 0x13e   :  { %v1284_v33 = vmax.f32 %v736_v30, 0.0  ;;  %v751_v34 = vadd.f32 %v3981_v31, %v4880_v50  ;;  %4121 = vmatprep.mubr.msk.bf16.mxu0 %vm1458_vm2, %v1318_v29  ;;  %v5131_v29 = vrot.slane %v2287_v23, %v2291_v24 }
 0x13f   :  { %v745_v35 = vpop.f32.mrf.mxu0 }
 0x140   :  { %v1319_v36 = vpack.c.bf16 %v1285_v32, %v1284_v33  ;;  %v746_v37 = vadd.f32 %v4880_v50, %v745_v35  ;;  %v1287_v39 = vmax.f32 %v751_v34, 0.0 }
 0x141   :  { %v3984_v38 = vpop.f32.mrf.mxu0 }
 0x142   :  { %v1286_v40 = vmax.f32 %v746_v37, 0.0  ;;  %v761_v41 = vadd.f32 %v3984_v38, %v4880_v50  ;;  %4122 = vmatmul.mubr.msk.bf16.gmra.mxu0 %vm1458_vm2, %v1319_v36 }
 0x143   :  { %v755_v42 = vpop.f32.mrf.mxu0 }
 0x144   :  { %v1320_v8 = vpack.c.bf16 %v1287_v39, %v1286_v40  ;;  %v756_v43 = vadd.f32 %v4880_v50, %v755_v42  ;;  %v1289_v44 = vmax.f32 %v761_v41, 0.0 }
 0x146   :  { %v1288_v45 = vmax.f32 %v756_v43, 0.0  ;;  %4125 = vmatprep.mubr.msk.bf16.mxu0 %vm1458_vm2, %v1320_v8 }
 0x148   :  { %v1321_v46 = vpack.c.bf16 %v1289_v44, %v1288_v45 }
 0x14a   :  { %4126 = vmatmul.mubr.msk.bf16.gmra.mxu0 %vm1458_vm2, %v1321_v46 }
 0x14c   :  { %v3995_v12 = vpop.f32.mrf.mxu1 }
 0x14e   :  { %v1589_v47 = vpop.f32.mrf.mxu1 }
 0x150   :  { %v3996_v48 = vpop.f32.mrf.mxu1 }
 0x152   :  { %v1592_v49 = vpop.f32.mrf.mxu1 }
 0x154   :  { %v3999_v51 = vpop.f32.mrf.mxu1 }
 0x156   :  { %v1605_v52 = vpop.f32.mrf.mxu1 }
 0x158   :  { %v4000_v53 = vpop.f32.mrf.mxu1 }
 0x15a   :  { %v1608_v54 = vpop.f32.mrf.mxu1 }
 0x15c   :  { %v5071_v55 = vpop.f32.mrf.mxu1 }
 0x15e   :  { %v5073_v56 = vpop.f32.mrf.mxu1 }
 0x160   :  { %v5075_v50 = vpop.f32.mrf.mxu1 }
 0x162   :  { %v5077_v57 = vpop.f32.mrf.mxu1 }
 0x164   :  { %v5079_v58 = vpop.f32.mrf.mxu1 }
 0x166   :  { %v5081_v59 = vpop.f32.mrf.mxu1 }
 0x168   :  { %v5083_v60 = vpop.f32.mrf.mxu1 }
 0x16a   :  { %v5085_v61 = vpop.f32.mrf.mxu1 }
 0x16c   :  { %v5087_v62 = vpop.f32.mrf.mxu1 }
 0x16e   :  { %v5089_v63 = vpop.f32.mrf.mxu1 }
 0x170   :  { %v5091_v0 = vpop.f32.mrf.mxu1 }
 0x172   :  { %v5093_v1 = vpop.f32.mrf.mxu1 }
 0x174   :  { %v5095_v2 = vpop.f32.mrf.mxu1 }
 0x176   :  { %v5097_v4 = vpop.f32.mrf.mxu1 }
 0x178   :  { %v5099_v5 = vpop.f32.mrf.mxu1 }
 0x17a   :  { %v5101_v6 = vpop.f32.mrf.mxu1 }
 0x17c   :  { %v5103_v7 = vpop.f32.mrf.mxu1 }
 0x17e   :  { %v5105_v9 = vpop.f32.mrf.mxu1 }
 0x180   :  { %v5107_v10 = vpop.f32.mrf.mxu1 }
 0x182   :  { %v5109_v11 = vpop.f32.mrf.mxu1 }
 0x184   :  { %v5111_v13 = vpop.f32.mrf.mxu1 }
 0x186   :  { %v5113_v14 = vpop.f32.mrf.mxu1 }
 0x188   :  { %v5115_v15 = vpop.f32.mrf.mxu1 }
 0x18a   :  { %v5117_v17 = vpop.f32.mrf.mxu1 }
 0x18c   :  { %v5124_v21 = vpop.f32.mrf.mxu1 }
 0x18e   :  { %v5127_v28 = vpop.f32.mrf.mxu1 }
 0x190   :  { %v5133_v36 = vpop.f32.mrf.mxu1 }
 0x192   :  { %v4067_v20 = vpop.f32.mrf.mxu0  ;;  %v5138_v43 = vpop.f32.mrf.mxu1 }
 0x193   :  { %v2007_v26 = vadd.f32 %v4067_v20, %v3995_v12 }
 0x194   :  { %v1998_v22 = vpop.f32.mrf.mxu0  ;;  %v5141_v16 = vpop.f32.mrf.mxu1 }
 0x195   :  { %v1999_v31 = vadd.f32 %v1998_v22, %v1589_v47 }
 0x196   :  { %v4068_v25 = vpop.f32.mrf.mxu0 }
 0x197   :  { %v2010_v27 = vadd.f32 %v4068_v25, %v3996_v48  ;;  %v5148_v25 = vpop.f32.mrf.mxu1 }
 0x198   :  { %v2001_v30 = vpop.f32.mrf.mxu0 }
 0x199   :  { %v2254_v32 = vpack.c.bf16 %v2010_v27, %v2007_v26  ;;  %v2002_v33 = vadd.f32 %v2001_v30, %v1592_v49 }
 0x19a   :  { %v4071_v34 = vpop.f32.mrf.mxu0 }
 0x19b   :  { %v2253_v35 = vpack.c.bf16 %v2002_v33, %v1999_v31  ;;  %v2294_v37 = vadd.bf16 %v5131_v29, %v2254_v32  ;;  %v2023_v41 = vadd.f32 %v4071_v34, %v3999_v51  ;;  %v5153_v34 = vpop.f32.mrf.mxu1 }
 0x19c   :  { %v2014_v38 = vpop.f32.mrf.mxu0 }
 0x19d   :  { %v2293_v39 = vadd.bf16 %v5131_v29, %v2253_v35  ;;  %v2326_v44 = vmax.bf16 %v4228_v3, %v2294_v37  ;;  %v2015_v46 = vadd.f32 %v2014_v38, %v1605_v52 }
 0x19e   :  { %v4072_v40 = vpop.f32.mrf.mxu0 }
 0x19f   :  { %v2026_v42 = vadd.f32 %v4072_v40, %v4000_v53  ;;  %v2325_v8 = vmax.bf16 %v4228_v3, %v2293_v39  ;;  %v5160_v40 = vpop.f32.mrf.mxu1 }
 0x1a0   :  { %v2017_v45 = vpop.f32.mrf.mxu0 }
 0x1a1   :  { %v2256_v12 = vpack.c.bf16 %v2026_v42, %v2023_v41  ;;  %v2018_v47 = vadd.f32 %v2017_v45, %v1608_v54  ;;  %4145 = vmatprep.mubr.bf16.mxu1 %v2325_v8 }
 0x1a2   :  { %v4075_v48 = vpop.f32.mrf.mxu0  ;;  %4146 = vmatmul.mubr.bf16.vlgmr.msra.gmra.mxu1 %v2326_v44 }
 0x1a3   :  { %v2255_v49 = vpack.c.bf16 %v2018_v47, %v2015_v46  ;;  %v2296_v19 = vadd.bf16 %v5131_v29, %v2256_v12  ;;  %v2039_v22 = vadd.f32 %v4075_v48, %v5071_v55  ;;  %v5165_v12 = vpop.f32.mrf.mxu1 }
 0x1a4   :  { %v2030_v51 = vpop.f32.mrf.mxu0 }
 0x1a5   :  { %v2295_v53 = vadd.bf16 %v5131_v29, %v2255_v49  ;;  %v2328_v26 = vmax.bf16 %v4228_v3, %v2296_v19  ;;  %v2031_v27 = vadd.f32 %v2030_v51, %v5073_v56  ;;  %v5172_v51 = vpop.f32.mrf.mxu1 }
 0x1a6   :  { %v4076_v20 = vpop.f32.mrf.mxu0 }
 0x1a7   :  { %v2042_v23 = vadd.f32 %v4076_v20, %v5075_v50  ;;  %v2327_v52 = vmax.bf16 %v4228_v3, %v2295_v53 }
 0x1a8   :  { %v2033_v54 = vpop.f32.mrf.mxu0 }
 0x1a9   :  { %v2258_v30 = vpack.c.bf16 %v2042_v23, %v2039_v22  ;;  %v2034_v31 = vadd.f32 %v2033_v54, %v5077_v57  ;;  %4149 = vmatprep.mubr.bf16.mxu1 %v2327_v52 }
 0x1aa   :  { %v4079_v32 = vpop.f32.mrf.mxu0  ;;  %4150 = vmatmul.mubr.bf16.gmra.mxu1 %v2328_v26  ;;  %v5177_v26 = vpop.f32.mrf.mxu1 }
 0x1ab   :  { %v2257_v33 = vpack.c.bf16 %v2034_v31, %v2031_v27  ;;  %v2298_v55 = vadd.bf16 %v5131_v29, %v2258_v30  ;;  %v2055_v38 = vadd.f32 %v4079_v32, %v5079_v58 }
 0x1ac   :  { %v2046_v50 = vpop.f32.mrf.mxu0 }
 0x1ad   :  { %v2297_v35 = vadd.bf16 %v5131_v29, %v2257_v33  ;;  %v2330_v41 = vmax.bf16 %v4228_v3, %v2298_v55  ;;  %v2047_v42 = vadd.f32 %v2046_v50, %v5081_v59  ;;  %v5184_v33 = vpop.f32.mrf.mxu1 }
 0x1ae   :  { %v4080_v37 = vpop.f32.mrf.mxu0 }
 0x1af   :  { %v2058_v39 = vadd.f32 %v4080_v37, %v5083_v60  ;;  %v2329_v56 = vmax.bf16 %v4228_v3, %v2297_v35 }
 0x1b0   :  { %v2049_v57 = vpop.f32.mrf.mxu0 }
 0x1b1   :  { %v2260_v8 = vpack.c.bf16 %v2058_v39, %v2055_v38  ;;  %v2050_v44 = vadd.f32 %v2049_v57, %v5085_v61  ;;  %4153 = vmatprep.mubr.bf16.mxu1 %v2329_v56  ;;  %v5189_v56 = vpop.f32.mrf.mxu1 }
 0x1b2   :  { %v4083_v45 = vpop.f32.mrf.mxu0  ;;  %4154 = vmatmul.mubr.bf16.gmra.mxu1 %v2330_v41 }
 0x1b3   :  { %v2259_v46 = vpack.c.bf16 %v2050_v44, %v2047_v42  ;;  %v2300_v58 = vadd.bf16 %v5131_v29, %v2260_v8  ;;  %v2071_v49 = vadd.f32 %v4083_v45, %v5087_v62  ;;  %v5196_v44 = vpop.f32.mrf.mxu1 }
 0x1b4   :  { %v2062_v60 = vpop.f32.mrf.mxu0 }
 0x1b5   :  { %v2299_v47 = vadd.bf16 %v5131_v29, %v2259_v46  ;;  %v2332_v53 = vmax.bf16 %v4228_v3, %v2300_v58  ;;  %v2063_v20 = vadd.f32 %v2062_v60, %v5089_v63 }
 0x1b6   :  { %v4084_v48 = vpop.f32.mrf.mxu0 }
 0x1b7   :  { %v2074_v19 = vadd.f32 %v4084_v48, %v5091_v0  ;;  %v2331_v59 = vmax.bf16 %v4228_v3, %v2299_v47 }
 0x1b8   :  { %v2065_v61 = vpop.f32.mrf.mxu0 }
 0x1b9   :  { %v2262_v22 = vpack.c.bf16 %v2074_v19, %v2071_v49  ;;  %v2066_v23 = vadd.f32 %v2065_v61, %v5093_v1  ;;  %4157 = vmatprep.mubr.bf16.mxu1 %v2331_v59  ;;  %v5201_v49 = vpop.f32.mrf.mxu1 }
 0x1ba   :  { %v4087_v52 = vpop.f32.mrf.mxu0  ;;  %4158 = vmatmul.mubr.bf16.gmra.mxu1 %v2332_v53 }
 0x1bb   :  { %v2261_v54 = vpack.c.bf16 %v2066_v23, %v2063_v20  ;;  %v2302_v62 = vadd.bf16 %v5131_v29, %v2262_v22  ;;  %v2087_v31 = vadd.f32 %v4087_v52, %v5095_v2  ;;  %v5208_v20 = vpop.f32.mrf.mxu1 }
 0x1bc   :  { %v2078_v0 = vpop.f32.mrf.mxu0 }
 0x1bd   :  { %v2301_v27 = vadd.bf16 %v5131_v29, %v2261_v54  ;;  %v2334_v55 = vmax.bf16 %v4228_v3, %v2302_v62  ;;  %v2079_v50 = vadd.f32 %v2078_v0, %v5097_v4 }
 0x1be   :  { %v4088_v30 = vpop.f32.mrf.mxu0 }
 0x1bf   :  { %v2090_v32 = vadd.f32 %v4088_v30, %v5099_v5  ;;  %v2333_v63 = vmax.bf16 %v4228_v3, %v2301_v27  ;;  %v5213_v27 = vpop.f32.mrf.mxu1 }
 0x1c0   :  { %v2081_v1 = vpop.f32.mrf.mxu0 }
 0x1c1   :  { %v2264_v35 = vpack.c.bf16 %v2090_v32, %v2087_v31  ;;  %v2082_v37 = vadd.f32 %v2081_v1, %v5101_v6  ;;  %4161 = vmatprep.mubr.bf16.mxu1 %v2333_v63  ;;  %v5220_v1 = vpop.f32.mrf.mxu1 }
 0x1c2   :  { %v4091_v38 = vpop.f32.mrf.mxu0  ;;  %4162 = vmatmul.mubr.bf16.gmra.mxu1 %v2334_v55 }
 0x1c3   :  { %v2263_v39 = vpack.c.bf16 %v2082_v37, %v2079_v50  ;;  %v2304_v2 = vadd.bf16 %v5131_v29, %v2264_v35  ;;  %v2103_v42 = vadd.f32 %v4091_v38, %v5103_v7 }
 0x1c4   :  { %v2094_v5 = vpop.f32.mrf.mxu0 }
 0x1c5   :  { %v2303_v57 = vadd.bf16 %v5131_v29, %v2263_v39  ;;  %v2336_v45 = vmax.bf16 %v4228_v3, %v2304_v2  ;;  %v2095_v46 = vadd.f32 %v2094_v5, %v5105_v9  ;;  %v4044_v2 = vpop.f32.mrf.mxu1 }
 0x1c6   :  { %v4092_v41 = vpop.f32.mrf.mxu0 }
 0x1c7   :  { %v2106_v8 = vadd.f32 %v4092_v41, %v5107_v10  ;;  %v2335_v4 = vmax.bf16 %v4228_v3, %v2303_v57 }
 0x1c8   :  { %v2097_v6 = vpop.f32.mrf.mxu0 }
 0x1c9   :  { %v2266_v58 = vpack.c.bf16 %v2106_v8, %v2103_v42  ;;  %v2098_v60 = vadd.f32 %v2097_v6, %v5109_v11  ;;  %4165 = vmatprep.mubr.bf16.mxu1 %v2335_v4  ;;  %v1784_v8 = vpop.f32.mrf.mxu1 }
 0x1ca   :  { %v4095_v47 = vpop.f32.mrf.mxu0  ;;  %4166 = vmatmul.mubr.bf16.gmra.mxu1 %v2336_v45 }
 0x1cb   :  { %v2265_v48 = vpack.c.bf16 %v2098_v60, %v2095_v46  ;;  %v2306_v7 = vadd.bf16 %v5131_v29, %v2266_v58  ;;  %v2119_v61 = vadd.f32 %v4095_v47, %v5111_v13  ;;  %v4047_v47 = vpop.f32.mrf.mxu1 }
 0x1cc   :  { %v2110_v10 = vpop.f32.mrf.mxu0 }
 0x1cd   :  { %v2305_v19 = vadd.bf16 %v5131_v29, %v2265_v48  ;;  %v2338_v22 = vmax.bf16 %v4228_v3, %v2306_v7  ;;  %v2111_v23 = vadd.f32 %v2110_v10, %v5113_v14 }
 0x1ce   :  { %v4096_v59 = vpop.f32.mrf.mxu0 }
 0x1cf   :  { %v2122_v53 = vadd.f32 %v4096_v59, %v5115_v15  ;;  %v2337_v9 = vmax.bf16 %v4228_v3, %v2305_v19  ;;  %v1797_v59 = vpop.f32.mrf.mxu1 }
 0x1d0   :  { %v2113_v11 = vpop.f32.mrf.mxu0 }
 0x1d1   :  { %v2268_v52 = vpack.c.bf16 %v2122_v53, %v2119_v61  ;;  %v2114_v54 = vadd.f32 %v2113_v11, %v5117_v17  ;;  %4169 = vmatprep.mubr.bf16.mxu1 %v2337_v9 }
 0x1d2   :  { %v4099_v62 = vpop.f32.mrf.mxu0  ;;  %4170 = vmatmul.mubr.bf16.gmra.mxu1 %v2338_v22 }
 0x1d3   :  { %v2267_v0 = vpack.c.bf16 %v2114_v54, %v2111_v23  ;;  %v2308_v13 = vadd.bf16 %v5131_v29, %v2268_v52  ;;  %v2135_v32 = vadd.f32 %v4099_v62, %v5124_v21  ;;  %v4048_v52 = vpop.f32.mrf.mxu1 }
 0x1d4   :  { %v2126_v15 = vpop.f32.mrf.mxu0 }
 0x1d5   :  { %v2307_v30 = vadd.bf16 %v5131_v29, %v2267_v0  ;;  %v2340_v55 = vmax.bf16 %v4228_v3, %v2308_v13  ;;  %v2127_v50 = vadd.f32 %v2126_v15, %v5127_v28  ;;  %v1800_v15 = vpop.f32.mrf.mxu1 }
 0x1d6   :  { %v4100_v31 = vpop.f32.mrf.mxu0 }
 0x1d7   :  { %v2138_v63 = vadd.f32 %v4100_v31, %v5133_v36  ;;  %v2339_v14 = vmax.bf16 %v4228_v3, %v2307_v30 }
 0x1d8   :  { %v2129_v17 = vpop.f32.mrf.mxu0 }
 0x1d9   :  { %v2270_v35 = vpack.c.bf16 %v2138_v63, %v2135_v32  ;;  %v2130_v37 = vadd.f32 %v2129_v17, %v5138_v43  ;;  %4173 = vmatprep.mubr.bf16.mxu1 %v2339_v14 }
 0x1da   :  { %v4103_v38 = vpop.f32.mrf.mxu0  ;;  %4174 = vmatmul.mubr.bf16.gmra.mxu1 %v2340_v55  ;;  %v4051_v55 = vpop.f32.mrf.mxu1 }
 0x1db   :  { %v2269_v39 = vpack.c.bf16 %v2130_v37, %v2127_v50  ;;  %v2310_v21 = vadd.bf16 %v5131_v29, %v2270_v35  ;;  %v2151_v41 = vadd.f32 %v4103_v38, %v5141_v16 }
 0x1dc   :  { %v2142_v36 = vpop.f32.mrf.mxu0 }
 0x1dd   :  { %v2309_v5 = vadd.bf16 %v5131_v29, %v2269_v39  ;;  %v2342_v43 = vmax.bf16 %v4228_v3, %v2310_v21  ;;  %v2143_v6 = vadd.f32 %v2142_v36, %v5148_v25 }
 0x1de   :  { %v4104_v57 = vpop.f32.mrf.mxu0 }
 0x1df   :  { %v2154_v42 = vadd.f32 %v4104_v57, %v5153_v34  ;;  %v2341_v28 = vmax.bf16 %v4228_v3, %v2309_v5 }
 0x1e0   :  { %v2145_v4 = vpop.f32.mrf.mxu0 }
 0x1e1   :  { %v2272_v45 = vpack.c.bf16 %v2154_v42, %v2151_v41  ;;  %v2146_v46 = vadd.f32 %v2145_v4, %v5160_v40  ;;  %4177 = vmatprep.mubr.bf16.mxu1 %v2341_v28 }
 0x1e2   :  { %v4107_v58 = vpop.f32.mrf.mxu0  ;;  %4178 = vmatmul.mubr.bf16.gmra.mxu1 %v2342_v43 }
 0x1e3   :  { %v2271_v60 = vpack.c.bf16 %v2146_v46, %v2143_v6  ;;  %v2312_v16 = vadd.bf16 %v5131_v29, %v2272_v45  ;;  %v2167_v10 = vadd.f32 %v4107_v58, %v5165_v12 }
 0x1e4   :  { %v2158_v48 = vpop.f32.mrf.mxu0 }
 0x1e5   :  { %v2311_v34 = vadd.bf16 %v5131_v29, %v2271_v60  ;;  %v2344_v40 = vmax.bf16 %v4228_v3, %v2312_v16  ;;  %v2159_v53 = vadd.f32 %v2158_v48, %v5172_v51 }
 0x1e6   :  { %v4108_v7 = vpop.f32.mrf.mxu0 }
 0x1e7   :  { %v2170_v19 = vadd.f32 %v4108_v7, %v5177_v26  ;;  %v2343_v25 = vmax.bf16 %v4228_v3, %v2311_v34 }
 0x1e8   :  { %v2161_v61 = vpop.f32.mrf.mxu0 }
 0x1e9   :  { %v2274_v9 = vpack.c.bf16 %v2170_v19, %v2167_v10  ;;  %v2162_v11 = vadd.f32 %v2161_v61, %v5184_v33  ;;  %4181 = vmatprep.mubr.bf16.mxu1 %v2343_v25 }
 0x1ea   :  { %v4111_v22 = vpop.f32.mrf.mxu0  ;;  %4182 = vmatmul.mubr.bf16.gmra.mxu1 %v2344_v40 }
 0x1eb   :  { %v2273_v23 = vpack.c.bf16 %v2162_v11, %v2159_v53  ;;  %v2314_v12 = vadd.bf16 %v5131_v29, %v2274_v9  ;;  %v2183_v0 = vadd.f32 %v4111_v22, %v5189_v56 }
 0x1ec   :  { %v2174_v54 = vpop.f32.mrf.mxu0 }
 0x1ed   :  { %v2313_v26 = vadd.bf16 %v5131_v29, %v2273_v23  ;;  %v2346_v33 = vmax.bf16 %v4228_v3, %v2314_v12  ;;  %v2175_v31 = vadd.f32 %v2174_v54, %v5196_v44  ;;  %v1813_v44 = vpop.f32.mrf.mxu1 }
 0x1ee   :  { %v4112_v62 = vpop.f32.mrf.mxu0 }
 0x1ef   :  { %v2186_v13 = vadd.f32 %v4112_v62, %v5201_v49  ;;  %v2345_v51 = vmax.bf16 %v4228_v3, %v2313_v26  ;;  %v4052_v28 = vpop.f32.mrf.mxu1 }
 0x1f0   :  { %v2177_v30 = vpop.f32.mrf.mxu0 }
 0x1f1   :  { %v2276_v32 = vpack.c.bf16 %v2186_v13, %v2183_v0  ;;  %v2178_v63 = vadd.f32 %v2177_v30, %v5208_v20  ;;  %4185 = vmatprep.mubr.bf16.mxu1 %v2345_v51  ;;  %v1816_v58 = vpop.f32.mrf.mxu1 }
 0x1f2   :  { %v4115_v14 = vpop.f32.mrf.mxu0  ;;  %4186 = vmatmul.mubr.bf16.gmra.mxu1 %v2346_v33 }
 0x1f3   :  { %v2275_v17 = vpack.c.bf16 %v2178_v63, %v2175_v31  ;;  %v2316_v56 = vadd.bf16 %v5131_v29, %v2276_v32  ;;  %v2199_v37 = vadd.f32 %v4115_v14, %v5213_v27  ;;  %v4055_v10 = vpop.f32.mrf.mxu1 }
 0x1f4   :  { %v2190_v50 = vpop.f32.mrf.mxu0 }
 0x1f5   :  { %v2315_v49 = vadd.bf16 %v5131_v29, %v2275_v17  ;;  %v2348_v20 = vmax.bf16 %v4228_v3, %v2316_v56  ;;  %v2191_v36 = vadd.f32 %v2190_v50, %v5220_v1  ;;  %v1829_v11 = vpop.f32.mrf.mxu1 }
 0x1f6   :  { %v4116_v35 = vpop.f32.mrf.mxu0 }
 0x1f7   :  { %v2202_v38 = vadd.f32 %v4116_v35, %v4044_v2  ;;  %v2347_v39 = vmax.bf16 %v4228_v3, %v2315_v49  ;;  %v4056_v62 = vpop.f32.mrf.mxu1 }
 0x1f8   :  { %v2193_v21 = vpop.f32.mrf.mxu0 }
 0x1f9   :  { %v2278_v5 = vpack.c.bf16 %v2202_v38, %v2199_v37  ;;  %v2194_v57 = vadd.f32 %v2193_v21, %v1784_v8  ;;  %4189 = vmatprep.mubr.bf16.mxu1 %v2347_v39  ;;  %v1832_v32 = vpop.f32.mrf.mxu1  ;;  %v2742_v39 = vld [vmem:[%s5805_s10] sm:$0x1] }
 0x1fa   :  { %v4119_v41 = vpop.f32.mrf.mxu0  ;;  %4190 = vmatmul.mubr.bf16.gmra.mxu1 %v2348_v20 }
 0x1fb   :  { %v2277_v42 = vpack.c.bf16 %v2194_v57, %v2191_v36  ;;  %v2318_v4 = vadd.bf16 %v5131_v29, %v2278_v5  ;;  %v2215_v6 = vadd.f32 %v4119_v41, %v4047_v47 }
 0x1fc   :  { %v2206_v43 = vpop.f32.mrf.mxu0 }
 0x1fd   :  { %v2317_v27 = vadd.bf16 %v5131_v29, %v2277_v42  ;;  %v2350_v1 = vmax.bf16 %v4228_v3, %v2318_v4  ;;  %v2207_v8 = vadd.f32 %v2206_v43, %v1797_v59 }
 0x1fe   :  { %v4120_v2 = vpop.f32.mrf.mxu0 }
 0x1ff   :  { %v2218_v45 = vadd.f32 %v4120_v2, %v4048_v52  ;;  %v2349_v46 = vmax.bf16 %v4228_v3, %v2317_v27  ;;  %v5284_v2 = vld [vmem:[%s5806_s11] ss:$0 sm:$0xff] }
 0x200   :  { %v2209_v60 = vpop.f32.mrf.mxu0 }
 0x201   :  { %v2280_v16 = vpack.c.bf16 %v2218_v45, %v2215_v6  ;;  %v2210_v48 = vadd.f32 %v2209_v60, %v1800_v15  ;;  %4193 = vmatprep.mubr.bf16.mxu1 %v2349_v46 }
 0x202   :  { %v4123_v34 = vpop.f32.mrf.mxu0  ;;  %4194 = vmatmul.mubr.bf16.gmra.mxu1 %v2350_v1 }
 0x203   :  { %v2279_v7 = vpack.c.bf16 %v2210_v48, %v2207_v8  ;;  %v2320_v19 = vadd.bf16 %v5131_v29, %v2280_v16  ;;  %v2231_v40 = vadd.f32 %v4123_v34, %v4051_v55 }
 0x204   :  { %v2222_v25 = vpop.f32.mrf.mxu0 }
 0x205   :  { %v2319_v47 = vadd.bf16 %v5131_v29, %v2279_v7  ;;  %v2352_v59 = vmax.bf16 %v4228_v3, %v2320_v19  ;;  %v2223_v23 = vadd.f32 %v2222_v25, %v1813_v44  ;;  %v2744_v44 = vpack.i.b16 %v2742_v39, %v2742_v39 }
 0x206   :  { %v4124_v61 = vpop.f32.mrf.mxu0 }
 0x207   :  { %v2234_v53 = vadd.f32 %v4124_v61, %v4052_v28  ;;  %v2351_v9 = vmax.bf16 %v4228_v3, %v2319_v47  ;;  %v5276_v36 = vrot.slane %v2744_v44, %v2291_v24 }
 0x208   :  { %v2225_v22 = vpop.f32.mrf.mxu0 }
 0x209   :  { %v2282_v52 = vpack.c.bf16 %v2234_v53, %v2231_v40  ;;  %v2226_v12 = vadd.f32 %v2225_v22, %v1816_v58  ;;  %4197 = vmatprep.mubr.bf16.mxu1 %v2351_v9 }
 0x20a   :  { %v4127_v54 = vpop.f32.mrf.mxu0  ;;  %4198 = vmatmul.mubr.bf16.gmra.mxu1 %v2352_v59 }
 0x20b   :  { %v2281_v26 = vpack.c.bf16 %v2226_v12, %v2223_v23  ;;  %v2322_v0 = vadd.bf16 %v5131_v29, %v2282_v52  ;;  %v2247_v30 = vadd.f32 %v4127_v54, %v4055_v10 }
 0x20c   :  { %v2238_v13 = vpop.f32.mrf.mxu0 }
 0x20d   :  { %v2321_v51 = vadd.bf16 %v5131_v29, %v2281_v26  ;;  %v2354_v63 = vmax.bf16 %v4228_v3, %v2322_v0  ;;  %v2239_v17 = vadd.f32 %v2238_v13, %v1829_v11 }
 0x20e   :  { %v4128_v15 = vpop.f32.mrf.mxu0 }
 0x20f   :  { %v2250_v33 = vadd.f32 %v4128_v15, %v4056_v62  ;;  %v2353_v31 = vmax.bf16 %v4228_v3, %v2321_v51 }
 0x210   :  { %v2241_v14 = vpop.f32.mrf.mxu0 }
 0x211   :  { %v2284_v55 = vpack.c.bf16 %v2250_v33, %v2247_v30  ;;  %v2242_v56 = vadd.f32 %v2241_v14, %v1832_v32  ;;  %4201 = vmatprep.mubr.bf16.mxu1 %v2353_v31 }
 0x212   :  { %4202 = vmatmul.mubr.bf16.gmra.mxu1 %v2354_v63 }
 0x213   :  { %v2283_v50 = vpack.c.bf16 %v2242_v56, %v2239_v17  ;;  %v2324_v49 = vadd.bf16 %v5131_v29, %v2284_v55 }
 0x215   :  { %v2323_v35 = vadd.bf16 %v5131_v29, %v2283_v50  ;;  %v2356_v38 = vmax.bf16 %v4228_v3, %v2324_v49 }
 0x217   :  { %v2355_v37 = vmax.bf16 %v4228_v3, %v2323_v35 }
 0x219   :  { %4205 = vmatprep.mubr.bf16.mxu1 %v2355_v37 }
 0x21a   :  { %4206 = vmatmul.mubr.bf16.gmra.mxu1 %v2356_v38 }
 0x262   :  { %v4147_v21 = vpop.f32.mrf.mxu1 }
 0x264   :  { %v2455_v20 = vpop.f32.mrf.mxu1 }
 0x266   :  { %v4148_v5 = vpop.f32.mrf.mxu1 }
 0x267   :  { %v2711_v57 = vpack.c.bf16 %v4148_v5, %v4147_v21 }
 0x268   :  { %v2458_v29 = vpop.f32.mrf.mxu1 }
 0x269   :  { %v2751_v41 = vadd.bf16 %v5276_v36, %v2711_v57  ;;  %v2710_v42 = vpack.c.bf16 %v2458_v29, %v2455_v20 }
 0x26a   :  { %v4151_v28 = vpop.f32.mrf.mxu1 }
 0x26b   :  { %v2783_v4 = vmax.bf16 %v4228_v3, %v2751_v41  ;;  %v2750_v43 = vadd.bf16 %v5276_v36, %v2710_v42 }
 0x26c   :  { %v2471_v27 = vpop.f32.mrf.mxu1 }
 0x26d   :  { %v2782_v18 = vmax.bf16 %v4228_v3, %v2750_v43  ;;  %v2816_v24 = vunpack.c.l.bf16 %v2783_v4  ;;  %v2817_v6 = vunpack.c.h.bf16 %v2783_v4 }
 0x26e   :  { %v4152_v45 = vpop.f32.mrf.mxu1 }
 0x26f   :  { %v2713_v46 = vpack.c.bf16 %v4152_v45, %v4151_v28  ;;  %v2887_v58 = vmul.f32 %v5284_v2, %v2816_v24  ;;  %v2815_v1 = vunpack.c.h.bf16 %v2782_v18  ;;  %v2888_v8 = vmul.f32 %v5284_v2, %v2817_v6 }
 0x270   :  { %v2474_v60 = vpop.f32.mrf.mxu1  ;;  %v2814_v16 = vunpack.c.l.bf16 %v2782_v18 }
 0x271   :  { %v2753_v48 = vadd.bf16 %v5276_v36, %v2713_v46  ;;  %v2712_v34 = vpack.c.bf16 %v2474_v60, %v2471_v27  ;;  %v2955_v7 = vsel %vm1458_vm2, %v2887_v58, 0.0  ;;  %v2886_v10 = vmul.f32 %v5284_v2, %v2815_v1 }
 0x272   :  { %2956 = vadd.xlane.f32.xlu0 %v2955_v7  ;;  %v4155_v19 = vpop.f32.mrf.mxu1  ;;  %v2958_v53 = vsel %vm1458_vm2, %v2888_v8, 0.0  ;;  %v2885_v11 = vmul.f32 %v5284_v2, %v2814_v16 }
 0x273   :  { %v2785_v25 = vmax.bf16 %v4228_v3, %v2753_v48  ;;  %v2752_v47 = vadd.bf16 %v5276_v36, %v2712_v34  ;;  %v2952_v61 = vsel %vm1458_vm2, %v2886_v10, 0.0 }
 0x274   :  { %2953 = vadd.xlane.f32.xlu1 %v2952_v61  ;;  %v2487_v40 = vpop.f32.mrf.mxu1  ;;  %v2949_v15 = vsel %vm1458_vm2, %v2885_v11, 0.0 }
 0x275   :  { %v2784_v9 = vmax.bf16 %v4228_v3, %v2752_v47  ;;  %v2820_v59 = vunpack.c.l.bf16 %v2785_v25  ;;  %v2821_v22 = vunpack.c.h.bf16 %v2785_v25 }
 0x276   :  { %2959 = vadd.xlane.f32.xlu0 %v2958_v53  ;;  %v4156_v23 = vpop.f32.mrf.mxu1 }
 0x277   :  { %v2715_v52 = vpack.c.bf16 %v4156_v23, %v4155_v19  ;;  %v2891_v12 = vmul.f32 %v5284_v2, %v2820_v59  ;;  %v2818_v54 = vunpack.c.l.bf16 %v2784_v9  ;;  %v2892_v62 = vmul.f32 %v5284_v2, %v2821_v22 }
 0x278   :  { %v2490_v26 = vpop.f32.mrf.mxu1  ;;  %v2819_v0 = vunpack.c.h.bf16 %v2784_v9 }
 0x279   :  { %v2755_v13 = vadd.bf16 %v5276_v36, %v2715_v52  ;;  %v2714_v51 = vpack.c.bf16 %v2490_v26, %v2487_v40  ;;  %v2967_v30 = vsel %vm1458_vm2, %v2891_v12, 0.0  ;;  %v2889_v31 = vmul.f32 %v5284_v2, %v2818_v54 }
 0x27a   :  { %2950 = vadd.xlane.f32.xlu0 %v2949_v15  ;;  %2968 = vadd.xlane.f32.xlu1 %v2967_v30  ;;  %v4159_v33 = vpop.f32.mrf.mxu1  ;;  %v2970_v17 = vsel %vm1458_vm2, %v2892_v62, 0.0  ;;  %v2890_v55 = vmul.f32 %v5284_v2, %v2819_v0 }
 0x27b   :  { %v2787_v32 = vmax.bf16 %v4228_v3, %v2755_v13  ;;  %v2754_v63 = vadd.bf16 %v5276_v36, %v2714_v51  ;;  %v2961_v50 = vsel %vm1458_vm2, %v2889_v31, 0.0 }
 0x27c   :  { %v2503_v14 = vpop.f32.mrf.mxu1  ;;  %v2964_v41 = vsel %vm1458_vm2, %v2890_v55, 0.0 }
 0x27d   :  { %v2786_v56 = vmax.bf16 %v4228_v3, %v2754_v63  ;;  %v2824_v49 = vunpack.c.l.bf16 %v2787_v32  ;;  %v2825_v35 = vunpack.c.h.bf16 %v2787_v32 }
 0x27e   :  { %2971 = vadd.xlane.f32.xlu0 %v2970_v17  ;;  %2962 = vadd.xlane.f32.xlu1 %v2961_v50  ;;  %v4160_v37 = vpop.f32.mrf.mxu1 }
 0x27f   :  { %v2717_v38 = vpack.c.bf16 %v4160_v37, %v4159_v33  ;;  %v2895_v39 = vmul.f32 %v5284_v2, %v2824_v49  ;;  %v2822_v44 = vunpack.c.l.bf16 %v2786_v56  ;;  %v2896_v20 = vmul.f32 %v5284_v2, %v2825_v35 }
 0x280   :  { %v2506_v21 = vpop.f32.mrf.mxu1  ;;  %v2823_v5 = vunpack.c.h.bf16 %v2786_v56 }
 0x281   :  { %v2757_v57 = vadd.bf16 %v5276_v36, %v2717_v38  ;;  %v2716_v29 = vpack.c.bf16 %v2506_v21, %v2503_v14  ;;  %v2979_v42 = vsel %vm1458_vm2, %v2895_v39, 0.0  ;;  %v2893_v4 = vmul.f32 %v5284_v2, %v2822_v44 }
 0x282   :  { %2965 = vadd.xlane.f32.xlu0 %v2964_v41  ;;  %2980 = vadd.xlane.f32.xlu1 %v2979_v42  ;;  %v4163_v28 = vpop.f32.mrf.mxu1  ;;  %v2982_v24 = vsel %vm1458_vm2, %v2896_v20, 0.0  ;;  %v2894_v6 = vmul.f32 %v5284_v2, %v2823_v5 }
 0x283   :  { %v2789_v43 = vmax.bf16 %v4228_v3, %v2757_v57  ;;  %v2756_v27 = vadd.bf16 %v5276_v36, %v2716_v29  ;;  %v2973_v46 = vsel %vm1458_vm2, %v2893_v4, 0.0 }
 0x284   :  { %v2519_v18 = vpop.f32.mrf.mxu1  ;;  %v2976_v47 = vsel %vm1458_vm2, %v2894_v6, 0.0 }
 0x285   :  { %v2788_v45 = vmax.bf16 %v4228_v3, %v2756_v27  ;;  %v2828_v58 = vunpack.c.l.bf16 %v2789_v43  ;;  %v2829_v1 = vunpack.c.h.bf16 %v2789_v43 }
 0x286   :  { %2983 = vadd.xlane.f32.xlu0 %v2982_v24  ;;  %2974 = vadd.xlane.f32.xlu1 %v2973_v46  ;;  %v4164_v60 = vpop.f32.mrf.mxu1 }
 0x287   :  { %v2719_v8 = vpack.c.bf16 %v4164_v60, %v4163_v28  ;;  %v2899_v16 = vmul.f32 %v5284_v2, %v2828_v58  ;;  %v2826_v48 = vunpack.c.l.bf16 %v2788_v45  ;;  %v2900_v7 = vmul.f32 %v5284_v2, %v2829_v1 }
 0x288   :  { %v2522_v34 = vpop.f32.mrf.mxu1  ;;  %v2827_v10 = vunpack.c.h.bf16 %v2788_v45 }
 0x289   :  { %v2759_v19 = vadd.bf16 %v5276_v36, %v2719_v8  ;;  %v2718_v25 = vpack.c.bf16 %v2522_v34, %v2519_v18  ;;  %v2991_v61 = vsel %vm1458_vm2, %v2899_v16, 0.0  ;;  %v2897_v53 = vmul.f32 %v5284_v2, %v2826_v48 }
 0x28a   :  { %2977 = vadd.xlane.f32.xlu0 %v2976_v47  ;;  %2992 = vadd.xlane.f32.xlu1 %v2991_v61  ;;  %v4167_v40 = vpop.f32.mrf.mxu1  ;;  %v2994_v22 = vsel %vm1458_vm2, %v2900_v7, 0.0  ;;  %v2898_v23 = vmul.f32 %v5284_v2, %v2827_v10 }
 0x28b   :  { %v2791_v9 = vmax.bf16 %v4228_v3, %v2759_v19  ;;  %v2758_v11 = vadd.bf16 %v5276_v36, %v2718_v25  ;;  %v2985_v12 = vsel %vm1458_vm2, %v2897_v53, 0.0 }
 0x28c   :  { %v2535_v59 = vpop.f32.mrf.mxu1  ;;  %v2988_v63 = vsel %vm1458_vm2, %v2898_v23, 0.0 }
 0x28d   :  { %v2790_v52 = vmax.bf16 %v4228_v3, %v2758_v11  ;;  %v2832_v54 = vunpack.c.l.bf16 %v2791_v9  ;;  %v2833_v26 = vunpack.c.h.bf16 %v2791_v9 }
 0x28e   :  { %2995 = vadd.xlane.f32.xlu0 %v2994_v22  ;;  %2986 = vadd.xlane.f32.xlu1 %v2985_v12  ;;  %v4168_v62 = vpop.f32.mrf.mxu1 }
 0x28f   :  { %v2721_v0 = vpack.c.bf16 %v4168_v62, %v4167_v40  ;;  %v2903_v13 = vmul.f32 %v5284_v2, %v2832_v54  ;;  %v2830_v51 = vunpack.c.l.bf16 %v2790_v52  ;;  %v2904_v30 = vmul.f32 %v5284_v2, %v2833_v26 }
 0x290   :  { %v2538_v15 = vpop.f32.mrf.mxu1  ;;  %v2831_v33 = vunpack.c.h.bf16 %v2790_v52 }
 0x291   :  { %v2761_v31 = vadd.bf16 %v5276_v36, %v2721_v0  ;;  %v2720_v32 = vpack.c.bf16 %v2538_v15, %v2535_v59  ;;  %v3003_v14 = vsel %vm1458_vm2, %v2903_v13, 0.0  ;;  %v2901_v55 = vmul.f32 %v5284_v2, %v2830_v51 }
 0x292   :  { %2989 = vadd.xlane.f32.xlu0 %v2988_v63  ;;  %3004 = vadd.xlane.f32.xlu1 %v3003_v14  ;;  %v4171_v17 = vpop.f32.mrf.mxu1  ;;  %v3006_v35 = vsel %vm1458_vm2, %v2904_v30, 0.0  ;;  %v2902_v37 = vmul.f32 %v5284_v2, %v2831_v33 }
 0x293   :  { %v2793_v56 = vmax.bf16 %v4228_v3, %v2761_v31  ;;  %v2760_v50 = vadd.bf16 %v5276_v36, %v2720_v32  ;;  %v2997_v39 = vsel %vm1458_vm2, %v2901_v55, 0.0 }
 0x294   :  { %v2551_v49 = vpop.f32.mrf.mxu1  ;;  %v3000_v27 = vsel %vm1458_vm2, %v2902_v37, 0.0 }
 0x295   :  { %v2792_v38 = vmax.bf16 %v4228_v3, %v2760_v50  ;;  %v2836_v44 = vunpack.c.l.bf16 %v2793_v56  ;;  %v2837_v21 = vunpack.c.h.bf16 %v2793_v56 }
 0x296   :  { %3007 = vadd.xlane.f32.xlu0 %v3006_v35  ;;  %2998 = vadd.xlane.f32.xlu1 %v2997_v39  ;;  %v4172_v20 = vpop.f32.mrf.mxu1 }
 0x297   :  { %v2723_v5 = vpack.c.bf16 %v4172_v20, %v4171_v17  ;;  %v2907_v57 = vmul.f32 %v5284_v2, %v2836_v44  ;;  %v2834_v29 = vunpack.c.l.bf16 %v2792_v38  ;;  %v2908_v42 = vmul.f32 %v5284_v2, %v2837_v21 }
 0x298   :  { %v2554_v41 = vpop.f32.mrf.mxu1  ;;  %v2835_v28 = vunpack.c.h.bf16 %v2792_v38 }
 0x299   :  { %v2763_v4 = vadd.bf16 %v5276_v36, %v2723_v5  ;;  %v2722_v43 = vpack.c.bf16 %v2554_v41, %v2551_v49  ;;  %v3015_v18 = vsel %vm1458_vm2, %v2907_v57, 0.0  ;;  %v2905_v6 = vmul.f32 %v5284_v2, %v2834_v29 }
 0x29a   :  { %3001 = vadd.xlane.f32.xlu0 %v3000_v27  ;;  %3016 = vadd.xlane.f32.xlu1 %v3015_v18  ;;  %v4175_v24 = vpop.f32.mrf.mxu1  ;;  %v3018_v1 = vsel %vm1458_vm2, %v2908_v42, 0.0  ;;  %v2906_v60 = vmul.f32 %v5284_v2, %v2835_v28 }
 0x29b   :  { %v2795_v45 = vmax.bf16 %v4228_v3, %v2763_v4  ;;  %v2762_v46 = vadd.bf16 %v5276_v36, %v2722_v43  ;;  %v3009_v16 = vsel %vm1458_vm2, %v2905_v6, 0.0 }
 0x29c   :  { %v2567_v58 = vpop.f32.mrf.mxu1  ;;  %v3012_v11 = vsel %vm1458_vm2, %v2906_v60, 0.0 }
 0x29d   :  { %v2794_v8 = vmax.bf16 %v4228_v3, %v2762_v46  ;;  %v2840_v48 = vunpack.c.l.bf16 %v2795_v45  ;;  %v2841_v34 = vunpack.c.h.bf16 %v2795_v45 }
 0x29e   :  { %3019 = vadd.xlane.f32.xlu0 %v3018_v1  ;;  %3010 = vadd.xlane.f32.xlu1 %v3009_v16  ;;  %v4176_v7 = vpop.f32.mrf.mxu1 }
 0x29f   :  { %v2725_v10 = vpack.c.bf16 %v4176_v7, %v4175_v24  ;;  %v2911_v19 = vmul.f32 %v5284_v2, %v2840_v48  ;;  %v2838_v25 = vunpack.c.l.bf16 %v2794_v8  ;;  %v2912_v61 = vmul.f32 %v5284_v2, %v2841_v34 }
 0x2a0   :  { %v2570_v47 = vpop.f32.mrf.mxu1  ;;  %v2839_v40 = vunpack.c.h.bf16 %v2794_v8 }
 0x2a1   :  { %v2765_v53 = vadd.bf16 %v5276_v36, %v2725_v10  ;;  %v2724_v9 = vpack.c.bf16 %v2570_v47, %v2567_v58  ;;  %v3027_v59 = vsel %vm1458_vm2, %v2911_v19, 0.0  ;;  %v2909_v23 = vmul.f32 %v5284_v2, %v2838_v25 }
 0x2a2   :  { %3013 = vadd.xlane.f32.xlu0 %v3012_v11  ;;  %3028 = vadd.xlane.f32.xlu1 %v3027_v59  ;;  %v4179_v22 = vpop.f32.mrf.mxu1  ;;  %v3030_v26 = vsel %vm1458_vm2, %v2912_v61, 0.0  ;;  %v2910_v62 = vmul.f32 %v5284_v2, %v2839_v40 }
 0x2a3   :  { %v2797_v52 = vmax.bf16 %v4228_v3, %v2765_v53  ;;  %v2764_v12 = vadd.bf16 %v5276_v36, %v2724_v9  ;;  %v3021_v13 = vsel %vm1458_vm2, %v2909_v23, 0.0 }
 0x2a4   :  { %v2583_v54 = vpop.f32.mrf.mxu1  ;;  %v3024_v50 = vsel %vm1458_vm2, %v2910_v62, 0.0 }
 0x2a5   :  { %v2796_v0 = vmax.bf16 %v4228_v3, %v2764_v12  ;;  %v2844_v51 = vunpack.c.l.bf16 %v2797_v52  ;;  %v2845_v15 = vunpack.c.h.bf16 %v2797_v52 }
 0x2a6   :  { %3031 = vadd.xlane.f32.xlu0 %v3030_v26  ;;  %3022 = vadd.xlane.f32.xlu1 %v3021_v13  ;;  %v4180_v30 = vpop.f32.mrf.mxu1 }
 0x2a7   :  { %v2727_v33 = vpack.c.bf16 %v4180_v30, %v4179_v22  ;;  %v2915_v31 = vmul.f32 %v5284_v2, %v2844_v51  ;;  %v2842_v32 = vunpack.c.l.bf16 %v2796_v0  ;;  %v2916_v14 = vmul.f32 %v5284_v2, %v2845_v15 }
 0x2a8   :  { %v2586_v63 = vpop.f32.mrf.mxu1  ;;  %v2843_v17 = vunpack.c.h.bf16 %v2796_v0 }
 0x2a9   :  { %v2767_v55 = vadd.bf16 %v5276_v36, %v2727_v33  ;;  %v2726_v56 = vpack.c.bf16 %v2586_v63, %v2583_v54  ;;  %v3039_v49 = vsel %vm1458_vm2, %v2915_v31, 0.0  ;;  %v2913_v37 = vmul.f32 %v5284_v2, %v2842_v32 }
 0x2aa   :  { %3025 = vadd.xlane.f32.xlu0 %v3024_v50  ;;  %3040 = vadd.xlane.f32.xlu1 %v3039_v49  ;;  %v4183_v35 = vpop.f32.mrf.mxu1  ;;  %v3042_v21 = vsel %vm1458_vm2, %v2916_v14, 0.0  ;;  %v2914_v20 = vmul.f32 %v5284_v2, %v2843_v17 }
 0x2ab   :  { %v2799_v38 = vmax.bf16 %v4228_v3, %v2767_v55  ;;  %v2766_v39 = vadd.bf16 %v5276_v36, %v2726_v56  ;;  %v3033_v57 = vsel %vm1458_vm2, %v2913_v37, 0.0 }
 0x2ac   :  { %v2599_v44 = vpop.f32.mrf.mxu1  ;;  %v3036_v46 = vsel %vm1458_vm2, %v2914_v20, 0.0 }
 0x2ad   :  { %v2798_v5 = vmax.bf16 %v4228_v3, %v2766_v39  ;;  %v2848_v29 = vunpack.c.l.bf16 %v2799_v38  ;;  %v2849_v41 = vunpack.c.h.bf16 %v2799_v38 }
 0x2ae   :  { %3043 = vadd.xlane.f32.xlu0 %v3042_v21  ;;  %3034 = vadd.xlane.f32.xlu1 %v3033_v57  ;;  %v4184_v42 = vpop.f32.mrf.mxu1 }
 0x2af   :  { %v2729_v28 = vpack.c.bf16 %v4184_v42, %v4183_v35  ;;  %v2919_v4 = vmul.f32 %v5284_v2, %v2848_v29  ;;  %v2846_v43 = vunpack.c.l.bf16 %v2798_v5  ;;  %v2920_v18 = vmul.f32 %v5284_v2, %v2849_v41 }
 0x2b0   :  { %v2602_v27 = vpop.f32.mrf.mxu1  ;;  %v2847_v24 = vunpack.c.h.bf16 %v2798_v5 }
 0x2b1   :  { %v2769_v6 = vadd.bf16 %v5276_v36, %v2729_v28  ;;  %v2728_v45 = vpack.c.bf16 %v2602_v27, %v2599_v44  ;;  %v3051_v58 = vsel %vm1458_vm2, %v2919_v4, 0.0  ;;  %v2917_v60 = vmul.f32 %v5284_v2, %v2846_v43 }
 0x2b2   :  { %3037 = vadd.xlane.f32.xlu0 %v3036_v46  ;;  %3052 = vadd.xlane.f32.xlu1 %v3051_v58  ;;  %v4187_v1 = vpop.f32.mrf.mxu1  ;;  %v3054_v34 = vsel %vm1458_vm2, %v2920_v18, 0.0  ;;  %v2918_v7 = vmul.f32 %v5284_v2, %v2847_v24 }
 0x2b3   :  { %v2801_v8 = vmax.bf16 %v4228_v3, %v2769_v6  ;;  %v2768_v16 = vadd.bf16 %v5276_v36, %v2728_v45  ;;  %v3045_v19 = vsel %vm1458_vm2, %v2917_v60, 0.0 }
 0x2b4   :  { %v2615_v48 = vpop.f32.mrf.mxu1  ;;  %v3048_v12 = vsel %vm1458_vm2, %v2918_v7, 0.0 }
 0x2b5   :  { %v2800_v10 = vmax.bf16 %v4228_v3, %v2768_v16  ;;  %v2852_v25 = vunpack.c.l.bf16 %v2801_v8  ;;  %v2853_v47 = vunpack.c.h.bf16 %v2801_v8 }
 0x2b6   :  { %3055 = vadd.xlane.f32.xlu0 %v3054_v34  ;;  %3046 = vadd.xlane.f32.xlu1 %v3045_v19  ;;  %v4188_v61 = vpop.f32.mrf.mxu1 }
 0x2b7   :  { %v2731_v40 = vpack.c.bf16 %v4188_v61, %v4187_v1  ;;  %v2923_v53 = vmul.f32 %v5284_v2, %v2852_v25  ;;  %v2850_v9 = vunpack.c.l.bf16 %v2800_v10  ;;  %v2924_v59 = vmul.f32 %v5284_v2, %v2853_v47 }
 0x2b8   :  { %v2618_v11 = vpop.f32.mrf.mxu1  ;;  %v2851_v22 = vunpack.c.h.bf16 %v2800_v10 }
 0x2b9   :  { %v2771_v23 = vadd.bf16 %v5276_v36, %v2731_v40  ;;  %v2730_v52 = vpack.c.bf16 %v2618_v11, %v2615_v48  ;;  %v3063_v54 = vsel %vm1458_vm2, %v2923_v53, 0.0  ;;  %v2921_v62 = vmul.f32 %v5284_v2, %v2850_v9 }
 0x2ba   :  { %3049 = vadd.xlane.f32.xlu0 %v3048_v12  ;;  %3064 = vadd.xlane.f32.xlu1 %v3063_v54  ;;  %v4191_v26 = vpop.f32.mrf.mxu1  ;;  %v3066_v15 = vsel %vm1458_vm2, %v2924_v59, 0.0  ;;  %v2922_v30 = vmul.f32 %v5284_v2, %v2851_v22 }
 0x2bb   :  { %v2803_v0 = vmax.bf16 %v4228_v3, %v2771_v23  ;;  %v2770_v13 = vadd.bf16 %v5276_v36, %v2730_v52  ;;  %v3057_v31 = vsel %vm1458_vm2, %v2921_v62, 0.0 }
 0x2bc   :  { %v2631_v51 = vpop.f32.mrf.mxu1  ;;  %v3060_v39 = vsel %vm1458_vm2, %v2922_v30, 0.0 }
 0x2bd   :  { %v2802_v33 = vmax.bf16 %v4228_v3, %v2770_v13  ;;  %v2856_v32 = vunpack.c.l.bf16 %v2803_v0  ;;  %v2857_v63 = vunpack.c.h.bf16 %v2803_v0 }
 0x2be   :  { %3067 = vadd.xlane.f32.xlu0 %v3066_v15  ;;  %3058 = vadd.xlane.f32.xlu1 %v3057_v31  ;;  %v4192_v14 = vpop.f32.mrf.mxu1 }
 0x2bf   :  { %v2733_v17 = vpack.c.bf16 %v4192_v14, %v4191_v26  ;;  %v2927_v55 = vmul.f32 %v5284_v2, %v2856_v32  ;;  %v2854_v56 = vunpack.c.l.bf16 %v2802_v33  ;;  %v2928_v49 = vmul.f32 %v5284_v2, %v2857_v63 }
 0x2c0   :  { %v2634_v50 = vpop.f32.mrf.mxu1  ;;  %v2855_v35 = vunpack.c.h.bf16 %v2802_v33 }
 0x2c1   :  { %v2773_v37 = vadd.bf16 %v5276_v36, %v2733_v17  ;;  %v2732_v38 = vpack.c.bf16 %v2634_v50, %v2631_v51  ;;  %v3075_v44 = vsel %vm1458_vm2, %v2927_v55, 0.0  ;;  %v2925_v20 = vmul.f32 %v5284_v2, %v2854_v56 }
 0x2c2   :  { %3061 = vadd.xlane.f32.xlu0 %v3060_v39  ;;  %3076 = vadd.xlane.f32.xlu1 %v3075_v44  ;;  %v4195_v21 = vpop.f32.mrf.mxu1  ;;  %v3078_v41 = vsel %vm1458_vm2, %v2928_v49, 0.0  ;;  %v2926_v42 = vmul.f32 %v5284_v2, %v2855_v35 }
 0x2c3   :  { %v2805_v5 = vmax.bf16 %v4228_v3, %v2773_v37  ;;  %v2772_v57 = vadd.bf16 %v5276_v36, %v2732_v38  ;;  %v3069_v4 = vsel %vm1458_vm2, %v2925_v20, 0.0 }
 0x2c4   :  { %v2647_v29 = vpop.f32.mrf.mxu1  ;;  %v3072_v16 = vsel %vm1458_vm2, %v2926_v42, 0.0 }
 0x2c5   :  { %v2804_v28 = vmax.bf16 %v4228_v3, %v2772_v57  ;;  %v2860_v43 = vunpack.c.l.bf16 %v2805_v5  ;;  %v2861_v27 = vunpack.c.h.bf16 %v2805_v5 }
 0x2c6   :  { %3079 = vadd.xlane.f32.xlu0 %v3078_v41  ;;  %3070 = vadd.xlane.f32.xlu1 %v3069_v4  ;;  %v4196_v18 = vpop.f32.mrf.mxu1 }
 0x2c7   :  { %v2735_v24 = vpack.c.bf16 %v4196_v18, %v4195_v21  ;;  %v2931_v6 = vmul.f32 %v5284_v2, %v2860_v43  ;;  %v2858_v45 = vunpack.c.l.bf16 %v2804_v28  ;;  %v2932_v58 = vmul.f32 %v5284_v2, %v2861_v27 }
 0x2c8   :  { %v2650_v46 = vpop.f32.mrf.mxu1  ;;  %v2859_v1 = vunpack.c.h.bf16 %v2804_v28 }
 0x2c9   :  { %v2775_v60 = vadd.bf16 %v5276_v36, %v2735_v24  ;;  %v2734_v8 = vpack.c.bf16 %v2650_v46, %v2647_v29  ;;  %v3087_v48 = vsel %vm1458_vm2, %v2931_v6, 0.0  ;;  %v2929_v7 = vmul.f32 %v5284_v2, %v2858_v45 }
 0x2ca   :  { %3073 = vadd.xlane.f32.xlu0 %v3072_v16  ;;  %3088 = vadd.xlane.f32.xlu1 %v3087_v48  ;;  %v4199_v34 = vpop.f32.mrf.mxu1  ;;  %v3090_v47 = vsel %vm1458_vm2, %v2932_v58, 0.0  ;;  %v2930_v61 = vmul.f32 %v5284_v2, %v2859_v1 }
 0x2cb   :  { %v2807_v10 = vmax.bf16 %v4228_v3, %v2775_v60  ;;  %v2774_v19 = vadd.bf16 %v5276_v36, %v2734_v8  ;;  %v3081_v53 = vsel %vm1458_vm2, %v2929_v7, 0.0 }
 0x2cc   :  { %v2663_v25 = vpop.f32.mrf.mxu1  ;;  %v3084_v13 = vsel %vm1458_vm2, %v2930_v61, 0.0 }
 0x2cd   :  { %v2806_v40 = vmax.bf16 %v4228_v3, %v2774_v19  ;;  %v2864_v9 = vunpack.c.l.bf16 %v2807_v10  ;;  %v2865_v11 = vunpack.c.h.bf16 %v2807_v10 }
 0x2ce   :  { %3091 = vadd.xlane.f32.xlu0 %v3090_v47  ;;  %3082 = vadd.xlane.f32.xlu1 %v3081_v53  ;;  %v4200_v59 = vpop.f32.mrf.mxu1 }
 0x2cf   :  { %v2737_v22 = vpack.c.bf16 %v4200_v59, %v4199_v34  ;;  %v2935_v23 = vmul.f32 %v5284_v2, %v2864_v9  ;;  %v2862_v52 = vunpack.c.l.bf16 %v2806_v40  ;;  %v2936_v54 = vmul.f32 %v5284_v2, %v2865_v11 }
 0x2d0   :  { %v2666_v12 = vpop.f32.mrf.mxu1  ;;  %v2863_v26 = vunpack.c.h.bf16 %v2806_v40 }
 0x2d1   :  { %v2777_v62 = vadd.bf16 %v5276_v36, %v2737_v22  ;;  %v2736_v0 = vpack.c.bf16 %v2666_v12, %v2663_v25  ;;  %v3099_v51 = vsel %vm1458_vm2, %v2935_v23, 0.0  ;;  %v2933_v30 = vmul.f32 %v5284_v2, %v2862_v52 }
 0x2d2   :  { %3085 = vadd.xlane.f32.xlu0 %v3084_v13  ;;  %3100 = vadd.xlane.f32.xlu1 %v3099_v51  ;;  %v4203_v15 = vpop.f32.mrf.mxu1  ;;  %v3102_v63 = vsel %vm1458_vm2, %v2936_v54, 0.0  ;;  %v2934_v14 = vmul.f32 %v5284_v2, %v2863_v26 }
 0x2d3   :  { %v2809_v33 = vmax.bf16 %v4228_v3, %v2777_v62  ;;  %v2776_v31 = vadd.bf16 %v5276_v36, %v2736_v0  ;;  %v3093_v55 = vsel %vm1458_vm2, %v2933_v30, 0.0  ;;  %v5478_v30 = vstv %s5807_s12 }
 0x2d4   :  { %v2679_v32 = vpop.f32.mrf.mxu1  ;;  %v3096_v57 = vsel %vm1458_vm2, %v2934_v14, 0.0 }
 0x2d5   :  { %v2808_v17 = vmax.bf16 %v4228_v3, %v2776_v31  ;;  %v2868_v56 = vunpack.c.l.bf16 %v2809_v33  ;;  %v2869_v50 = vunpack.c.h.bf16 %v2809_v33 }
 0x2d6   :  { %3103 = vadd.xlane.f32.xlu0 %v3102_v63  ;;  %3094 = vadd.xlane.f32.xlu1 %v3093_v55  ;;  %v4204_v49 = vpop.f32.mrf.mxu1 }
 0x2d7   :  { %v2739_v35 = vpack.c.bf16 %v4204_v49, %v4203_v15  ;;  %v2939_v37 = vmul.f32 %v5284_v2, %v2868_v56  ;;  %v2866_v38 = vunpack.c.l.bf16 %v2808_v17  ;;  %v2940_v44 = vmul.f32 %v5284_v2, %v2869_v50 }
 0x2d8   :  { %v2682_v39 = vpop.f32.mrf.mxu1  ;;  %v2867_v21 = vunpack.c.h.bf16 %v2808_v17 }
 0x2d9   :  { %v2779_v20 = vadd.bf16 %v5276_v36, %v2739_v35  ;;  %v2738_v5 = vpack.c.bf16 %v2682_v39, %v2679_v32  ;;  %v3111_v29 = vsel %vm1458_vm2, %v2939_v37, 0.0  ;;  %v2937_v42 = vmul.f32 %v5284_v2, %v2866_v38 }
 0x2da   :  { %3097 = vadd.xlane.f32.xlu0 %v3096_v57  ;;  %3112 = vadd.xlane.f32.xlu1 %v3111_v29  ;;  %v4207_v41 = vpop.f32.mrf.mxu1  ;;  %v3114_v27 = vsel %vm1458_vm2, %v2940_v44, 0.0  ;;  %v2938_v18 = vmul.f32 %v5284_v2, %v2867_v21 }
 0x2db   :  { %v2811_v28 = vmax.bf16 %v4228_v3, %v2779_v20  ;;  %v2778_v4 = vadd.bf16 %v5276_v36, %v2738_v5  ;;  %v3105_v6 = vsel %vm1458_vm2, %v2937_v42, 0.0 }
 0x2dc   :  { %v2695_v43 = vpop.f32.mrf.mxu1  ;;  %v3108_v48 = vsel %vm1458_vm2, %v2938_v18, 0.0 }
 0x2dd   :  { %v2810_v24 = vmax.bf16 %v4228_v3, %v2778_v4  ;;  %v2872_v45 = vunpack.c.l.bf16 %v2811_v28  ;;  %v2873_v46 = vunpack.c.h.bf16 %v2811_v28 }
 0x2de   :  { %3115 = vadd.xlane.f32.xlu0 %v3114_v27  ;;  %3106 = vadd.xlane.f32.xlu1 %v3105_v6  ;;  %v4208_v58 = vpop.f32.mrf.mxu1 }
 0x2df   :  { %v2741_v1 = vpack.c.bf16 %v4208_v58, %v4207_v41  ;;  %v2943_v60 = vmul.f32 %v5284_v2, %v2872_v45  ;;  %v2870_v8 = vunpack.c.l.bf16 %v2810_v24  ;;  %v2944_v34 = vmul.f32 %v5284_v2, %v2873_v46 }
 0x2e0   :  { %v2698_v16 = vpop.f32.mrf.mxu1  ;;  %v2871_v25 = vunpack.c.h.bf16 %v2810_v24 }
 0x2e1   :  { %v2781_v7 = vadd.bf16 %v5276_v36, %v2741_v1  ;;  %v2740_v10 = vpack.c.bf16 %v2698_v16, %v2695_v43  ;;  %v3123_v19 = vsel %vm1458_vm2, %v2943_v60, 0.0  ;;  %v2941_v47 = vmul.f32 %v5284_v2, %v2870_v8 }
 0x2e2   :  { %3109 = vadd.xlane.f32.xlu0 %v3108_v48  ;;  %3124 = vadd.xlane.f32.xlu1 %v3123_v19  ;;  %v3126_v9 = vsel %vm1458_vm2, %v2944_v34, 0.0  ;;  %v2942_v59 = vmul.f32 %v5284_v2, %v2871_v25 }
 0x2e3   :  { %v2813_v61 = vmax.bf16 %v4228_v3, %v2781_v7  ;;  %v2780_v40 = vadd.bf16 %v5276_v36, %v2740_v10  ;;  %v3117_v11 = vsel %vm1458_vm2, %v2941_v47, 0.0 }
 0x2e4   :  { %v3120_v12 = vsel %vm1458_vm2, %v2942_v59, 0.0 }
 0x2e5   :  { %v2812_v53 = vmax.bf16 %v4228_v3, %v2780_v40  ;;  %v2876_v52 = vunpack.c.l.bf16 %v2813_v61  ;;  %v2877_v36 = vunpack.c.h.bf16 %v2813_v61 }
 0x2e6   :  { %3127 = vadd.xlane.f32.xlu0 %v3126_v9  ;;  %3118 = vadd.xlane.f32.xlu1 %v3117_v11 }
 0x2e7   :  { %v2874_v22 = vunpack.c.l.bf16 %v2812_v53  ;;  %v2875_v23 = vunpack.c.h.bf16 %v2812_v53  ;;  %v2947_v62 = vmul.f32 %v5284_v2, %v2876_v52  ;;  %v2948_v13 = vmul.f32 %v5284_v2, %v2877_v36 }
 0x2e9   :  { %v2945_v54 = vmul.f32 %v5284_v2, %v2874_v22  ;;  %v2946_v26 = vmul.f32 %v5284_v2, %v2875_v23  ;;  %v3135_v51 = vsel %vm1458_vm2, %v2947_v62, 0.0  ;;  %v3138_v15 = vsel %vm1458_vm2, %v2948_v13, 0.0 }
 0x2ea   :  { %3121 = vadd.xlane.f32.xlu0 %v3120_v12 }
 0x2eb   :  { %v3129_v3 = vsel %vm1458_vm2, %v2945_v54, 0.0  ;;  %v3132_v0 = vsel %vm1458_vm2, %v2946_v26, 0.0 }
 0x2ec   :  { %3130 = vadd.xlane.f32.xlu1 %v3129_v3 }
 0x2ee   :  { %3133 = vadd.xlane.f32.xlu0 %v3132_v0 }
 0x2f0   :  { %3136 = vadd.xlane.f32.xlu1 %v3135_v51 }
 0x2f2   :  { %3139 = vadd.xlane.f32.xlu0 %v3138_v15 }
 0x2fb   :  { %v2957_v33 = vpop.xlane.xlu0 %2956 }
 0x2fc   :  { %v3145_v31 = vadd.f32 %v5478_v30, %v2957_v33 }
 0x2fd   :  { %v2954_v32 = vpop.xlane.xlu1 %2953 }
 0x2fe   :  { %3210 = vst.msk [vmem:[#allocation3 + $0x10] sm:$0xff] %vm3207_vm3, %v3145_v31  ;;  %v3144_v2 = vadd.f32 %v5478_v30, %v2954_v32 }
 0x2ff   :  { %v2960_v63 = vpop.xlane.xlu0 %2959 }
 0x300   :  { %3209 = vst.msk [vmem:[#allocation3 + $0x8] sm:$0xff] %vm3207_vm3, %v3144_v2  ;;  %v3146_v14 = vadd.f32 %v5478_v30, %v2960_v63 }
 0x302   :  { %3211 = vst.msk [vmem:[#allocation3 + $0x18] sm:$0xff] %vm3207_vm3, %v3146_v14 }
 0x303   :  { %v2951_v17 = vpop.xlane.xlu0 %2950  ;;  %v2969_v55 = vpop.xlane.xlu1 %2968 }
 0x304   :  { %v3143_v56 = vadd.f32 %v5478_v30, %v2951_v17  ;;  %v3149_v50 = vadd.f32 %v5478_v30, %v2969_v55 }
 0x305   :  { %v3430_v49 = vld [vmem:[#allocation3 + $0x10] sm:$0xff] }
 0x306   :  { %3431 = vst [vmem:[%s5808_s13 + $0x10] sm:$0xff] %v3430_v49  ;;  %3208 = vst.msk [vmem:[#allocation3] sm:$0xff] %vm3207_vm3, %v3143_v56 }
 0x307   :  { %3214 = vst.msk [vmem:[#allocation3 + $0x30] sm:$0xff] %vm3207_vm3, %v3149_v50  ;;  %v3428_v35 = vld [vmem:[#allocation3 + $0x8] sm:$0xff]  ;;  %v2972_v37 = vpop.xlane.xlu0 %2971  ;;  %v2963_v38 = vpop.xlane.xlu1 %2962 }
 0x308   :  { %3429 = vst [vmem:[%s5808_s13 + $0x8] sm:$0xff] %v3428_v35  ;;  %v3150_v39 = vadd.f32 %v5478_v30, %v2972_v37  ;;  %v3147_v44 = vadd.f32 %v5478_v30, %v2963_v38 }
 0x309   :  { %v3432_v21 = vld [vmem:[#allocation3 + $0x18] sm:$0xff] }
 0x30a   :  { %3433 = vst [vmem:[%s5808_s13 + $0x18] sm:$0xff] %v3432_v21  ;;  %3215 = vst.msk [vmem:[#allocation3 + $0x38] sm:$0xff] %vm3207_vm3, %v3150_v39 }
 0x30b   :  { %3212 = vst.msk [vmem:[#allocation3 + $0x20] sm:$0xff] %vm3207_vm3, %v3147_v44  ;;  %v2966_v20 = vpop.xlane.xlu0 %2965  ;;  %v2981_v5 = vpop.xlane.xlu1 %2980 }
 0x30c   :  { %v3148_v57 = vadd.f32 %v5478_v30, %v2966_v20  ;;  %v3153_v29 = vadd.f32 %v5478_v30, %v2981_v5 }
 0x30d   :  { %v3426_v41 = vld [vmem:[#allocation3] sm:$0xff] }
 0x30e   :  { %v3438_v42 = vld [vmem:[#allocation3 + $0x30] sm:$0xff]  ;;  %3427 = vst [vmem:[%s5808_s13] sm:$0xff] %v3426_v41  ;;  %3213 = vst.msk [vmem:[#allocation3 + $0x28] sm:$0xff] %vm3207_vm3, %v3148_v57 }
 0x30f   :  { %3439 = vst [vmem:[%s5808_s13 + $0x30] sm:$0xff] %v3438_v42  ;;  %3218 = vst.msk [vmem:[#allocation3 + $0x50] sm:$0xff] %vm3207_vm3, %v3153_v29  ;;  %v2984_v28 = vpop.xlane.xlu0 %2983  ;;  %v2975_v4 = vpop.xlane.xlu1 %2974 }
 0x310   :  { %v3154_v43 = vadd.f32 %v5478_v30, %v2984_v28  ;;  %v3151_v27 = vadd.f32 %v5478_v30, %v2975_v4 }
 0x311   :  { %v3440_v18 = vld [vmem:[#allocation3 + $0x38] sm:$0xff] }
 0x312   :  { %v3434_v24 = vld [vmem:[#allocation3 + $0x20] sm:$0xff]  ;;  %3441 = vst [vmem:[%s5808_s13 + $0x38] sm:$0xff] %v3440_v18  ;;  %3219 = vst.msk [vmem:[#allocation3 + $0x58] sm:$0xff] %vm3207_vm3, %v3154_v43 }
 0x313   :  { %3435 = vst [vmem:[%s5808_s13 + $0x20] sm:$0xff] %v3434_v24  ;;  %3216 = vst.msk [vmem:[#allocation3 + $0x40] sm:$0xff] %vm3207_vm3, %v3151_v27  ;;  %v2978_v6 = vpop.xlane.xlu0 %2977  ;;  %v2993_v45 = vpop.xlane.xlu1 %2992 }
 0x314   :  { %v3152_v46 = vadd.f32 %v5478_v30, %v2978_v6  ;;  %v3157_v58 = vadd.f32 %v5478_v30, %v2993_v45 }
 0x315   :  { %v3436_v1 = vld [vmem:[#allocation3 + $0x28] sm:$0xff] }
 0x316   :  { %v3446_v60 = vld [vmem:[#allocation3 + $0x50] sm:$0xff]  ;;  %3437 = vst [vmem:[%s5808_s13 + $0x28] sm:$0xff] %v3436_v1  ;;  %3217 = vst.msk [vmem:[#allocation3 + $0x48] sm:$0xff] %vm3207_vm3, %v3152_v46 }
 0x317   :  { %3447 = vst [vmem:[%s5808_s13 + $0x50] sm:$0xff] %v3446_v60  ;;  %3222 = vst.msk [vmem:[#allocation3 + $0x70] sm:$0xff] %vm3207_vm3, %v3157_v58  ;;  %v2996_v8 = vpop.xlane.xlu0 %2995  ;;  %v2987_v16 = vpop.xlane.xlu1 %2986 }
 0x318   :  { %v3158_v48 = vadd.f32 %v5478_v30, %v2996_v8  ;;  %v3155_v34 = vadd.f32 %v5478_v30, %v2987_v16 }
 0x319   :  { %v3448_v7 = vld [vmem:[#allocation3 + $0x58] sm:$0xff] }
 0x31a   :  { %v3442_v10 = vld [vmem:[#allocation3 + $0x40] sm:$0xff]  ;;  %3449 = vst [vmem:[%s5808_s13 + $0x58] sm:$0xff] %v3448_v7  ;;  %3223 = vst.msk [vmem:[#allocation3 + $0x78] sm:$0xff] %vm3207_vm3, %v3158_v48 }
 0x31b   :  { %3443 = vst [vmem:[%s5808_s13 + $0x40] sm:$0xff] %v3442_v10  ;;  %3220 = vst.msk [vmem:[#allocation3 + $0x60] sm:$0xff] %vm3207_vm3, %v3155_v34  ;;  %v2990_v19 = vpop.xlane.xlu0 %2989  ;;  %v3005_v25 = vpop.xlane.xlu1 %3004 }
 0x31c   :  { %v3156_v47 = vadd.f32 %v5478_v30, %v2990_v19  ;;  %v3161_v61 = vadd.f32 %v5478_v30, %v3005_v25 }
 0x31d   :  { %v3444_v40 = vld [vmem:[#allocation3 + $0x48] sm:$0xff] }
 0x31e   :  { %v3454_v53 = vld [vmem:[#allocation3 + $0x70] sm:$0xff]  ;;  %3445 = vst [vmem:[%s5808_s13 + $0x48] sm:$0xff] %v3444_v40  ;;  %3221 = vst.msk [vmem:[#allocation3 + $0x68] sm:$0xff] %vm3207_vm3, %v3156_v47 }
 0x31f   :  { %3455 = vst [vmem:[%s5808_s13 + $0x70] sm:$0xff] %v3454_v53  ;;  %3226 = vst.msk [vmem:[#allocation3 + $0x90] sm:$0xff] %vm3207_vm3, %v3161_v61  ;;  %v3008_v9 = vpop.xlane.xlu0 %3007  ;;  %v2999_v11 = vpop.xlane.xlu1 %2998 }
 0x320   :  { %v3162_v59 = vadd.f32 %v5478_v30, %v3008_v9  ;;  %v3159_v22 = vadd.f32 %v5478_v30, %v2999_v11 }
 0x321   :  { %v3456_v23 = vld [vmem:[#allocation3 + $0x78] sm:$0xff] }
 0x322   :  { %v3450_v52 = vld [vmem:[#allocation3 + $0x60] sm:$0xff]  ;;  %3457 = vst [vmem:[%s5808_s13 + $0x78] sm:$0xff] %v3456_v23  ;;  %3227 = vst.msk [vmem:[#allocation3 + $0x98] sm:$0xff] %vm3207_vm3, %v3162_v59 }
 0x323   :  { %3451 = vst [vmem:[%s5808_s13 + $0x60] sm:$0xff] %v3450_v52  ;;  %3224 = vst.msk [vmem:[#allocation3 + $0x80] sm:$0xff] %vm3207_vm3, %v3159_v22  ;;  %v3002_v12 = vpop.xlane.xlu0 %3001  ;;  %v3017_v54 = vpop.xlane.xlu1 %3016 }
 0x324   :  { %v3160_v26 = vadd.f32 %v5478_v30, %v3002_v12  ;;  %v3165_v36 = vadd.f32 %v5478_v30, %v3017_v54 }
 0x325   :  { %v3452_v3 = vld [vmem:[#allocation3 + $0x68] sm:$0xff] }
 0x326   :  { %v3462_v62 = vld [vmem:[#allocation3 + $0x90] sm:$0xff]  ;;  %3453 = vst [vmem:[%s5808_s13 + $0x68] sm:$0xff] %v3452_v3  ;;  %3225 = vst.msk [vmem:[#allocation3 + $0x88] sm:$0xff] %vm3207_vm3, %v3160_v26 }
 0x327   :  { %3463 = vst [vmem:[%s5808_s13 + $0x90] sm:$0xff] %v3462_v62  ;;  %3230 = vst.msk [vmem:[#allocation3 + $0xb0] sm:$0xff] %vm3207_vm3, %v3165_v36  ;;  %v3020_v0 = vpop.xlane.xlu0 %3019  ;;  %v3011_v13 = vpop.xlane.xlu1 %3010 }
 0x328   :  { %v3166_v51 = vadd.f32 %v5478_v30, %v3020_v0  ;;  %v3163_v15 = vadd.f32 %v5478_v30, %v3011_v13 }
 0x329   :  { %v3464_v33 = vld [vmem:[#allocation3 + $0x98] sm:$0xff] }
 0x32a   :  { %v3458_v31 = vld [vmem:[#allocation3 + $0x80] sm:$0xff]  ;;  %3465 = vst [vmem:[%s5808_s13 + $0x98] sm:$0xff] %v3464_v33  ;;  %3231 = vst.msk [vmem:[#allocation3 + $0xb8] sm:$0xff] %vm3207_vm3, %v3166_v51 }
 0x32b   :  { %3459 = vst [vmem:[%s5808_s13 + $0x80] sm:$0xff] %v3458_v31  ;;  %3228 = vst.msk [vmem:[#allocation3 + $0xa0] sm:$0xff] %vm3207_vm3, %v3163_v15  ;;  %v3014_v32 = vpop.xlane.xlu0 %3013  ;;  %v3029_v2 = vpop.xlane.xlu1 %3028 }
 0x32c   :  { %v3164_v63 = vadd.f32 %v5478_v30, %v3014_v32  ;;  %v3169_v14 = vadd.f32 %v5478_v30, %v3029_v2 }
 0x32d   :  { %v3460_v17 = vld [vmem:[#allocation3 + $0x88] sm:$0xff] }
 0x32e   :  { %v3470_v55 = vld [vmem:[#allocation3 + $0xb0] sm:$0xff]  ;;  %3461 = vst [vmem:[%s5808_s13 + $0x88] sm:$0xff] %v3460_v17  ;;  %3229 = vst.msk [vmem:[#allocation3 + $0xa8] sm:$0xff] %vm3207_vm3, %v3164_v63 }
 0x32f   :  { %3471 = vst [vmem:[%s5808_s13 + $0xb0] sm:$0xff] %v3470_v55  ;;  %3234 = vst.msk [vmem:[#allocation3 + $0xd0] sm:$0xff] %vm3207_vm3, %v3169_v14  ;;  %v3032_v56 = vpop.xlane.xlu0 %3031  ;;  %v3023_v50 = vpop.xlane.xlu1 %3022 }
 0x330   :  { %v3170_v49 = vadd.f32 %v5478_v30, %v3032_v56  ;;  %v3167_v35 = vadd.f32 %v5478_v30, %v3023_v50 }
 0x331   :  { %v3472_v37 = vld [vmem:[#allocation3 + $0xb8] sm:$0xff] }
 0x332   :  { %v3466_v38 = vld [vmem:[#allocation3 + $0xa0] sm:$0xff]  ;;  %3473 = vst [vmem:[%s5808_s13 + $0xb8] sm:$0xff] %v3472_v37  ;;  %3235 = vst.msk [vmem:[#allocation3 + $0xd8] sm:$0xff] %vm3207_vm3, %v3170_v49 }
 0x333   :  { %3467 = vst [vmem:[%s5808_s13 + $0xa0] sm:$0xff] %v3466_v38  ;;  %3232 = vst.msk [vmem:[#allocation3 + $0xc0] sm:$0xff] %vm3207_vm3, %v3167_v35  ;;  %v3026_v39 = vpop.xlane.xlu0 %3025  ;;  %v3041_v44 = vpop.xlane.xlu1 %3040 }
 0x334   :  { %v3168_v21 = vadd.f32 %v5478_v30, %v3026_v39  ;;  %v3173_v20 = vadd.f32 %v5478_v30, %v3041_v44 }
 0x335   :  { %v3468_v5 = vld [vmem:[#allocation3 + $0xa8] sm:$0xff] }
 0x336   :  { %v3478_v57 = vld [vmem:[#allocation3 + $0xd0] sm:$0xff]  ;;  %3469 = vst [vmem:[%s5808_s13 + $0xa8] sm:$0xff] %v3468_v5  ;;  %3233 = vst.msk [vmem:[#allocation3 + $0xc8] sm:$0xff] %vm3207_vm3, %v3168_v21 }
 0x337   :  { %3479 = vst [vmem:[%s5808_s13 + $0xd0] sm:$0xff] %v3478_v57  ;;  %3238 = vst.msk [vmem:[#allocation3 + $0xf0] sm:$0xff] %vm3207_vm3, %v3173_v20  ;;  %v3044_v29 = vpop.xlane.xlu0 %3043  ;;  %v3035_v41 = vpop.xlane.xlu1 %3034 }
 0x338   :  { %v3174_v42 = vadd.f32 %v5478_v30, %v3044_v29  ;;  %v3171_v28 = vadd.f32 %v5478_v30, %v3035_v41 }
 0x339   :  { %v3480_v4 = vld [vmem:[#allocation3 + $0xd8] sm:$0xff] }
 0x33a   :  { %v3474_v43 = vld [vmem:[#allocation3 + $0xc0] sm:$0xff]  ;;  %3481 = vst [vmem:[%s5808_s13 + $0xd8] sm:$0xff] %v3480_v4  ;;  %3239 = vst.msk [vmem:[#allocation3 + $0xf8] sm:$0xff] %vm3207_vm3, %v3174_v42 }
 0x33b   :  { %3475 = vst [vmem:[%s5808_s13 + $0xc0] sm:$0xff] %v3474_v43  ;;  %3236 = vst.msk [vmem:[#allocation3 + $0xe0] sm:$0xff] %vm3207_vm3, %v3171_v28  ;;  %v3038_v27 = vpop.xlane.xlu0 %3037  ;;  %v3053_v18 = vpop.xlane.xlu1 %3052 }
 0x33c   :  { %v3172_v24 = vadd.f32 %v5478_v30, %v3038_v27  ;;  %v3177_v6 = vadd.f32 %v5478_v30, %v3053_v18 }
 0x33d   :  { %v3476_v45 = vld [vmem:[#allocation3 + $0xc8] sm:$0xff] }
 0x33e   :  { %v3486_v46 = vld [vmem:[#allocation3 + $0xf0] sm:$0xff]  ;;  %3477 = vst [vmem:[%s5808_s13 + $0xc8] sm:$0xff] %v3476_v45  ;;  %3237 = vst.msk [vmem:[#allocation3 + $0xe8] sm:$0xff] %vm3207_vm3, %v3172_v24 }
 0x33f   :  { %3487 = vst [vmem:[%s5808_s13 + $0xf0] sm:$0xff] %v3486_v46  ;;  %3242 = vst.msk [vmem:[#allocation3 + $0x110] sm:$0xff] %vm3207_vm3, %v3177_v6  ;;  %v3056_v58 = vpop.xlane.xlu0 %3055  ;;  %v3047_v1 = vpop.xlane.xlu1 %3046 }
 0x340   :  { %v3178_v60 = vadd.f32 %v5478_v30, %v3056_v58  ;;  %v3175_v8 = vadd.f32 %v5478_v30, %v3047_v1 }
 0x341   :  { %v3488_v16 = vld [vmem:[#allocation3 + $0xf8] sm:$0xff] }
 0x342   :  { %v3482_v48 = vld [vmem:[#allocation3 + $0xe0] sm:$0xff]  ;;  %3489 = vst [vmem:[%s5808_s13 + $0xf8] sm:$0xff] %v3488_v16  ;;  %3243 = vst.msk [vmem:[#allocation3 + $0x118] sm:$0xff] %vm3207_vm3, %v3178_v60 }
 0x343   :  { %3483 = vst [vmem:[%s5808_s13 + $0xe0] sm:$0xff] %v3482_v48  ;;  %3240 = vst.msk [vmem:[#allocation3 + $0x100] sm:$0xff] %vm3207_vm3, %v3175_v8  ;;  %v3050_v34 = vpop.xlane.xlu0 %3049  ;;  %v3065_v7 = vpop.xlane.xlu1 %3064 }
 0x344   :  { %v3176_v10 = vadd.f32 %v5478_v30, %v3050_v34  ;;  %v3181_v19 = vadd.f32 %v5478_v30, %v3065_v7 }
 0x345   :  { %v3484_v25 = vld [vmem:[#allocation3 + $0xe8] sm:$0xff] }
 0x346   :  { %v3494_v47 = vld [vmem:[#allocation3 + $0x110] sm:$0xff]  ;;  %3485 = vst [vmem:[%s5808_s13 + $0xe8] sm:$0xff] %v3484_v25  ;;  %3241 = vst.msk [vmem:[#allocation3 + $0x108] sm:$0xff] %vm3207_vm3, %v3176_v10 }
 0x347   :  { %3495 = vst [vmem:[%s5808_s13 + $0x110] sm:$0xff] %v3494_v47  ;;  %3246 = vst.msk [vmem:[#allocation3 + $0x130] sm:$0xff] %vm3207_vm3, %v3181_v19  ;;  %v3068_v61 = vpop.xlane.xlu0 %3067  ;;  %v3059_v40 = vpop.xlane.xlu1 %3058 }
 0x348   :  { %v3182_v53 = vadd.f32 %v5478_v30, %v3068_v61  ;;  %v3179_v9 = vadd.f32 %v5478_v30, %v3059_v40 }
 0x349   :  { %v3496_v11 = vld [vmem:[#allocation3 + $0x118] sm:$0xff] }
 0x34a   :  { %v3490_v59 = vld [vmem:[#allocation3 + $0x100] sm:$0xff]  ;;  %3497 = vst [vmem:[%s5808_s13 + $0x118] sm:$0xff] %v3496_v11  ;;  %3247 = vst.msk [vmem:[#allocation3 + $0x138] sm:$0xff] %vm3207_vm3, %v3182_v53 }
 0x34b   :  { %3491 = vst [vmem:[%s5808_s13 + $0x100] sm:$0xff] %v3490_v59  ;;  %3244 = vst.msk [vmem:[#allocation3 + $0x120] sm:$0xff] %vm3207_vm3, %v3179_v9  ;;  %v3062_v22 = vpop.xlane.xlu0 %3061  ;;  %v3077_v23 = vpop.xlane.xlu1 %3076 }
 0x34c   :  { %v3180_v52 = vadd.f32 %v5478_v30, %v3062_v22  ;;  %v3185_v12 = vadd.f32 %v5478_v30, %v3077_v23 }
 0x34d   :  { %v3492_v54 = vld [vmem:[#allocation3 + $0x108] sm:$0xff] }
 0x34e   :  { %v3502_v26 = vld [vmem:[#allocation3 + $0x130] sm:$0xff]  ;;  %3493 = vst [vmem:[%s5808_s13 + $0x108] sm:$0xff] %v3492_v54  ;;  %3245 = vst.msk [vmem:[#allocation3 + $0x128] sm:$0xff] %vm3207_vm3, %v3180_v52 }
 0x34f   :  { %3503 = vst [vmem:[%s5808_s13 + $0x130] sm:$0xff] %v3502_v26  ;;  %3250 = vst.msk [vmem:[#allocation3 + $0x150] sm:$0xff] %vm3207_vm3, %v3185_v12  ;;  %v3080_v36 = vpop.xlane.xlu0 %3079  ;;  %v3071_v3 = vpop.xlane.xlu1 %3070 }
 0x350   :  { %v3186_v62 = vadd.f32 %v5478_v30, %v3080_v36  ;;  %v3183_v0 = vadd.f32 %v5478_v30, %v3071_v3 }
 0x351   :  { %v3504_v13 = vld [vmem:[#allocation3 + $0x138] sm:$0xff] }
 0x352   :  { %v3498_v51 = vld [vmem:[#allocation3 + $0x120] sm:$0xff]  ;;  %3505 = vst [vmem:[%s5808_s13 + $0x138] sm:$0xff] %v3504_v13  ;;  %3251 = vst.msk [vmem:[#allocation3 + $0x158] sm:$0xff] %vm3207_vm3, %v3186_v62 }
 0x353   :  { %3499 = vst [vmem:[%s5808_s13 + $0x120] sm:$0xff] %v3498_v51  ;;  %3248 = vst.msk [vmem:[#allocation3 + $0x140] sm:$0xff] %vm3207_vm3, %v3183_v0  ;;  %v3074_v15 = vpop.xlane.xlu0 %3073  ;;  %v3089_v33 = vpop.xlane.xlu1 %3088 }
 0x354   :  { %v3184_v31 = vadd.f32 %v5478_v30, %v3074_v15  ;;  %v3189_v32 = vadd.f32 %v5478_v30, %v3089_v33 }
 0x355   :  { %v3500_v2 = vld [vmem:[#allocation3 + $0x128] sm:$0xff] }
 0x356   :  { %v3510_v63 = vld [vmem:[#allocation3 + $0x150] sm:$0xff]  ;;  %3501 = vst [vmem:[%s5808_s13 + $0x128] sm:$0xff] %v3500_v2  ;;  %3249 = vst.msk [vmem:[#allocation3 + $0x148] sm:$0xff] %vm3207_vm3, %v3184_v31 }
 0x357   :  { %3511 = vst [vmem:[%s5808_s13 + $0x150] sm:$0xff] %v3510_v63  ;;  %3254 = vst.msk [vmem:[#allocation3 + $0x170] sm:$0xff] %vm3207_vm3, %v3189_v32  ;;  %v3092_v14 = vpop.xlane.xlu0 %3091  ;;  %v3083_v17 = vpop.xlane.xlu1 %3082 }
 0x358   :  { %v3190_v55 = vadd.f32 %v5478_v30, %v3092_v14  ;;  %v3187_v56 = vadd.f32 %v5478_v30, %v3083_v17 }
 0x359   :  { %v3512_v50 = vld [vmem:[#allocation3 + $0x158] sm:$0xff] }
 0x35a   :  { %v3506_v49 = vld [vmem:[#allocation3 + $0x140] sm:$0xff]  ;;  %3513 = vst [vmem:[%s5808_s13 + $0x158] sm:$0xff] %v3512_v50  ;;  %3255 = vst.msk [vmem:[#allocation3 + $0x178] sm:$0xff] %vm3207_vm3, %v3190_v55 }
 0x35b   :  { %3507 = vst [vmem:[%s5808_s13 + $0x140] sm:$0xff] %v3506_v49  ;;  %3252 = vst.msk [vmem:[#allocation3 + $0x160] sm:$0xff] %vm3207_vm3, %v3187_v56  ;;  %v3086_v35 = vpop.xlane.xlu0 %3085  ;;  %v3101_v37 = vpop.xlane.xlu1 %3100 }
 0x35c   :  { %v3188_v38 = vadd.f32 %v5478_v30, %v3086_v35  ;;  %v3193_v39 = vadd.f32 %v5478_v30, %v3101_v37 }
 0x35d   :  { %v3508_v44 = vld [vmem:[#allocation3 + $0x148] sm:$0xff] }
 0x35e   :  { %v3518_v21 = vld [vmem:[#allocation3 + $0x170] sm:$0xff]  ;;  %3509 = vst [vmem:[%s5808_s13 + $0x148] sm:$0xff] %v3508_v44  ;;  %3253 = vst.msk [vmem:[#allocation3 + $0x168] sm:$0xff] %vm3207_vm3, %v3188_v38 }
 0x35f   :  { %3519 = vst [vmem:[%s5808_s13 + $0x170] sm:$0xff] %v3518_v21  ;;  %3258 = vst.msk [vmem:[#allocation3 + $0x190] sm:$0xff] %vm3207_vm3, %v3193_v39  ;;  %v3104_v20 = vpop.xlane.xlu0 %3103  ;;  %v3095_v5 = vpop.xlane.xlu1 %3094 }
 0x360   :  { %v3194_v57 = vadd.f32 %v5478_v30, %v3104_v20  ;;  %v3191_v29 = vadd.f32 %v5478_v30, %v3095_v5 }
 0x361   :  { %v3520_v41 = vld [vmem:[#allocation3 + $0x178] sm:$0xff] }
 0x362   :  { %v3514_v42 = vld [vmem:[#allocation3 + $0x160] sm:$0xff]  ;;  %3521 = vst [vmem:[%s5808_s13 + $0x178] sm:$0xff] %v3520_v41  ;;  %3259 = vst.msk [vmem:[#allocation3 + $0x198] sm:$0xff] %vm3207_vm3, %v3194_v57 }
 0x363   :  { %3515 = vst [vmem:[%s5808_s13 + $0x160] sm:$0xff] %v3514_v42  ;;  %3256 = vst.msk [vmem:[#allocation3 + $0x180] sm:$0xff] %vm3207_vm3, %v3191_v29  ;;  %v3098_v28 = vpop.xlane.xlu0 %3097  ;;  %v3113_v4 = vpop.xlane.xlu1 %3112 }
 0x364   :  { %v3192_v43 = vadd.f32 %v5478_v30, %v3098_v28  ;;  %v3197_v27 = vadd.f32 %v5478_v30, %v3113_v4 }
 0x365   :  { %v3516_v18 = vld [vmem:[#allocation3 + $0x168] sm:$0xff] }
 0x366   :  { %v3526_v24 = vld [vmem:[#allocation3 + $0x190] sm:$0xff]  ;;  %3517 = vst [vmem:[%s5808_s13 + $0x168] sm:$0xff] %v3516_v18  ;;  %3257 = vst.msk [vmem:[#allocation3 + $0x188] sm:$0xff] %vm3207_vm3, %v3192_v43 }
 0x367   :  { %3527 = vst [vmem:[%s5808_s13 + $0x190] sm:$0xff] %v3526_v24  ;;  %3262 = vst.msk [vmem:[#allocation3 + $0x1b0] sm:$0xff] %vm3207_vm3, %v3197_v27  ;;  %v3116_v6 = vpop.xlane.xlu0 %3115  ;;  %v3107_v45 = vpop.xlane.xlu1 %3106 }
 0x368   :  { %v3198_v46 = vadd.f32 %v5478_v30, %v3116_v6  ;;  %v3195_v58 = vadd.f32 %v5478_v30, %v3107_v45 }
 0x369   :  { %v3528_v1 = vld [vmem:[#allocation3 + $0x198] sm:$0xff] }
 0x36a   :  { %v3522_v60 = vld [vmem:[#allocation3 + $0x180] sm:$0xff]  ;;  %3529 = vst [vmem:[%s5808_s13 + $0x198] sm:$0xff] %v3528_v1  ;;  %3263 = vst.msk [vmem:[#allocation3 + $0x1b8] sm:$0xff] %vm3207_vm3, %v3198_v46 }
 0x36b   :  { %3523 = vst [vmem:[%s5808_s13 + $0x180] sm:$0xff] %v3522_v60  ;;  %3260 = vst.msk [vmem:[#allocation3 + $0x1a0] sm:$0xff] %vm3207_vm3, %v3195_v58  ;;  %v3110_v8 = vpop.xlane.xlu0 %3109  ;;  %v3125_v16 = vpop.xlane.xlu1 %3124 }
 0x36c   :  { %v3196_v48 = vadd.f32 %v5478_v30, %v3110_v8  ;;  %v3201_v34 = vadd.f32 %v5478_v30, %v3125_v16 }
 0x36d   :  { %v3524_v7 = vld [vmem:[#allocation3 + $0x188] sm:$0xff] }
 0x36e   :  { %v3534_v10 = vld [vmem:[#allocation3 + $0x1b0] sm:$0xff]  ;;  %3525 = vst [vmem:[%s5808_s13 + $0x188] sm:$0xff] %v3524_v7  ;;  %3261 = vst.msk [vmem:[#allocation3 + $0x1a8] sm:$0xff] %vm3207_vm3, %v3196_v48 }
 0x36f   :  { %3535 = vst [vmem:[%s5808_s13 + $0x1b0] sm:$0xff] %v3534_v10  ;;  %3266 = vst.msk [vmem:[#allocation3 + $0x1d0] sm:$0xff] %vm3207_vm3, %v3201_v34  ;;  %v3128_v19 = vpop.xlane.xlu0 %3127  ;;  %v3119_v25 = vpop.xlane.xlu1 %3118 }
 0x370   :  { %v3202_v47 = vadd.f32 %v5478_v30, %v3128_v19  ;;  %v3199_v61 = vadd.f32 %v5478_v30, %v3119_v25 }
 0x371   :  { %v3536_v40 = vld [vmem:[#allocation3 + $0x1b8] sm:$0xff] }
 0x372   :  { %v3530_v53 = vld [vmem:[#allocation3 + $0x1a0] sm:$0xff]  ;;  %3537 = vst [vmem:[%s5808_s13 + $0x1b8] sm:$0xff] %v3536_v40  ;;  %3267 = vst.msk [vmem:[#allocation3 + $0x1d8] sm:$0xff] %vm3207_vm3, %v3202_v47 }
 0x373   :  { %3531 = vst [vmem:[%s5808_s13 + $0x1a0] sm:$0xff] %v3530_v53  ;;  %3264 = vst.msk [vmem:[#allocation3 + $0x1c0] sm:$0xff] %vm3207_vm3, %v3199_v61  ;;  %v3122_v9 = vpop.xlane.xlu0 %3121 }
 0x374   :  { %v3200_v11 = vadd.f32 %v5478_v30, %v3122_v9 }
 0x375   :  { %v3532_v59 = vld [vmem:[#allocation3 + $0x1a8] sm:$0xff]  ;;  %v3131_v23 = vpop.xlane.xlu1 %3130 }
 0x376   :  { %v3542_v22 = vld [vmem:[#allocation3 + $0x1d0] sm:$0xff]  ;;  %3533 = vst [vmem:[%s5808_s13 + $0x1a8] sm:$0xff] %v3532_v59  ;;  %3265 = vst.msk [vmem:[#allocation3 + $0x1c8] sm:$0xff] %vm3207_vm3, %v3200_v11  ;;  %v3203_v52 = vadd.f32 %v5478_v30, %v3131_v23 }
 0x377   :  { %3543 = vst [vmem:[%s5808_s13 + $0x1d0] sm:$0xff] %v3542_v22  ;;  %v3134_v12 = vpop.xlane.xlu0 %3133 }
 0x378   :  { %3268 = vst.msk [vmem:[#allocation3 + $0x1e0] sm:$0xff] %vm3207_vm3, %v3203_v52  ;;  %v3204_v54 = vadd.f32 %v5478_v30, %v3134_v12 }
 0x379   :  { %v3544_v26 = vld [vmem:[#allocation3 + $0x1d8] sm:$0xff]  ;;  %v3137_v3 = vpop.xlane.xlu1 %3136 }
 0x37a   :  { %v3538_v36 = vld [vmem:[#allocation3 + $0x1c0] sm:$0xff]  ;;  %3545 = vst [vmem:[%s5808_s13 + $0x1d8] sm:$0xff] %v3544_v26  ;;  %3269 = vst.msk [vmem:[#allocation3 + $0x1e8] sm:$0xff] %vm3207_vm3, %v3204_v54  ;;  %v3205_v62 = vadd.f32 %v5478_v30, %v3137_v3 }
 0x37b   :  { %3539 = vst [vmem:[%s5808_s13 + $0x1c0] sm:$0xff] %v3538_v36  ;;  %v3140_v0 = vpop.xlane.xlu0 %3139 }
 0x37c   :  { %3270 = vst.msk [vmem:[#allocation3 + $0x1f0] sm:$0xff] %vm3207_vm3, %v3205_v62 }
 0x37d   :  { %v3540_v13 = vld [vmem:[#allocation3 + $0x1c8] sm:$0xff] }
 0x37e   :  { %3541 = vst [vmem:[%s5808_s13 + $0x1c8] sm:$0xff] %v3540_v13 }
 0x37f   :  { %v3546_v51 = vld [vmem:[#allocation3 + $0x1e0] sm:$0xff] }
 0x380   :  { %3547 = vst [vmem:[%s5808_s13 + $0x1e0] sm:$0xff] %v3546_v51 }
 0x381   :  { %v3548_v15 = vld [vmem:[#allocation3 + $0x1e8] sm:$0xff] }
 0x382   :  { %3549 = vst [vmem:[%s5808_s13 + $0x1e8] sm:$0xff] %v3548_v15 }
 0x383   :  { %v3550_v33 = vld [vmem:[#allocation3 + $0x1f0] sm:$0xff] }
 0x384   :  { %3551 = vst [vmem:[%s5808_s13 + $0x1f0] sm:$0xff] %v3550_v33 }

</bundles_post_ra>
